<compile_context>
chip_gen: v7x
topology: tpu7x:2x2x1
jax: 0.10.0
libtpu: 0.0.40
codegen_flags: <defaults>
</compile_context>

<pallas_src>
import jax
import jax.numpy as jnp
from jax.experimental import pallas as pl
from jax.experimental.pallas import tpu as pltpu

INPUT_SIZE = 784
HIDDEN_DIM = 1500
OUTPUT_DIM = 10

# Lane-aligned (multiple-of-128) padded sizes.
K_PAD = 896     # 7 * 128
H_PAD = 1536    # 12 * 128
N_PAD = 128     # 1 * 128


def _round_up(x, m):
    return ((x + m - 1) // m) * m


def mlp_kernel(x_ref, w1_ref, b1_ref, w2_ref, b2_ref, o_ref):
    # First linear (bf16 MXU matmul, f32 accumulation) + bias + ReLU in f32.
    h = jnp.dot(x_ref[...], w1_ref[...], preferred_element_type=jnp.float32)
    h = jnp.maximum(h + b1_ref[...], 0.0)
    # Second linear + bias + Sigmoid; lane-dense (TM, 128) output store.
    z = jnp.dot(h.astype(jnp.bfloat16), w2_ref[...],
                preferred_element_type=jnp.float32)
    z = z + b2_ref[...]
    o_ref[...] = jax.nn.sigmoid(z).astype(o_ref.dtype)


def mlp_forward(x, w1, b1, w2, b2, *, tm_max=512):
    """x: any shape whose trailing dims flatten to 784 per row (e.g. (B,1,28,28))."""
    x2 = x.reshape(-1, INPUT_SIZE).astype(jnp.float32)
    B = x2.shape[0]

    # One-time padding to lane-aligned layouts; zeros do not change the math.
    x_p = jnp.pad(x2, ((0, 0), (0, K_PAD - INPUT_SIZE))).astype(jnp.bfloat16)
    w1_p = jnp.pad(w1.astype(jnp.float32),
                   ((0, K_PAD - INPUT_SIZE), (0, H_PAD - HIDDEN_DIM))
                   ).astype(jnp.bfloat16)
    b1_p = jnp.pad(b1.astype(jnp.float32),
                   (0, H_PAD - HIDDEN_DIM)).reshape(1, H_PAD)
    w2_p = jnp.pad(w2.astype(jnp.float32),
                   ((0, H_PAD - HIDDEN_DIM), (0, N_PAD - OUTPUT_DIM))
                   ).astype(jnp.bfloat16)
    b2_p = jnp.pad(b2.astype(jnp.float32),
                   (0, N_PAD - OUTPUT_DIM)).reshape(1, N_PAD)

    # Batch tiling: TM rows per grid step, weights resident across steps.
    tm = min(tm_max, _round_up(B, 8))
    b_pad = _round_up(B, tm)
    if b_pad != B:
        x_p = jnp.pad(x_p, ((0, b_pad - B), (0, 0)))
    grid = (b_pad // tm,)

    out = pl.pallas_call(
        mlp_kernel,
        out_shape=jax.ShapeDtypeStruct((b_pad, N_PAD), jnp.float32),
        grid_spec=pltpu.PrefetchScalarGridSpec(
            num_scalar_prefetch=0,
            grid=grid,
            in_specs=[
                pl.BlockSpec((tm, K_PAD), lambda i: (i, 0)),      # x tile
                pl.BlockSpec((K_PAD, H_PAD), lambda i: (0, 0)),   # W1 (resident)
                pl.BlockSpec((1, H_PAD), lambda i: (0, 0)),       # b1 (resident)
                pl.BlockSpec((H_PAD, N_PAD), lambda i: (0, 0)),   # W2 (resident)
                pl.BlockSpec((1, N_PAD), lambda i: (0, 0)),       # b2 (resident)
            ],
            out_specs=pl.BlockSpec((tm, N_PAD), lambda i: (i, 0)),
        ),
        compiler_params=pltpu.CompilerParams(
            dimension_semantics=("parallel",),
            vmem_limit_bytes=32 << 20,
        ),
    )(x_p, w1_p, b1_p, w2_p, b2_p)

    return out[:B, :OUTPUT_DIM]


def init_params(key):
    k1, k2, k3, k4 = jax.random.split(key, 4)
    # Deterministic synthetic init (uniform, roughly PyTorch Linear scale).
    lim1 = 1.0 / (INPUT_SIZE ** 0.5)
    lim2 = 1.0 / (HIDDEN_DIM ** 0.5)
    w1 = jax.random.uniform(k1, (INPUT_SIZE, HIDDEN_DIM), jnp.float32, -lim1, lim1)
    b1 = jax.random.uniform(k2, (HIDDEN_DIM,), jnp.float32, -lim1, lim1)
    w2 = jax.random.uniform(k3, (HIDDEN_DIM, OUTPUT_DIM), jnp.float32, -lim2, lim2)
    b2 = jax.random.uniform(k4, (OUTPUT_DIM,), jnp.float32, -lim2, lim2)
    return w1, b1, w2, b2


def _reference(x, w1, b1, w2, b2):
    x2 = x.reshape(-1, INPUT_SIZE).astype(jnp.float32)
    return jax.nn.sigmoid(jnp.maximum(x2 @ w1 + b1, 0.0) @ w2 + b2)


if __name__ == "__main__":
    key = jax.random.PRNGKey(0)
    kx, kp, kx2 = jax.random.split(key, 3)
    w1, b1, w2, b2 = init_params(kp)

    # MNIST-like input: (batch=8, 1, 28, 28) -> view(-1, 784); single grid step.
    x = jax.random.normal(kx, (8, 1, 28, 28), jnp.float32)
    out = jax.block_until_ready(mlp_forward(x, w1, b1, w2, b2))
    ref = _reference(x, w1, b1, w2, b2)
    assert out.shape == (8, OUTPUT_DIM)
    assert jnp.allclose(out, ref, atol=1e-2)  # bf16 matmul vs f32 reference

    # Exercise the batch grid (multiple tiles + row padding): B=272, TM=128 -> grid=3.
    xb = jax.random.normal(kx2, (272, 1, 28, 28), jnp.float32)
    outb = jax.block_until_ready(mlp_forward(xb, w1, b1, w2, b2, tm_max=128))
    refb = _reference(xb, w1, b1, w2, b2)
    assert outb.shape == (272, OUTPUT_DIM)
    assert jnp.allclose(outb, refb, atol=1e-2)

    print("KERNEL_OK")
</pallas_src>

<mosaic_0001>
module attributes {stable_mosaic.version = 11 : i64} {
  func.func @mlp_kernel(%arg0: i32, %arg1: memref<8x896xbf16, #tpu.memory_space<vmem>>, %arg2: memref<896x1536xbf16, #tpu.memory_space<vmem>>, %arg3: memref<1x1536xf32, #tpu.memory_space<vmem>>, %arg4: memref<1536x128xbf16, #tpu.memory_space<vmem>>, %arg5: memref<1x128xf32, #tpu.memory_space<vmem>>, %arg6: memref<8x128xf32, #tpu.memory_space<vmem>>) attributes {dimension_semantics = [#tpu.dimension_semantics<parallel>], iteration_bounds = array<i64: 1>, scalar_prefetch = 0 : i64, scratch_operands = 0 : i64, tpu.core_type = #tpu.core_type<tc>, window_params = [{transform_indices = @transform_0, window_bounds = array<i64: 8, 896>}, {pipeline_mode = #tpu.pipeline_mode<synchronous>, transform_indices = @transform_1, window_bounds = array<i64: 896, 1536>}, {pipeline_mode = #tpu.pipeline_mode<synchronous>, transform_indices = @transform_2, window_bounds = array<i64: 1, 1536>}, {pipeline_mode = #tpu.pipeline_mode<synchronous>, transform_indices = @transform_3, window_bounds = array<i64: 1536, 128>}, {pipeline_mode = #tpu.pipeline_mode<synchronous>, transform_indices = @transform_4, window_bounds = array<i64: 1, 128>}, {transform_indices = @transform_5, window_bounds = array<i64: 8, 128>}]} {
    %c0 = arith.constant 0 : index
    %c0_0 = arith.constant 0 : index
    %0 = vector.load %arg1[%c0, %c0_0] : memref<8x896xbf16, #tpu.memory_space<vmem>>, vector<8x896xbf16>
    %c0_1 = arith.constant 0 : index
    %c0_2 = arith.constant 0 : index
    %1 = vector.load %arg2[%c0_1, %c0_2] : memref<896x1536xbf16, #tpu.memory_space<vmem>>, vector<896x1536xbf16>
    %cst = arith.constant dense<0.000000e+00> : vector<8x1536xf32>
    %2 = tpu.matmul %0, %1, %cst {dimension_numbers = #tpu.dot_dimension_numbers<[1], [0], [0], [1], [0, 0, 1, 1], [], []>} : vector<8x896xbf16>, vector<896x1536xbf16>, vector<8x1536xf32> -> vector<8x1536xf32>
    %c0_3 = arith.constant 0 : index
    %c0_4 = arith.constant 0 : index
    %3 = vector.load %arg3[%c0_3, %c0_4] : memref<1x1536xf32, #tpu.memory_space<vmem>>, vector<1x1536xf32>
    %4 = vector.broadcast %3 : vector<1x1536xf32> to vector<8x1536xf32>
    %5 = arith.addf %2, %4 : vector<8x1536xf32>
    %cst_5 = arith.constant 0.000000e+00 : f32
    %6 = vector.broadcast %cst_5 : f32 to vector<8x1536xf32>
    %7 = arith.maximumf %5, %6 : vector<8x1536xf32>
    %8 = arith.truncf %7 : vector<8x1536xf32> to vector<8x1536xbf16>
    %c0_6 = arith.constant 0 : index
    %c0_7 = arith.constant 0 : index
    %9 = vector.load %arg4[%c0_6, %c0_7] : memref<1536x128xbf16, #tpu.memory_space<vmem>>, vector<1536x128xbf16>
    %cst_8 = arith.constant dense<0.000000e+00> : vector<8x128xf32>
    %10 = tpu.matmul %8, %9, %cst_8 {dimension_numbers = #tpu.dot_dimension_numbers<[1], [0], [0], [1], [0, 0, 1, 1], [], []>} : vector<8x1536xbf16>, vector<1536x128xbf16>, vector<8x128xf32> -> vector<8x128xf32>
    %c0_9 = arith.constant 0 : index
    %c0_10 = arith.constant 0 : index
    %11 = vector.load %arg5[%c0_9, %c0_10] : memref<1x128xf32, #tpu.memory_space<vmem>>, vector<1x128xf32>
    %12 = vector.broadcast %11 : vector<1x128xf32> to vector<8x128xf32>
    %13 = arith.addf %10, %12 : vector<8x128xf32>
    %14 = arith.negf %13 : vector<8x128xf32>
    %15 = math.exp %14 : vector<8x128xf32>
    %cst_11 = arith.constant 1.000000e+00 : f32
    %16 = vector.broadcast %cst_11 : f32 to vector<8x128xf32>
    %17 = arith.addf %16, %15 : vector<8x128xf32>
    %18 = arith.divf %16, %17 : vector<8x128xf32>
    %c0_12 = arith.constant 0 : index
    %c0_13 = arith.constant 0 : index
    %19 = vector.load %arg6[%c0_12, %c0_13] : memref<8x128xf32, #tpu.memory_space<vmem>>, vector<8x128xf32>
    tpu.vector_store %arg6[%c0_12, %c0_13], %18 {strides = array<i32>} : memref<8x128xf32, #tpu.memory_space<vmem>>, vector<8x128xf32>,
    return
  }
  func.func @transform_0(%arg0: i32) -> (i32, i32) {
    %c0_i32 = arith.constant 0 : i32
    %c0_i32_0 = arith.constant 0 : i32
    return %arg0, %c0_i32 : i32, i32
  }
  func.func @transform_1(%arg0: i32) -> (i32, i32) {
    %c0_i32 = arith.constant 0 : i32
    %c0_i32_0 = arith.constant 0 : i32
    %c0_i32_1 = arith.constant 0 : i32
    return %c0_i32, %c0_i32_0 : i32, i32
  }
  func.func @transform_2(%arg0: i32) -> (i32, i32) {
    %c0_i32 = arith.constant 0 : i32
    %c0_i32_0 = arith.constant 0 : i32
    %c0_i32_1 = arith.constant 0 : i32
    return %c0_i32, %c0_i32_0 : i32, i32
  }
  func.func @transform_3(%arg0: i32) -> (i32, i32) {
    %c0_i32 = arith.constant 0 : i32
    %c0_i32_0 = arith.constant 0 : i32
    %c0_i32_1 = arith.constant 0 : i32
    return %c0_i32, %c0_i32_0 : i32, i32
  }
  func.func @transform_4(%arg0: i32) -> (i32, i32) {
    %c0_i32 = arith.constant 0 : i32
    %c0_i32_0 = arith.constant 0 : i32
    %c0_i32_1 = arith.constant 0 : i32
    return %c0_i32, %c0_i32_0 : i32, i32
  }
  func.func @transform_5(%arg0: i32) -> (i32, i32) {
    %c0_i32 = arith.constant 0 : i32
    %c0_i32_0 = arith.constant 0 : i32
    return %arg0, %c0_i32 : i32, i32
  }
}

</mosaic_0001>

<bundles_post_ra>
// kernel: tpu_custom_call.1
= control target key start
LH: loop header
LB: loop body
LE: loop exit
PB: predicated region body
PF: predicated region fallthrough
CT: control target
= control target key end

     0   :  { %10 = vsyncpa [#allocation3], 0  ;;  %s8759_s0 = inlined_call_operand.hbm [shape: bf16[8,896], index: 0, kind: input, shape index: {}]   ;;  %s8760_s1 = inlined_call_operand.hbm [shape: bf16[896,1536], index: 1, kind: input, shape index: {}]   ;;  %s8761_s2 = inlined_call_operand.hbm [shape: f32[1,1536], index: 2, kind: input, shape index: {}]   ;;  %s8762_s3 = inlined_call_operand.hbm [shape: bf16[1536,128], index: 3, kind: input, shape index: {}]   ;;  %s8763_s4 = inlined_call_operand.hbm [shape: f32[1,128], index: 4, kind: input, shape index: {}]   ;;  %s8764_s5 = inlined_call_operand.hbm [shape: f32[8,128], index: 5, kind: output, shape index: {}]  }
   0x1   :  { %11 = vsyncpa [#allocation6], 0 }
   0x2   :  { %12 = vsyncpa [#allocation9], 0 }
   0x3   :  { %13 = vsyncpa [#allocation4], 0  ;;  %s8517_s18 = smov [#allocation5]   ;;  %s8377_s22 = scalar_lea.hbm %s8760_s1, 86016 }
   0x4   :  { %s29_s19 = sshll.u32 %s8517_s18, 4  ;;  %p8378_p0 = scmp.ne.s32.totalorder %s8760_s1, %s8377_s22  ;;  %s30_s19 = int_to_ptr.vmem [resolvable:$true] %s29_s19 }
   0x5   :  { %p8381_p1 = scmp.lt.u32.totalorder %s8377_s22, %s8760_s1 }
   0x7   :  { %p8383_p2 = pnand %p8381_p1, %p8378_p0 }
   0x9   :  { %8386 = shalt.err (!%p8383_p2)
}
   0xa   :  { %s8387_s27 = scalar_lea.vmem %s30_s19, 86016  ;;  %p8392_p4 = scmp.lt.s32.totalorder %s30_s19, %s30_s19 }
   0xb   :  { %p8388_p3 = scmp.ne.s32.totalorder %s30_s19, %s8387_s27  ;;  %p8393_p5 = scmp.lt.s32.totalorder %s8387_s27, %s8387_s27 }
   0xd   :  { %p8394_p6 = por %p8393_p5, %p8392_p4 }
   0xf   :  { %p8395_p7 = pnand %p8394_p6, %p8388_p3 }
  0x11   :  { %8398 = shalt.err (!%p8395_p7)
}
  0x12   :  { %s8518_s28 = smov 768   ;;  %s8519_s29 = smov 48  }
  0x13   :  { %35 = dma.hbm_to_vmem [thread:$0]  %s8760_s1, 86016, %s30_s19, [#allocation6], %s8518_s28, %s8518_s28, %s8519_s29  }
  0x14   :  { %s8520_s7 = smov [#allocation8]   ;;  %s8399_s11 = scalar_lea.hbm %s8762_s3, 12288 }
  0x15   :  { %s51_s8 = sshll.u32 %s8520_s7, 4  ;;  %p8400_p8 = scmp.ne.s32.totalorder %s8762_s3, %s8399_s11  ;;  %s52_s8 = int_to_ptr.vmem [resolvable:$true] %s51_s8 }
  0x16   :  { %p8403_p9 = scmp.lt.u32.totalorder %s8399_s11, %s8762_s3 }
  0x18   :  { %p8405_p10 = pnand %p8403_p9, %p8400_p8 }
  0x1a   :  { %8408 = shalt.err (!%p8405_p10)
}
  0x1b   :  { %s8409_s16 = scalar_lea.vmem %s52_s8, 12288  ;;  %p8414_p12 = scmp.lt.s32.totalorder %s52_s8, %s52_s8 }
  0x1c   :  { %p8410_p11 = scmp.ne.s32.totalorder %s52_s8, %s8409_s16  ;;  %p8415_p13 = scmp.lt.s32.totalorder %s8409_s16, %s8409_s16 }
  0x1e   :  { %p8416_p0 = por %p8415_p13, %p8414_p12 }
  0x20   :  { %p8417_p1 = pnand %p8416_p0, %p8410_p11 }
  0x22   :  { %8420 = shalt.err (!%p8417_p1)
}
  0x23   :  { %s8521_s1 = smov 64   ;;  %s8522_s17 = smov 4  }
  0x24   :  { %57 = dma.hbm_to_vmem [thread:$0]  %s8762_s3, 12288, %s52_s8, [#allocation9], %s8521_s1, %s8521_s1, %s8522_s17  }
  0x25   :  { %s8523_s20 = smov [#allocation2]   ;;  %s8524_s22 = smov [#allocation7]  }
  0x26   :  { %s20_s21 = sshll.u32 %s8523_s20, 4  ;;  %s42_s23 = sshll.u32 %s8524_s22, 4  ;;  %s21_s21 = int_to_ptr.vmem [resolvable:$true] %s20_s21  ;;  %s43_s23 = int_to_ptr.vmem [resolvable:$true] %s42_s23 }
  0x27   :  { %s8421_s26 = scalar_lea.hbm %s8759_s0, 448 }
  0x28   :  { %p8422_p2 = scmp.ne.s32.totalorder %s8759_s0, %s8421_s26  ;;  %p8425_p3 = scmp.lt.u32.totalorder %s8421_s26, %s8759_s0 }
  0x2a   :  { %p8427_p4 = pnand %p8425_p3, %p8422_p2 }
  0x2c   :  { %8430 = shalt.err (!%p8427_p4)
}
  0x2d   :  { %s8431_s3 = scalar_lea.vmem %s21_s21, 448  ;;  %p8436_p6 = scmp.lt.s32.totalorder %s21_s21, %s21_s21 }
  0x2e   :  { %p8432_p5 = scmp.ne.s32.totalorder %s21_s21, %s8431_s3  ;;  %p8437_p7 = scmp.lt.s32.totalorder %s8431_s3, %s8431_s3 }
  0x30   :  { %p8438_p8 = por %p8437_p7, %p8436_p6 }
  0x32   :  { %p8439_p9 = pnand %p8438_p8, %p8432_p5 }
  0x34   :  { %8442 = shalt.err (!%p8439_p9)
}
  0x35   :  { %23 = dma.hbm_to_vmem [thread:$0]  %s8759_s0, 448, %s21_s21, [#allocation3]  }
  0x36   :  { %s8443_s10 = scalar_lea.hbm %s8761_s2, 192 }
  0x37   :  { %p8444_p10 = scmp.ne.s32.totalorder %s8761_s2, %s8443_s10  ;;  %p8447_p11 = scmp.lt.u32.totalorder %s8443_s10, %s8761_s2 }
  0x39   :  { %p8449_p12 = pnand %p8447_p11, %p8444_p10 }
  0x3b   :  { %8452 = shalt.err (!%p8449_p12)
}
  0x3c   :  { %s8453_s15 = scalar_lea.vmem %s43_s23, 192  ;;  %p8458_p0 = scmp.lt.s32.totalorder %s43_s23, %s43_s23 }
  0x3d   :  { %p8454_p13 = scmp.ne.s32.totalorder %s43_s23, %s8453_s15  ;;  %p8459_p1 = scmp.lt.s32.totalorder %s8453_s15, %s8453_s15 }
  0x3f   :  { %p8460_p2 = por %p8459_p1, %p8458_p0 }
  0x41   :  { %p8461_p3 = pnand %p8460_p2, %p8454_p13 }
  0x43   :  { %8464 = shalt.err (!%p8461_p3)
}
  0x44   :  { %45 = dma.hbm_to_vmem [thread:$0]  %s8761_s2, 192, %s43_s23, [#allocation6]  }
  0x45   :  { %s8525_s1 = smov [#allocation10]   ;;  %s8465_s20 = scalar_lea.hbm %s8763_s4, 16 }
  0x46   :  { %s64_s17 = sshll.u32 %s8525_s1, 4  ;;  %p8466_p4 = scmp.ne.s32.totalorder %s8763_s4, %s8465_s20  ;;  %s65_s17 = int_to_ptr.vmem [resolvable:$true] %s64_s17 }
  0x47   :  { %p8469_p5 = scmp.lt.u32.totalorder %s8465_s20, %s8763_s4 }
  0x49   :  { %p8471_p6 = pnand %p8469_p5, %p8466_p4 }
  0x4b   :  { %8474 = shalt.err (!%p8471_p6)
}
  0x4c   :  { %s8475_s26 = scalar_lea.vmem %s65_s17, 16  ;;  %s8479_s2 = scalar_lea.vmem %s65_s17, 32 }
  0x4d   :  { %p8476_p7 = scmp.ne.s32.totalorder %s65_s17, %s8475_s26  ;;  %p8480_p8 = scmp.lt.s32.totalorder %s65_s17, %s65_s17 }
  0x4e   :  { %p8481_p9 = scmp.lt.s32.totalorder %s8479_s2, %s8475_s26 }
  0x50   :  { %p8482_p10 = por %p8481_p9, %p8480_p8 }
  0x52   :  { %p8483_p11 = pnand %p8482_p10, %p8476_p7 }
  0x54   :  { %8486 = shalt.err (!%p8483_p11)
}
  0x55   :  { %67 = dma.hbm_to_vmem [thread:$0]  %s8763_s4, 16, %s65_s17, [#allocation9]  }
  0x56   :  { %8509 = dma.done.wait [#allocation3], 448  }
  0x57   :  { %8510 = vsyncadd [#allocation3], 4294966848 }
  0x58   :  { %8511 = dma.done.wait [#allocation6], 86208  }
  0x59   :  { %8512 = vsyncadd [#allocation6], 4294881088 }
  0x5a   :  { %8513 = dma.done.wait [#allocation9], 12304  }
  0x5b   :  { %8514 = vsyncadd [#allocation9], 4294954992  ;;  %v7260_v0 = vld [vmem:[#allocation5 + $0x4] ss:$48 sps:$4 sm:$0xff]   ;;  %v7262_v1 = vld [vmem:[#allocation5 + $0xc] ss:$48 sps:$4 sm:$0xff]  }
  0x5c   :  { %4209 = vmatprep.subr.bf16.mxu0 %v7260_v0  ;;  %v7264_v2 = vld [vmem:[#allocation5] ss:$48 sps:$4 sm:$0xff]   ;;  %v7265_v3 = vld [vmem:[#allocation5 + $0x8] ss:$48 sps:$4 sm:$0xff]   ;;  %4373 = vmatprep.subr.bf16.mxu1 %v7262_v1  ;;  %v7266_v4 = vld [vmem:[#allocation5 + $0x64] ss:$48 sps:$4 sm:$0xff]  }
  0x5d   :  { %4210 = vmatpush1.bf16.msra.mxu0 %v7264_v2  ;;  %4374 = vmatpush1.bf16.msra.mxu1 %v7265_v3  ;;  %v7268_v5 = vld [vmem:[#allocation5 + $0x6c] ss:$48 sps:$4 sm:$0xff]   ;;  %v7270_v6 = vld [vmem:[#allocation5 + $0x60] ss:$48 sps:$4 sm:$0xff]   ;;  %v7271_v7 = vld [vmem:[#allocation5 + $0x68] ss:$48 sps:$4 sm:$0xff]  }
  0x5e   :  { %4211 = vmatprep.subr.bf16.mxu0 %v7266_v4  ;;  %4375 = vmatprep.subr.bf16.mxu1 %v7268_v5  ;;  %v7272_v8 = vld [vmem:[#allocation5 + $0xc4] ss:$48 sps:$4 sm:$0xff]   ;;  %v7274_v9 = vld [vmem:[#allocation5 + $0xcc] ss:$48 sps:$4 sm:$0xff]   ;;  %v7276_v10 = vld [vmem:[#allocation5 + $0xc0] ss:$48 sps:$4 sm:$0xff]  }
  0x5f   :  { %v7277_v11 = vld [vmem:[#allocation5 + $0xc8] ss:$48 sps:$4 sm:$0xff]   ;;  %v7278_v12 = vld [vmem:[#allocation5 + $0x124] ss:$48 sps:$4 sm:$0xff]   ;;  %v7280_v13 = vld [vmem:[#allocation5 + $0x12c] ss:$48 sps:$4 sm:$0xff]  }
  0x60   :  { %v7282_v14 = vld [vmem:[#allocation5 + $0x120] ss:$48 sps:$4 sm:$0xff]   ;;  %v7283_v15 = vld [vmem:[#allocation5 + $0x128] ss:$48 sps:$4 sm:$0xff]   ;;  %v7284_v16 = vld [vmem:[#allocation5 + $0x184] ss:$48 sps:$4 sm:$0xff]  }
  0x61   :  { %4212 = vmatpush1.bf16.msra.mxu0 %v7270_v6  ;;  %4376 = vmatpush1.bf16.msra.mxu1 %v7271_v7  ;;  %v7286_v17 = vld [vmem:[#allocation5 + $0x18c] ss:$48 sps:$4 sm:$0xff]   ;;  %v7288_v18 = vld [vmem:[#allocation5 + $0x180] ss:$48 sps:$4 sm:$0xff]   ;;  %v7289_v19 = vld [vmem:[#allocation5 + $0x188] ss:$48 sps:$4 sm:$0xff]  }
  0x62   :  { %4213 = vmatprep.subr.bf16.mxu0 %v7272_v8  ;;  %4377 = vmatprep.subr.bf16.mxu1 %v7274_v9  ;;  %v7290_v20 = vld [vmem:[#allocation5 + $0x1e4] ss:$48 sps:$4 sm:$0xff]   ;;  %v7292_v21 = vld [vmem:[#allocation5 + $0x1ec] ss:$48 sps:$4 sm:$0xff]   ;;  %v7294_v22 = vld [vmem:[#allocation5 + $0x1e0] ss:$48 sps:$4 sm:$0xff]  }
  0x63   :  { %v7295_v23 = vld [vmem:[#allocation5 + $0x1e8] ss:$48 sps:$4 sm:$0xff]   ;;  %v7296_v24 = vld [vmem:[#allocation5 + $0x244] ss:$48 sps:$4 sm:$0xff]   ;;  %v7298_v25 = vld [vmem:[#allocation5 + $0x24c] ss:$48 sps:$4 sm:$0xff]  }
  0x64   :  { %v7300_v26 = vld [vmem:[#allocation5 + $0x240] ss:$48 sps:$4 sm:$0xff]   ;;  %v7301_v27 = vld [vmem:[#allocation5 + $0x248] ss:$48 sps:$4 sm:$0xff]   ;;  %v7302_v28 = vld [vmem:[#allocation5 + $0x2a4] ss:$48 sps:$4 sm:$0xff]  }
  0x65   :  { %4214 = vmatpush1.bf16.msra.mxu0 %v7276_v10  ;;  %4378 = vmatpush1.bf16.msra.mxu1 %v7277_v11  ;;  %v7304_v29 = vld [vmem:[#allocation5 + $0x2ac] ss:$48 sps:$4 sm:$0xff]   ;;  %v7306_v30 = vld [vmem:[#allocation5 + $0x2a0] ss:$48 sps:$4 sm:$0xff]   ;;  %v7307_v31 = vld [vmem:[#allocation5 + $0x2a8] ss:$48 sps:$4 sm:$0xff]  }
  0x66   :  { %4215 = vmatprep.subr.bf16.mxu0 %v7278_v12  ;;  %4379 = vmatprep.subr.bf16.mxu1 %v7280_v13  ;;  %v7308_v32 = vld [vmem:[#allocation5 + $0x304] ss:$48 sps:$4 sm:$0xff]   ;;  %v7310_v33 = vld [vmem:[#allocation5 + $0x30c] ss:$48 sps:$4 sm:$0xff]   ;;  %v7312_v34 = vld [vmem:[#allocation5 + $0x300] ss:$48 sps:$4 sm:$0xff]  }
  0x67   :  { %v7313_v35 = vld [vmem:[#allocation5 + $0x308] ss:$48 sps:$4 sm:$0xff]   ;;  %v7314_v36 = vld [vmem:[#allocation5 + $0x364] ss:$48 sps:$4 sm:$0xff]   ;;  %v7316_v37 = vld [vmem:[#allocation5 + $0x36c] ss:$48 sps:$4 sm:$0xff]  }
  0x68   :  { %v7318_v38 = vld [vmem:[#allocation5 + $0x360] ss:$48 sps:$4 sm:$0xff]   ;;  %v7319_v39 = vld [vmem:[#allocation5 + $0x368] ss:$48 sps:$4 sm:$0xff]   ;;  %v7320_v40 = vld [vmem:[#allocation5 + $0x3c4] ss:$48 sps:$4 sm:$0xff]  }
  0x69   :  { %4216 = vmatpush1.bf16.msra.mxu0 %v7282_v14  ;;  %4380 = vmatpush1.bf16.msra.mxu1 %v7283_v15  ;;  %v7322_v41 = vld [vmem:[#allocation5 + $0x3cc] ss:$48 sps:$4 sm:$0xff]   ;;  %v7324_v42 = vld [vmem:[#allocation5 + $0x3c0] ss:$48 sps:$4 sm:$0xff]   ;;  %v7325_v43 = vld [vmem:[#allocation5 + $0x3c8] ss:$48 sps:$4 sm:$0xff]  }
  0x6a   :  { %4217 = vmatprep.subr.bf16.mxu0 %v7284_v16  ;;  %4381 = vmatprep.subr.bf16.mxu1 %v7286_v17  ;;  %v7326_v44 = vld [vmem:[#allocation5 + $0x424] ss:$48 sps:$4 sm:$0xff]   ;;  %v7328_v45 = vld [vmem:[#allocation5 + $0x42c] ss:$48 sps:$4 sm:$0xff]   ;;  %v7330_v47 = vld [vmem:[#allocation5 + $0x420] ss:$48 sps:$4 sm:$0xff]  }
  0x6b   :  { %v84_v46 = vld [vmem:[#allocation2] sm:$0xff]  ;;  %v7334_v51 = vld [vmem:[#allocation5 + $0x48c] ss:$48 sps:$4 sm:$0xff]   ;;  %v7336_v52 = vld [vmem:[#allocation5 + $0x480] ss:$48 sps:$4 sm:$0xff]   ;;  %s8527_s4 = smov [#allocation11]  }
  0x6c   :  { %v8618_v48 = vcombine.high %v84_v46, %v84_v46  ;;  %v7331_v49 = vld [vmem:[#allocation5 + $0x428] ss:$48 sps:$4 sm:$0xff]   ;;  %v7332_v50 = vld [vmem:[#allocation5 + $0x484] ss:$48 sps:$4 sm:$0xff]   ;;  %v7340_v55 = vld [vmem:[#allocation5 + $0x4ec] ss:$48 sps:$4 sm:$0xff]   ;;  %v8622_v5 = vcombine.low %v84_v46, %v84_v46 }
  0x6d   :  { %4218 = vmatpush1.bf16.msra.mxu0 %v7288_v18  ;;  %4382 = vmatpush1.bf16.msra.mxu1 %v7289_v19  ;;  %v7337_v53 = vld [vmem:[#allocation5 + $0x488] ss:$48 sps:$4 sm:$0xff]   ;;  %v7338_v54 = vld [vmem:[#allocation5 + $0x4e4] ss:$48 sps:$4 sm:$0xff]   ;;  %v7342_v56 = vld [vmem:[#allocation5 + $0x4e0] ss:$48 sps:$4 sm:$0xff]  }
  0x6e   :  { %4219 = vmatprep.subr.bf16.mxu0 %v7290_v20  ;;  %4383 = vmatprep.subr.bf16.mxu1 %v7292_v21  ;;  %v7343_v57 = vld [vmem:[#allocation5 + $0x4e8] ss:$48 sps:$4 sm:$0xff]   ;;  %v7344_v58 = vld [vmem:[#allocation5 + $0x544] ss:$48 sps:$4 sm:$0xff]   ;;  %v7346_v59 = vld [vmem:[#allocation5 + $0x54c] ss:$48 sps:$4 sm:$0xff]  }
  0x6f   :  { %4241 = vmatprep.mubr.bf16.mxu0 %v8618_v48  ;;  %4405 = vmatprep.mubr.bf16.mxu1 %v8618_v48  ;;  %v7348_v60 = vld [vmem:[#allocation5 + $0x540] ss:$48 sps:$4 sm:$0xff]   ;;  %v7349_v61 = vld [vmem:[#allocation5 + $0x548] ss:$48 sps:$4 sm:$0xff]   ;;  %v7350_v62 = vld [vmem:[#allocation5 + $0x5a4] ss:$48 sps:$4 sm:$0xff]  }
  0x70   :  { %v7352_v63 = vld [vmem:[#allocation5 + $0x5ac] ss:$48 sps:$4 sm:$0xff]   ;;  %v7354_v0 = vld [vmem:[#allocation5 + $0x5a0] ss:$48 sps:$4 sm:$0xff]   ;;  %v7355_v1 = vld [vmem:[#allocation5 + $0x5a8] ss:$48 sps:$4 sm:$0xff]  }
  0x71   :  { %4220 = vmatpush1.bf16.msra.mxu0 %v7294_v22  ;;  %4384 = vmatpush1.bf16.msra.mxu1 %v7295_v23  ;;  %v7359_v2 = vld [vmem:[#allocation5 + $0x604] ss:$48 sps:$4 sm:$0xff]   ;;  %v7362_v3 = vld [vmem:[#allocation5 + $0x60c] ss:$48 sps:$4 sm:$0xff]   ;;  %v7357_v4 = vld [vmem:[#allocation5 + $0x600] ss:$48 sps:$4 sm:$0xff]  }
  0x72   :  { %4221 = vmatprep.subr.bf16.mxu0 %v7296_v24  ;;  %4385 = vmatprep.subr.bf16.mxu1 %v7298_v25  ;;  %v7360_v6 = vld [vmem:[#allocation5 + $0x608] ss:$48 sps:$4 sm:$0xff]   ;;  %v7366_v7 = vld [vmem:[#allocation5 + $0x664] ss:$48 sps:$4 sm:$0xff]   ;;  %v7369_v8 = vld [vmem:[#allocation5 + $0x66c] ss:$48 sps:$4 sm:$0xff]  }
  0x73   :  { %v7364_v9 = vld [vmem:[#allocation5 + $0x660] ss:$48 sps:$4 sm:$0xff]   ;;  %v7367_v10 = vld [vmem:[#allocation5 + $0x668] ss:$48 sps:$4 sm:$0xff]   ;;  %v7372_v11 = vld [vmem:[#allocation5 + $0x6c4] ss:$48 sps:$4 sm:$0xff]  }
  0x74   :  { %v7375_v12 = vld [vmem:[#allocation5 + $0x6cc] ss:$48 sps:$4 sm:$0xff]   ;;  %v7370_v13 = vld [vmem:[#allocation5 + $0x6c0] ss:$48 sps:$4 sm:$0xff]   ;;  %v7373_v14 = vld [vmem:[#allocation5 + $0x6c8] ss:$48 sps:$4 sm:$0xff]  }
  0x75   :  { %4222 = vmatpush1.bf16.msra.mxu0 %v7300_v26  ;;  %4386 = vmatpush1.bf16.msra.mxu1 %v7301_v27  ;;  %v7378_v15 = vld [vmem:[#allocation5 + $0x724] ss:$48 sps:$4 sm:$0xff]   ;;  %v7381_v16 = vld [vmem:[#allocation5 + $0x72c] ss:$48 sps:$4 sm:$0xff]   ;;  %v7376_v17 = vld [vmem:[#allocation5 + $0x720] ss:$48 sps:$4 sm:$0xff]  }
  0x76   :  { %4223 = vmatprep.subr.bf16.mxu0 %v7302_v28  ;;  %4387 = vmatprep.subr.bf16.mxu1 %v7304_v29  ;;  %v7379_v18 = vld [vmem:[#allocation5 + $0x728] ss:$48 sps:$4 sm:$0xff]   ;;  %v7384_v19 = vld [vmem:[#allocation5 + $0x784] ss:$48 sps:$4 sm:$0xff]   ;;  %v7387_v20 = vld [vmem:[#allocation5 + $0x78c] ss:$48 sps:$4 sm:$0xff]  }
  0x77   :  { %v7382_v21 = vld [vmem:[#allocation5 + $0x780] ss:$48 sps:$4 sm:$0xff]   ;;  %v7385_v22 = vld [vmem:[#allocation5 + $0x788] ss:$48 sps:$4 sm:$0xff]   ;;  %v7390_v23 = vld [vmem:[#allocation5 + $0x7e4] ss:$48 sps:$4 sm:$0xff]  }
  0x78   :  { %v7393_v24 = vld [vmem:[#allocation5 + $0x7ec] ss:$48 sps:$4 sm:$0xff]   ;;  %v7388_v25 = vld [vmem:[#allocation5 + $0x7e0] ss:$48 sps:$4 sm:$0xff]   ;;  %v7391_v26 = vld [vmem:[#allocation5 + $0x7e8] ss:$48 sps:$4 sm:$0xff]  }
  0x79   :  { %4224 = vmatpush1.bf16.msra.mxu0 %v7306_v30  ;;  %4388 = vmatpush1.bf16.msra.mxu1 %v7307_v31  ;;  %v7396_v27 = vld [vmem:[#allocation5 + $0x844] ss:$48 sps:$4 sm:$0xff]   ;;  %v7399_v28 = vld [vmem:[#allocation5 + $0x84c] ss:$48 sps:$4 sm:$0xff]   ;;  %v7394_v31 = vld [vmem:[#allocation5 + $0x840] ss:$48 sps:$4 sm:$0xff]  }
  0x7a   :  { %4225 = vmatprep.subr.bf16.mxu0 %v7308_v32  ;;  %4389 = vmatprep.subr.bf16.mxu1 %v7310_v33  ;;  %v8626_v29 = vld [vmem:[#allocation2 + $0x8] sm:$0xff]  ;;  %v7397_v32 = vld [vmem:[#allocation5 + $0x848] ss:$48 sps:$4 sm:$0xff]   ;;  %v7402_v33 = vld [vmem:[#allocation5 + $0x8a4] ss:$48 sps:$4 sm:$0xff]   ;;  %s6245_s28 = sshll.u32 %s8527_s4, 4  ;;  %s6246_s28 = int_to_ptr.vmem [resolvable:$true] %s6245_s28 }
  0x7b   :  { %v8630_v30 = vcombine.high %v8626_v29, %v8626_v29  ;;  %v7423_v46 = vld [vmem:[#allocation5 + $0x9cc] ss:$48 sps:$4 sm:$0xff]   ;;  %s8487_s29 = scalar_lea.vmem %s6246_s28, 128  ;;  %p8492_p13 = scmp.lt.s32.totalorder %s6246_s28, %s6246_s28 }
  0x7c   :  { %p8488_p12 = scmp.ne.s32.totalorder %s6246_s28, %s8487_s29  ;;  %p8493_p0 = scmp.lt.s32.totalorder %s8487_s29, %s8487_s29 }
  0x7d   :  { %4226 = vmatpush1.bf16.msra.mxu0 %v7312_v34  ;;  %4390 = vmatpush1.bf16.msra.mxu1 %v7313_v35  ;;  %v7405_v34 = vld [vmem:[#allocation5 + $0x8ac] ss:$48 sps:$4 sm:$0xff]   ;;  %v7400_v35 = vld [vmem:[#allocation5 + $0x8a0] ss:$48 sps:$4 sm:$0xff]  }
  0x7e   :  { %4227 = vmatprep.subr.bf16.mxu0 %v7314_v36  ;;  %4391 = vmatprep.subr.bf16.mxu1 %v7316_v37  ;;  %v7403_v36 = vld [vmem:[#allocation5 + $0x8a8] ss:$48 sps:$4 sm:$0xff]   ;;  %v7408_v37 = vld [vmem:[#allocation5 + $0x904] ss:$48 sps:$4 sm:$0xff]   ;;  %p8494_p1 = por %p8493_p0, %p8492_p13 }
  0x80   :  { %p8495_p2 = pnand %p8494_p1, %p8488_p12 }
  0x81   :  { %4228 = vmatpush1.bf16.msra.mxu0 %v7318_v38  ;;  %4392 = vmatpush1.bf16.msra.mxu1 %v7319_v39  ;;  %v7411_v38 = vld [vmem:[#allocation5 + $0x90c] ss:$48 sps:$4 sm:$0xff]   ;;  %v7406_v39 = vld [vmem:[#allocation5 + $0x900] ss:$48 sps:$4 sm:$0xff]  }
  0x82   :  { %4229 = vmatprep.subr.bf16.mxu0 %v7320_v40  ;;  %4393 = vmatprep.subr.bf16.mxu1 %v7322_v41  ;;  %v7409_v40 = vld [vmem:[#allocation5 + $0x908] ss:$48 sps:$4 sm:$0xff]   ;;  %v7414_v41 = vld [vmem:[#allocation5 + $0x964] ss:$48 sps:$4 sm:$0xff]  }
  0x85   :  { %4230 = vmatpush1.bf16.msra.mxu0 %v7324_v42  ;;  %4394 = vmatpush1.bf16.msra.mxu1 %v7325_v43  ;;  %v7417_v42 = vld [vmem:[#allocation5 + $0x96c] ss:$48 sps:$4 sm:$0xff]   ;;  %v7412_v43 = vld [vmem:[#allocation5 + $0x960] ss:$48 sps:$4 sm:$0xff]  }
  0x86   :  { %4231 = vmatprep.subr.bf16.mxu0 %v7326_v44  ;;  %4395 = vmatprep.subr.bf16.mxu1 %v7328_v45  ;;  %v7415_v44 = vld [vmem:[#allocation5 + $0x968] ss:$48 sps:$4 sm:$0xff]   ;;  %v7420_v45 = vld [vmem:[#allocation5 + $0x9c4] ss:$48 sps:$4 sm:$0xff]  }
  0x89   :  { %4232 = vmatpush1.bf16.msra.mxu0 %v7330_v47  ;;  %4396 = vmatpush1.bf16.msra.mxu1 %v7331_v49  ;;  %v7418_v47 = vld [vmem:[#allocation5 + $0x9c0] ss:$48 sps:$4 sm:$0xff]   ;;  %v7421_v49 = vld [vmem:[#allocation5 + $0x9c8] ss:$48 sps:$4 sm:$0xff]  }
  0x8a   :  { %4233 = vmatprep.subr.bf16.mxu0 %v7332_v50  ;;  %4397 = vmatprep.subr.bf16.mxu1 %v7334_v51  ;;  %v7426_v50 = vld [vmem:[#allocation5 + $0xa24] ss:$48 sps:$4 sm:$0xff]   ;;  %v7429_v51 = vld [vmem:[#allocation5 + $0xa2c] ss:$48 sps:$4 sm:$0xff]  }
  0x8d   :  { %4234 = vmatpush1.bf16.msra.mxu0 %v7336_v52  ;;  %4398 = vmatpush1.bf16.msra.mxu1 %v7337_v53  ;;  %v7424_v52 = vld [vmem:[#allocation5 + $0xa20] ss:$48 sps:$4 sm:$0xff]   ;;  %v7427_v53 = vld [vmem:[#allocation5 + $0xa28] ss:$48 sps:$4 sm:$0xff]  }
  0x8e   :  { %4235 = vmatprep.subr.bf16.mxu0 %v7338_v54  ;;  %4399 = vmatprep.subr.bf16.mxu1 %v7340_v55  ;;  %v7432_v54 = vld [vmem:[#allocation5 + $0xa84] ss:$48 sps:$4 sm:$0xff]   ;;  %v7435_v55 = vld [vmem:[#allocation5 + $0xa8c] ss:$48 sps:$4 sm:$0xff]  }
  0x91   :  { %4236 = vmatpush1.bf16.msra.mxu0 %v7342_v56  ;;  %4400 = vmatpush1.bf16.msra.mxu1 %v7343_v57  ;;  %v7430_v56 = vld [vmem:[#allocation5 + $0xa80] ss:$48 sps:$4 sm:$0xff]   ;;  %v7433_v57 = vld [vmem:[#allocation5 + $0xa88] ss:$48 sps:$4 sm:$0xff]  }
  0x92   :  { %4237 = vmatprep.subr.bf16.mxu0 %v7344_v58  ;;  %4401 = vmatprep.subr.bf16.mxu1 %v7346_v59  ;;  %v7438_v58 = vld [vmem:[#allocation5 + $0xae4] ss:$48 sps:$4 sm:$0xff]   ;;  %v7441_v59 = vld [vmem:[#allocation5 + $0xaec] ss:$48 sps:$4 sm:$0xff]  }
  0x95   :  { %4238 = vmatpush1.bf16.msra.mxu0 %v7348_v60  ;;  %4402 = vmatpush1.bf16.msra.mxu1 %v7349_v61  ;;  %v7436_v60 = vld [vmem:[#allocation5 + $0xae0] ss:$48 sps:$4 sm:$0xff]   ;;  %v7439_v61 = vld [vmem:[#allocation5 + $0xae8] ss:$48 sps:$4 sm:$0xff]  }
  0x96   :  { %4239 = vmatprep.subr.bf16.mxu0 %v7350_v62  ;;  %4403 = vmatprep.subr.bf16.mxu1 %v7352_v63  ;;  %v7444_v62 = vld [vmem:[#allocation5 + $0xb44] ss:$48 sps:$4 sm:$0xff]   ;;  %v7447_v63 = vld [vmem:[#allocation5 + $0xb4c] ss:$48 sps:$4 sm:$0xff]  }
  0x99   :  { %4240 = vmatpush1.bf16.msra.mxu0 %v7354_v0  ;;  %4404 = vmatpush1.bf16.msra.mxu1 %v7355_v1  ;;  %v7442_v0 = vld [vmem:[#allocation5 + $0xb40] ss:$48 sps:$4 sm:$0xff]   ;;  %v7445_v1 = vld [vmem:[#allocation5 + $0xb48] ss:$48 sps:$4 sm:$0xff]  }
  0x9a   :  { %4250 = vmatprep.subr.bf16.mxu0 %v7359_v2  ;;  %4414 = vmatprep.subr.bf16.mxu1 %v7362_v3  ;;  %v7450_v2 = vld [vmem:[#allocation5 + $0xba4] ss:$48 sps:$4 sm:$0xff]   ;;  %v7453_v3 = vld [vmem:[#allocation5 + $0xbac] ss:$48 sps:$4 sm:$0xff]  }
  0x9c   :  { %4242 = vmatmul.mubr.bf16.vlgmr.msra.gmra.mrb[0].mxu0 %v8622_v5  ;;  %4406 = vmatmul.mubr.bf16.vlgmr.msra.gmra.mrb[0].mxu1 %v8622_v5 }
  0x9d   :  { %4251 = vmatpush1.bf16.msra.mxu0 %v7357_v4  ;;  %4415 = vmatpush1.bf16.msra.mxu1 %v7360_v6  ;;  %v7448_v4 = vld [vmem:[#allocation5 + $0xba0] ss:$48 sps:$4 sm:$0xff]   ;;  %v7451_v6 = vld [vmem:[#allocation5 + $0xba8] ss:$48 sps:$4 sm:$0xff]  }
  0x9e   :  { %4252 = vmatprep.subr.bf16.mxu0 %v7366_v7  ;;  %4416 = vmatprep.subr.bf16.mxu1 %v7369_v8  ;;  %v7457_v7 = vld [vmem:[#allocation5 + $0xc04] ss:$48 sps:$4 sm:$0xff]   ;;  %v7460_v8 = vld [vmem:[#allocation5 + $0xc0c] ss:$48 sps:$4 sm:$0xff]  }
  0x9f   :  { %4282 = vmatprep.mubr.bf16.mxu0 %v8630_v30  ;;  %4446 = vmatprep.mubr.bf16.mxu1 %v8630_v30 }
  0xa1   :  { %4253 = vmatpush1.bf16.msra.mxu0 %v7364_v9  ;;  %4417 = vmatpush1.bf16.msra.mxu1 %v7367_v10  ;;  %v7455_v9 = vld [vmem:[#allocation5 + $0xc00] ss:$48 sps:$4 sm:$0xff]   ;;  %v8636_v10 = vcombine.low %v8626_v29, %v8626_v29  ;;  %v7483_v29 = vld [vmem:[#allocation5 + $0xd88] ss:$48 sps:$4 sm:$0xff]  }
  0xa2   :  { %4254 = vmatprep.subr.bf16.mxu0 %v7372_v11  ;;  %4418 = vmatprep.subr.bf16.mxu1 %v7375_v12  ;;  %v7458_v11 = vld [vmem:[#allocation5 + $0xc08] ss:$48 sps:$4 sm:$0xff]   ;;  %v7464_v12 = vld [vmem:[#allocation5 + $0xc64] ss:$48 sps:$4 sm:$0xff]  }
  0xa5   :  { %4255 = vmatpush1.bf16.msra.mxu0 %v7370_v13  ;;  %4419 = vmatpush1.bf16.msra.mxu1 %v7373_v14  ;;  %v8638_v13 = vld [vmem:[#allocation2 + $0x10] sm:$0xff]  ;;  %v7467_v14 = vld [vmem:[#allocation5 + $0xc6c] ss:$48 sps:$4 sm:$0xff]  }
  0xa6   :  { %4256 = vmatprep.subr.bf16.mxu0 %v7378_v15  ;;  %4420 = vmatprep.subr.bf16.mxu1 %v7381_v16  ;;  %v8642_v15 = vcombine.high %v8638_v13, %v8638_v13  ;;  %v7462_v16 = vld [vmem:[#allocation5 + $0xc60] ss:$48 sps:$4 sm:$0xff]  }
  0xa9   :  { %4257 = vmatpush1.bf16.msra.mxu0 %v7376_v17  ;;  %4421 = vmatpush1.bf16.msra.mxu1 %v7379_v18  ;;  %v7465_v17 = vld [vmem:[#allocation5 + $0xc68] ss:$48 sps:$4 sm:$0xff]   ;;  %v7470_v18 = vld [vmem:[#allocation5 + $0xcc4] ss:$48 sps:$4 sm:$0xff]  }
  0xaa   :  { %4258 = vmatprep.subr.bf16.mxu0 %v7384_v19  ;;  %4422 = vmatprep.subr.bf16.mxu1 %v7387_v20  ;;  %v7473_v19 = vld [vmem:[#allocation5 + $0xccc] ss:$48 sps:$4 sm:$0xff]   ;;  %v7468_v20 = vld [vmem:[#allocation5 + $0xcc0] ss:$48 sps:$4 sm:$0xff]  }
  0xad   :  { %4259 = vmatpush1.bf16.msra.mxu0 %v7382_v21  ;;  %4423 = vmatpush1.bf16.msra.mxu1 %v7385_v22  ;;  %v7471_v21 = vld [vmem:[#allocation5 + $0xcc8] ss:$48 sps:$4 sm:$0xff]   ;;  %v7476_v22 = vld [vmem:[#allocation5 + $0xd24] ss:$48 sps:$4 sm:$0xff]  }
  0xae   :  { %4260 = vmatprep.subr.bf16.mxu0 %v7390_v23  ;;  %4424 = vmatprep.subr.bf16.mxu1 %v7393_v24  ;;  %v7479_v23 = vld [vmem:[#allocation5 + $0xd2c] ss:$48 sps:$4 sm:$0xff]   ;;  %v7474_v24 = vld [vmem:[#allocation5 + $0xd20] ss:$48 sps:$4 sm:$0xff]  }
  0xb1   :  { %4261 = vmatpush1.bf16.msra.mxu0 %v7388_v25  ;;  %4425 = vmatpush1.bf16.msra.mxu1 %v7391_v26  ;;  %v7477_v25 = vld [vmem:[#allocation5 + $0xd28] ss:$48 sps:$4 sm:$0xff]   ;;  %v7482_v26 = vld [vmem:[#allocation5 + $0xd84] ss:$48 sps:$4 sm:$0xff]  }
  0xb2   :  { %4262 = vmatprep.subr.bf16.mxu0 %v7396_v27  ;;  %4426 = vmatprep.subr.bf16.mxu1 %v7399_v28  ;;  %v7485_v27 = vld [vmem:[#allocation5 + $0xd8c] ss:$48 sps:$4 sm:$0xff]   ;;  %v7480_v28 = vld [vmem:[#allocation5 + $0xd80] ss:$48 sps:$4 sm:$0xff]  }
  0xb5   :  { %4263 = vmatpush1.bf16.msra.mxu0 %v7394_v31  ;;  %4427 = vmatpush1.bf16.msra.mxu1 %v7397_v32  ;;  %v7488_v31 = vld [vmem:[#allocation5 + $0xde4] ss:$48 sps:$4 sm:$0xff]   ;;  %v7491_v32 = vld [vmem:[#allocation5 + $0xdec] ss:$48 sps:$4 sm:$0xff]  }
  0xb6   :  { %4264 = vmatprep.subr.bf16.mxu0 %v7402_v33  ;;  %4428 = vmatprep.subr.bf16.mxu1 %v7405_v34  ;;  %v7486_v33 = vld [vmem:[#allocation5 + $0xde0] ss:$48 sps:$4 sm:$0xff]   ;;  %v7489_v34 = vld [vmem:[#allocation5 + $0xde8] ss:$48 sps:$4 sm:$0xff]  }
  0xb9   :  { %4265 = vmatpush1.bf16.msra.mxu0 %v7400_v35  ;;  %4429 = vmatpush1.bf16.msra.mxu1 %v7403_v36  ;;  %v7494_v35 = vld [vmem:[#allocation5 + $0xe44] ss:$48 sps:$4 sm:$0xff]   ;;  %v7497_v36 = vld [vmem:[#allocation5 + $0xe4c] ss:$48 sps:$4 sm:$0xff]  }
  0xba   :  { %4266 = vmatprep.subr.bf16.mxu0 %v7408_v37  ;;  %4430 = vmatprep.subr.bf16.mxu1 %v7411_v38  ;;  %v7492_v37 = vld [vmem:[#allocation5 + $0xe40] ss:$48 sps:$4 sm:$0xff]   ;;  %v7495_v38 = vld [vmem:[#allocation5 + $0xe48] ss:$48 sps:$4 sm:$0xff]  }
  0xbd   :  { %4267 = vmatpush1.bf16.msra.mxu0 %v7406_v39  ;;  %4431 = vmatpush1.bf16.msra.mxu1 %v7409_v40  ;;  %v7500_v39 = vld [vmem:[#allocation5 + $0xea4] ss:$48 sps:$4 sm:$0xff]   ;;  %v7503_v40 = vld [vmem:[#allocation5 + $0xeac] ss:$48 sps:$4 sm:$0xff]  }
  0xbe   :  { %4268 = vmatprep.subr.bf16.mxu0 %v7414_v41  ;;  %4432 = vmatprep.subr.bf16.mxu1 %v7417_v42  ;;  %v7498_v41 = vld [vmem:[#allocation5 + $0xea0] ss:$48 sps:$4 sm:$0xff]   ;;  %v7501_v42 = vld [vmem:[#allocation5 + $0xea8] ss:$48 sps:$4 sm:$0xff]  }
  0xc1   :  { %4269 = vmatpush1.bf16.msra.mxu0 %v7412_v43  ;;  %4433 = vmatpush1.bf16.msra.mxu1 %v7415_v44  ;;  %v7506_v43 = vld [vmem:[#allocation5 + $0xf04] ss:$48 sps:$4 sm:$0xff]   ;;  %v7509_v44 = vld [vmem:[#allocation5 + $0xf0c] ss:$48 sps:$4 sm:$0xff]  }
  0xc2   :  { %4270 = vmatprep.subr.bf16.mxu0 %v7420_v45  ;;  %4434 = vmatprep.subr.bf16.mxu1 %v7423_v46  ;;  %v7504_v45 = vld [vmem:[#allocation5 + $0xf00] ss:$48 sps:$4 sm:$0xff]   ;;  %v7507_v46 = vld [vmem:[#allocation5 + $0xf08] ss:$48 sps:$4 sm:$0xff]  }
  0xc5   :  { %4271 = vmatpush1.bf16.msra.mxu0 %v7418_v47  ;;  %4435 = vmatpush1.bf16.msra.mxu1 %v7421_v49  ;;  %v7512_v47 = vld [vmem:[#allocation5 + $0xf64] ss:$48 sps:$4 sm:$0xff]   ;;  %v7515_v49 = vld [vmem:[#allocation5 + $0xf6c] ss:$48 sps:$4 sm:$0xff]  }
  0xc6   :  { %4272 = vmatprep.subr.bf16.mxu0 %v7426_v50  ;;  %4436 = vmatprep.subr.bf16.mxu1 %v7429_v51  ;;  %v7510_v50 = vld [vmem:[#allocation5 + $0xf60] ss:$48 sps:$4 sm:$0xff]   ;;  %v7513_v51 = vld [vmem:[#allocation5 + $0xf68] ss:$48 sps:$4 sm:$0xff]  }
  0xc9   :  { %4273 = vmatpush1.bf16.msra.mxu0 %v7424_v52  ;;  %4437 = vmatpush1.bf16.msra.mxu1 %v7427_v53  ;;  %v7518_v52 = vld [vmem:[#allocation5 + $0xfc4] ss:$48 sps:$4 sm:$0xff]   ;;  %v7521_v53 = vld [vmem:[#allocation5 + $0xfcc] ss:$48 sps:$4 sm:$0xff]  }
  0xca   :  { %4274 = vmatprep.subr.bf16.mxu0 %v7432_v54  ;;  %4438 = vmatprep.subr.bf16.mxu1 %v7435_v55  ;;  %v7516_v54 = vld [vmem:[#allocation5 + $0xfc0] ss:$48 sps:$4 sm:$0xff]   ;;  %v7519_v55 = vld [vmem:[#allocation5 + $0xfc8] ss:$48 sps:$4 sm:$0xff]  }
  0xcd   :  { %4275 = vmatpush1.bf16.msra.mxu0 %v7430_v56  ;;  %4439 = vmatpush1.bf16.msra.mxu1 %v7433_v57  ;;  %v7524_v56 = vld [vmem:[#allocation5 + $0x1024] ss:$48 sps:$4 sm:$0xff]   ;;  %v7527_v57 = vld [vmem:[#allocation5 + $0x102c] ss:$48 sps:$4 sm:$0xff]  }
  0xce   :  { %4276 = vmatprep.subr.bf16.mxu0 %v7438_v58  ;;  %4440 = vmatprep.subr.bf16.mxu1 %v7441_v59  ;;  %v7522_v58 = vld [vmem:[#allocation5 + $0x1020] ss:$48 sps:$4 sm:$0xff]   ;;  %v7525_v59 = vld [vmem:[#allocation5 + $0x1028] ss:$48 sps:$4 sm:$0xff]  }
  0xd1   :  { %4277 = vmatpush1.bf16.msra.mxu0 %v7436_v60  ;;  %4441 = vmatpush1.bf16.msra.mxu1 %v7439_v61  ;;  %v7530_v60 = vld [vmem:[#allocation5 + $0x1084] ss:$48 sps:$4 sm:$0xff]   ;;  %v7533_v61 = vld [vmem:[#allocation5 + $0x108c] ss:$48 sps:$4 sm:$0xff]  }
  0xd2   :  { %4278 = vmatprep.subr.bf16.mxu0 %v7444_v62  ;;  %4442 = vmatprep.subr.bf16.mxu1 %v7447_v63  ;;  %v7528_v62 = vld [vmem:[#allocation5 + $0x1080] ss:$48 sps:$4 sm:$0xff]   ;;  %v7531_v63 = vld [vmem:[#allocation5 + $0x1088] ss:$48 sps:$4 sm:$0xff]  }
  0xd5   :  { %4279 = vmatpush1.bf16.msra.mxu0 %v7442_v0  ;;  %4443 = vmatpush1.bf16.msra.mxu1 %v7445_v1  ;;  %v7536_v0 = vld [vmem:[#allocation5 + $0x10e4] ss:$48 sps:$4 sm:$0xff]   ;;  %v7539_v1 = vld [vmem:[#allocation5 + $0x10ec] ss:$48 sps:$4 sm:$0xff]  }
  0xd6   :  { %4280 = vmatprep.subr.bf16.mxu0 %v7450_v2  ;;  %4444 = vmatprep.subr.bf16.mxu1 %v7453_v3  ;;  %v7534_v2 = vld [vmem:[#allocation5 + $0x10e0] ss:$48 sps:$4 sm:$0xff]   ;;  %v7537_v3 = vld [vmem:[#allocation5 + $0x10e8] ss:$48 sps:$4 sm:$0xff]  }
  0xd9   :  { %4281 = vmatpush1.bf16.msra.mxu0 %v7448_v4  ;;  %4445 = vmatpush1.bf16.msra.mxu1 %v7451_v6  ;;  %v7542_v4 = vld [vmem:[#allocation5 + $0x1144] ss:$48 sps:$4 sm:$0xff]   ;;  %v7545_v6 = vld [vmem:[#allocation5 + $0x114c] ss:$48 sps:$4 sm:$0xff]  }
  0xda   :  { %4291 = vmatprep.subr.bf16.mxu0 %v7457_v7  ;;  %4455 = vmatprep.subr.bf16.mxu1 %v7460_v8  ;;  %v7540_v7 = vld [vmem:[#allocation5 + $0x1140] ss:$48 sps:$4 sm:$0xff]   ;;  %v7543_v8 = vld [vmem:[#allocation5 + $0x1148] ss:$48 sps:$4 sm:$0xff]  }
  0xdc   :  { %4283 = vmatmul.mubr.bf16.vlgmr.msra.gmra.mrb[0].mxu0 %v8636_v10  ;;  %4447 = vmatmul.mubr.bf16.vlgmr.msra.gmra.mrb[0].mxu1 %v8636_v10 }
  0xdd   :  { %4292 = vmatpush1.bf16.msra.mxu0 %v7455_v9  ;;  %4456 = vmatpush1.bf16.msra.mxu1 %v7458_v11  ;;  %v7548_v9 = vld [vmem:[#allocation5 + $0x11a4] ss:$48 sps:$4 sm:$0xff]   ;;  %v7551_v11 = vld [vmem:[#allocation5 + $0x11ac] ss:$48 sps:$4 sm:$0xff]  }
  0xde   :  { %4293 = vmatprep.subr.bf16.mxu0 %v7464_v12  ;;  %4457 = vmatprep.subr.bf16.mxu1 %v7467_v14  ;;  %v7546_v12 = vld [vmem:[#allocation5 + $0x11a0] ss:$48 sps:$4 sm:$0xff]   ;;  %v7549_v14 = vld [vmem:[#allocation5 + $0x11a8] ss:$48 sps:$4 sm:$0xff]  }
  0xdf   :  { %4323 = vmatprep.mubr.bf16.mxu0 %v8642_v15  ;;  %4487 = vmatprep.mubr.bf16.mxu1 %v8642_v15 }
  0xe1   :  { %4294 = vmatpush1.bf16.msra.mxu0 %v7462_v16  ;;  %4458 = vmatpush1.bf16.msra.mxu1 %v7465_v17  ;;  %v7555_v16 = vld [vmem:[#allocation5 + $0x1204] ss:$48 sps:$4 sm:$0xff]   ;;  %v7558_v17 = vld [vmem:[#allocation5 + $0x120c] ss:$48 sps:$4 sm:$0xff]  }
  0xe2   :  { %4295 = vmatprep.subr.bf16.mxu0 %v7470_v18  ;;  %4459 = vmatprep.subr.bf16.mxu1 %v7473_v19  ;;  %v7553_v18 = vld [vmem:[#allocation5 + $0x1200] ss:$48 sps:$4 sm:$0xff]   ;;  %v8650_v19 = vcombine.low %v8638_v13, %v8638_v13  ;;  %v7571_v13 = vld [vmem:[#allocation5 + $0x12cc] ss:$48 sps:$4 sm:$0xff]  }
  0xe5   :  { %4296 = vmatpush1.bf16.msra.mxu0 %v7468_v20  ;;  %4460 = vmatpush1.bf16.msra.mxu1 %v7471_v21  ;;  %v7556_v20 = vld [vmem:[#allocation5 + $0x1208] ss:$48 sps:$4 sm:$0xff]   ;;  %v7562_v21 = vld [vmem:[#allocation5 + $0x1264] ss:$48 sps:$4 sm:$0xff]  }
  0xe6   :  { %4297 = vmatprep.subr.bf16.mxu0 %v7476_v22  ;;  %4461 = vmatprep.subr.bf16.mxu1 %v7479_v23  ;;  %v7565_v22 = vld [vmem:[#allocation5 + $0x126c] ss:$48 sps:$4 sm:$0xff]   ;;  %v7560_v23 = vld [vmem:[#allocation5 + $0x1260] ss:$48 sps:$4 sm:$0xff]  }
  0xe9   :  { %4298 = vmatpush1.bf16.msra.mxu0 %v7474_v24  ;;  %4462 = vmatpush1.bf16.msra.mxu1 %v7477_v25  ;;  %v7563_v24 = vld [vmem:[#allocation5 + $0x1268] ss:$48 sps:$4 sm:$0xff]   ;;  %v7568_v25 = vld [vmem:[#allocation5 + $0x12c4] ss:$48 sps:$4 sm:$0xff]  }
  0xea   :  { %4299 = vmatprep.subr.bf16.mxu0 %v7482_v26  ;;  %4463 = vmatprep.subr.bf16.mxu1 %v7485_v27  ;;  %v8526_v26 = vmov 0   ;;  %v7566_v27 = vld [vmem:[#allocation5 + $0x12c0] ss:$48 sps:$4 sm:$0xff]  }
  0xed   :  { %4300 = vmatpush1.bf16.msra.mxu0 %v7480_v28  ;;  %4464 = vmatpush1.bf16.msra.mxu1 %v7483_v29  ;;  %v7569_v28 = vld [vmem:[#allocation5 + $0x12c8] ss:$48 sps:$4 sm:$0xff]   ;;  %v7574_v29 = vld [vmem:[#allocation5 + $0x1324] ss:$48 sps:$4 sm:$0xff]  }
  0xee   :  { %4301 = vmatprep.subr.bf16.mxu0 %v7488_v31  ;;  %4465 = vmatprep.subr.bf16.mxu1 %v7491_v32  ;;  %v7577_v31 = vld [vmem:[#allocation5 + $0x132c] ss:$48 sps:$4 sm:$0xff]   ;;  %v7572_v32 = vld [vmem:[#allocation5 + $0x1320] ss:$48 sps:$4 sm:$0xff]  }
  0xf1   :  { %4302 = vmatpush1.bf16.msra.mxu0 %v7486_v33  ;;  %4466 = vmatpush1.bf16.msra.mxu1 %v7489_v34  ;;  %v7575_v33 = vld [vmem:[#allocation5 + $0x1328] ss:$48 sps:$4 sm:$0xff]   ;;  %v7580_v34 = vld [vmem:[#allocation5 + $0x1384] ss:$48 sps:$4 sm:$0xff]  }
  0xf2   :  { %4303 = vmatprep.subr.bf16.mxu0 %v7494_v35  ;;  %4467 = vmatprep.subr.bf16.mxu1 %v7497_v36  ;;  %v7583_v35 = vld [vmem:[#allocation5 + $0x138c] ss:$48 sps:$4 sm:$0xff]   ;;  %v7578_v36 = vld [vmem:[#allocation5 + $0x1380] ss:$48 sps:$4 sm:$0xff]  }
  0xf5   :  { %4304 = vmatpush1.bf16.msra.mxu0 %v7492_v37  ;;  %4468 = vmatpush1.bf16.msra.mxu1 %v7495_v38  ;;  %v7581_v37 = vld [vmem:[#allocation5 + $0x1388] ss:$48 sps:$4 sm:$0xff]   ;;  %v7586_v38 = vld [vmem:[#allocation5 + $0x13e4] ss:$48 sps:$4 sm:$0xff]  }
  0xf6   :  { %4305 = vmatprep.subr.bf16.mxu0 %v7500_v39  ;;  %4469 = vmatprep.subr.bf16.mxu1 %v7503_v40  ;;  %v7589_v39 = vld [vmem:[#allocation5 + $0x13ec] ss:$48 sps:$4 sm:$0xff]   ;;  %v7584_v40 = vld [vmem:[#allocation5 + $0x13e0] ss:$48 sps:$4 sm:$0xff]  }
  0xf9   :  { %4306 = vmatpush1.bf16.msra.mxu0 %v7498_v41  ;;  %4470 = vmatpush1.bf16.msra.mxu1 %v7501_v42  ;;  %v7587_v41 = vld [vmem:[#allocation5 + $0x13e8] ss:$48 sps:$4 sm:$0xff]   ;;  %v7592_v42 = vld [vmem:[#allocation5 + $0x1444] ss:$48 sps:$4 sm:$0xff]  }
  0xfa   :  { %4307 = vmatprep.subr.bf16.mxu0 %v7506_v43  ;;  %4471 = vmatprep.subr.bf16.mxu1 %v7509_v44  ;;  %v7595_v43 = vld [vmem:[#allocation5 + $0x144c] ss:$48 sps:$4 sm:$0xff]   ;;  %v7590_v44 = vld [vmem:[#allocation5 + $0x1440] ss:$48 sps:$4 sm:$0xff]  }
  0xfd   :  { %4308 = vmatpush1.bf16.msra.mxu0 %v7504_v45  ;;  %4472 = vmatpush1.bf16.msra.mxu1 %v7507_v46  ;;  %v7593_v45 = vld [vmem:[#allocation5 + $0x1448] ss:$48 sps:$4 sm:$0xff]   ;;  %v7598_v46 = vld [vmem:[#allocation5 + $0x14a4] ss:$48 sps:$4 sm:$0xff]  }
  0xfe   :  { %4309 = vmatprep.subr.bf16.mxu0 %v7512_v47  ;;  %4473 = vmatprep.subr.bf16.mxu1 %v7515_v49  ;;  %v7601_v47 = vld [vmem:[#allocation5 + $0x14ac] ss:$48 sps:$4 sm:$0xff]   ;;  %v7596_v49 = vld [vmem:[#allocation5 + $0x14a0] ss:$48 sps:$4 sm:$0xff]  }
 0x101   :  { %4310 = vmatpush1.bf16.msra.mxu0 %v7510_v50  ;;  %4474 = vmatpush1.bf16.msra.mxu1 %v7513_v51  ;;  %v7599_v50 = vld [vmem:[#allocation5 + $0x14a8] ss:$48 sps:$4 sm:$0xff]   ;;  %v7605_v51 = vld [vmem:[#allocation5 + $0x14] ss:$48 sps:$4 sm:$0xff]  }
 0x102   :  { %4311 = vmatprep.subr.bf16.mxu0 %v7518_v52  ;;  %4475 = vmatprep.subr.bf16.mxu1 %v7521_v53  ;;  %v7608_v52 = vld [vmem:[#allocation5 + $0x1c] ss:$48 sps:$4 sm:$0xff]  }
 0x103   :  { %v7602_v53 = vld [vmem:[#allocation2 + $0x18] ss:$0 sps:$4 sm:$0xff]  }
 0x105   :  { %4312 = vmatpush1.bf16.msra.mxu0 %v7516_v54  ;;  %4476 = vmatpush1.bf16.msra.mxu1 %v7519_v55  ;;  %v7603_v54 = vld [vmem:[#allocation5 + $0x10] ss:$48 sps:$4 sm:$0xff]   ;;  %v7606_v55 = vld [vmem:[#allocation5 + $0x18] ss:$48 sps:$4 sm:$0xff]  }
 0x106   :  { %4313 = vmatprep.subr.bf16.mxu0 %v7524_v56  ;;  %4477 = vmatprep.subr.bf16.mxu1 %v7527_v57  ;;  %v7611_v56 = vld [vmem:[#allocation5 + $0x74] ss:$48 sps:$4 sm:$0xff]   ;;  %v7614_v57 = vld [vmem:[#allocation5 + $0x7c] ss:$48 sps:$4 sm:$0xff]  }
 0x109   :  { %4314 = vmatpush1.bf16.msra.mxu0 %v7522_v58  ;;  %4478 = vmatpush1.bf16.msra.mxu1 %v7525_v59  ;;  %v7609_v58 = vld [vmem:[#allocation5 + $0x70] ss:$48 sps:$4 sm:$0xff]   ;;  %v7612_v59 = vld [vmem:[#allocation5 + $0x78] ss:$48 sps:$4 sm:$0xff]  }
 0x10a   :  { %4315 = vmatprep.subr.bf16.mxu0 %v7530_v60  ;;  %4479 = vmatprep.subr.bf16.mxu1 %v7533_v61  ;;  %v7617_v60 = vld [vmem:[#allocation5 + $0xd4] ss:$48 sps:$4 sm:$0xff]   ;;  %v7620_v61 = vld [vmem:[#allocation5 + $0xdc] ss:$48 sps:$4 sm:$0xff]  }
 0x10d   :  { %4316 = vmatpush1.bf16.msra.mxu0 %v7528_v62  ;;  %4480 = vmatpush1.bf16.msra.mxu1 %v7531_v63  ;;  %v7615_v62 = vld [vmem:[#allocation5 + $0xd0] ss:$48 sps:$4 sm:$0xff]   ;;  %v7618_v63 = vld [vmem:[#allocation5 + $0xd8] ss:$48 sps:$4 sm:$0xff]  }
 0x10e   :  { %4317 = vmatprep.subr.bf16.mxu0 %v7536_v0  ;;  %4481 = vmatprep.subr.bf16.mxu1 %v7539_v1  ;;  %v7623_v0 = vld [vmem:[#allocation5 + $0x134] ss:$48 sps:$4 sm:$0xff]   ;;  %v7626_v1 = vld [vmem:[#allocation5 + $0x13c] ss:$48 sps:$4 sm:$0xff]  }
 0x111   :  { %4318 = vmatpush1.bf16.msra.mxu0 %v7534_v2  ;;  %4482 = vmatpush1.bf16.msra.mxu1 %v7537_v3  ;;  %v7621_v2 = vld [vmem:[#allocation5 + $0x130] ss:$48 sps:$4 sm:$0xff]   ;;  %v7624_v3 = vld [vmem:[#allocation5 + $0x138] ss:$48 sps:$4 sm:$0xff]  }
 0x112   :  { %4319 = vmatprep.subr.bf16.mxu0 %v7542_v4  ;;  %4483 = vmatprep.subr.bf16.mxu1 %v7545_v6  ;;  %v7629_v4 = vld [vmem:[#allocation5 + $0x194] ss:$48 sps:$4 sm:$0xff]   ;;  %v7632_v6 = vld [vmem:[#allocation5 + $0x19c] ss:$48 sps:$4 sm:$0xff]  }
 0x115   :  { %4320 = vmatpush1.bf16.msra.mxu0 %v7540_v7  ;;  %4484 = vmatpush1.bf16.msra.mxu1 %v7543_v8  ;;  %v7627_v7 = vld [vmem:[#allocation5 + $0x190] ss:$48 sps:$4 sm:$0xff]   ;;  %v7630_v8 = vld [vmem:[#allocation5 + $0x198] ss:$48 sps:$4 sm:$0xff]  }
 0x116   :  { %4321 = vmatprep.subr.bf16.mxu0 %v7548_v9  ;;  %4485 = vmatprep.subr.bf16.mxu1 %v7551_v11  ;;  %v7635_v9 = vld [vmem:[#allocation5 + $0x1f4] ss:$48 sps:$4 sm:$0xff]   ;;  %v7638_v11 = vld [vmem:[#allocation5 + $0x1fc] ss:$48 sps:$4 sm:$0xff]  }
 0x119   :  { %4322 = vmatpush1.bf16.msra.mxu0 %v7546_v12  ;;  %4486 = vmatpush1.bf16.msra.mxu1 %v7549_v14  ;;  %v7633_v12 = vld [vmem:[#allocation5 + $0x1f0] ss:$48 sps:$4 sm:$0xff]   ;;  %v7636_v14 = vld [vmem:[#allocation5 + $0x1f8] ss:$48 sps:$4 sm:$0xff]  }
 0x11a   :  { %4332 = vmatprep.subr.bf16.mxu0 %v7555_v16  ;;  %4496 = vmatprep.subr.bf16.mxu1 %v7558_v17  ;;  %v7641_v16 = vld [vmem:[#allocation5 + $0x254] ss:$48 sps:$4 sm:$0xff]   ;;  %v7644_v17 = vld [vmem:[#allocation5 + $0x25c] ss:$48 sps:$4 sm:$0xff]  }
 0x11c   :  { %4324 = vmatmul.mubr.bf16.vlgmr.msra.gmra.mrb[0].mxu0 %v8650_v19  ;;  %4488 = vmatmul.mubr.bf16.vlgmr.msra.gmra.mrb[0].mxu1 %v8650_v19 }
 0x11d   :  { %4333 = vmatpush1.bf16.msra.mxu0 %v7553_v18  ;;  %4497 = vmatpush1.bf16.msra.mxu1 %v7556_v20  ;;  %v7639_v18 = vld [vmem:[#allocation5 + $0x250] ss:$48 sps:$4 sm:$0xff]   ;;  %v7642_v20 = vld [vmem:[#allocation5 + $0x258] ss:$48 sps:$4 sm:$0xff]  }
 0x11e   :  { %4334 = vmatprep.subr.bf16.mxu0 %v7562_v21  ;;  %4498 = vmatprep.subr.bf16.mxu1 %v7565_v22  ;;  %v7647_v21 = vld [vmem:[#allocation5 + $0x2b4] ss:$48 sps:$4 sm:$0xff]   ;;  %v7650_v22 = vld [vmem:[#allocation5 + $0x2bc] ss:$48 sps:$4 sm:$0xff]  }
 0x11f   :  { %4364 = vmatprep.mubr.bf16.mxu0 %v8526_v26  ;;  %4528 = vmatprep.mubr.bf16.mxu1 %v8526_v26 }
 0x121   :  { %4335 = vmatpush1.bf16.msra.mxu0 %v7560_v23  ;;  %4499 = vmatpush1.bf16.msra.mxu1 %v7563_v24  ;;  %v7645_v23 = vld [vmem:[#allocation5 + $0x2b0] ss:$48 sps:$4 sm:$0xff]   ;;  %v7648_v24 = vld [vmem:[#allocation5 + $0x2b8] ss:$48 sps:$4 sm:$0xff]  }
 0x122   :  { %4336 = vmatprep.subr.bf16.mxu0 %v7568_v25  ;;  %4500 = vmatprep.subr.bf16.mxu1 %v7571_v13  ;;  %v7653_v25 = vld [vmem:[#allocation5 + $0x314] ss:$48 sps:$4 sm:$0xff]   ;;  %v7656_v13 = vld [vmem:[#allocation5 + $0x31c] ss:$48 sps:$4 sm:$0xff]  }
 0x125   :  { %4337 = vmatpush1.bf16.msra.mxu0 %v7566_v27  ;;  %4501 = vmatpush1.bf16.msra.mxu1 %v7569_v28  ;;  %v7651_v27 = vld [vmem:[#allocation5 + $0x310] ss:$48 sps:$4 sm:$0xff]   ;;  %v7654_v28 = vld [vmem:[#allocation5 + $0x318] ss:$48 sps:$4 sm:$0xff]  }
 0x126   :  { %4338 = vmatprep.subr.bf16.mxu0 %v7574_v29  ;;  %4502 = vmatprep.subr.bf16.mxu1 %v7577_v31  ;;  %v7659_v29 = vld [vmem:[#allocation5 + $0x374] ss:$48 sps:$4 sm:$0xff]   ;;  %v7662_v31 = vld [vmem:[#allocation5 + $0x37c] ss:$48 sps:$4 sm:$0xff]  }
 0x129   :  { %4339 = vmatpush1.bf16.msra.mxu0 %v7572_v32  ;;  %4503 = vmatpush1.bf16.msra.mxu1 %v7575_v33  ;;  %v7657_v32 = vld [vmem:[#allocation5 + $0x370] ss:$48 sps:$4 sm:$0xff]   ;;  %v7660_v33 = vld [vmem:[#allocation5 + $0x378] ss:$48 sps:$4 sm:$0xff]  }
 0x12a   :  { %4340 = vmatprep.subr.bf16.mxu0 %v7580_v34  ;;  %4504 = vmatprep.subr.bf16.mxu1 %v7583_v35  ;;  %v7665_v34 = vld [vmem:[#allocation5 + $0x3d4] ss:$48 sps:$4 sm:$0xff]   ;;  %v7668_v35 = vld [vmem:[#allocation5 + $0x3dc] ss:$48 sps:$4 sm:$0xff]  }
 0x12d   :  { %4341 = vmatpush1.bf16.msra.mxu0 %v7578_v36  ;;  %4505 = vmatpush1.bf16.msra.mxu1 %v7581_v37  ;;  %v7663_v36 = vld [vmem:[#allocation5 + $0x3d0] ss:$48 sps:$4 sm:$0xff]   ;;  %v7666_v37 = vld [vmem:[#allocation5 + $0x3d8] ss:$48 sps:$4 sm:$0xff]  }
 0x12e   :  { %4342 = vmatprep.subr.bf16.mxu0 %v7586_v38  ;;  %4506 = vmatprep.subr.bf16.mxu1 %v7589_v39  ;;  %v7671_v38 = vld [vmem:[#allocation5 + $0x434] ss:$48 sps:$4 sm:$0xff]   ;;  %v7674_v39 = vld [vmem:[#allocation5 + $0x43c] ss:$48 sps:$4 sm:$0xff]  }
 0x131   :  { %4343 = vmatpush1.bf16.msra.mxu0 %v7584_v40  ;;  %4507 = vmatpush1.bf16.msra.mxu1 %v7587_v41  ;;  %v7669_v40 = vld [vmem:[#allocation5 + $0x430] ss:$48 sps:$4 sm:$0xff]   ;;  %v7672_v41 = vld [vmem:[#allocation5 + $0x438] ss:$48 sps:$4 sm:$0xff]  }
 0x132   :  { %4344 = vmatprep.subr.bf16.mxu0 %v7592_v42  ;;  %4508 = vmatprep.subr.bf16.mxu1 %v7595_v43  ;;  %v7677_v42 = vld [vmem:[#allocation5 + $0x494] ss:$48 sps:$4 sm:$0xff]   ;;  %v7680_v43 = vld [vmem:[#allocation5 + $0x49c] ss:$48 sps:$4 sm:$0xff]  }
 0x135   :  { %4345 = vmatpush1.bf16.msra.mxu0 %v7590_v44  ;;  %4509 = vmatpush1.bf16.msra.mxu1 %v7593_v45  ;;  %v7675_v44 = vld [vmem:[#allocation5 + $0x490] ss:$48 sps:$4 sm:$0xff]   ;;  %v7678_v45 = vld [vmem:[#allocation5 + $0x498] ss:$48 sps:$4 sm:$0xff]  }
 0x136   :  { %4346 = vmatprep.subr.bf16.mxu0 %v7598_v46  ;;  %4510 = vmatprep.subr.bf16.mxu1 %v7601_v47  ;;  %v7683_v46 = vld [vmem:[#allocation5 + $0x4f4] ss:$48 sps:$4 sm:$0xff]   ;;  %v7686_v47 = vld [vmem:[#allocation5 + $0x4fc] ss:$48 sps:$4 sm:$0xff]  }
 0x139   :  { %4347 = vmatpush1.bf16.msra.mxu0 %v7596_v49  ;;  %4511 = vmatpush1.bf16.msra.mxu1 %v7599_v50  ;;  %v7681_v49 = vld [vmem:[#allocation5 + $0x4f0] ss:$48 sps:$4 sm:$0xff]   ;;  %v7684_v50 = vld [vmem:[#allocation5 + $0x4f8] ss:$48 sps:$4 sm:$0xff]  }
 0x13a   :  { %4537 = vmatprep.subr.bf16.mxu0 %v7605_v51  ;;  %4701 = vmatprep.subr.bf16.mxu1 %v7608_v52  ;;  %v7689_v51 = vld [vmem:[#allocation5 + $0x554] ss:$48 sps:$4 sm:$0xff]   ;;  %v7692_v52 = vld [vmem:[#allocation5 + $0x55c] ss:$48 sps:$4 sm:$0xff]  }
 0x13c   :  { %4365 = vmatmul.mubr.bf16.vlgmr.msra.gmra.mrb[0].mxu0 %v7602_v53  ;;  %4529 = vmatmul.mubr.bf16.vlgmr.msra.gmra.mrb[0].mxu1 %v7602_v53  ;;  %v7687_v53 = vld [vmem:[#allocation5 + $0x550] ss:$48 sps:$4 sm:$0xff]  }
 0x13d   :  { %4538 = vmatpush1.bf16.msra.mxu0 %v7603_v54  ;;  %4702 = vmatpush1.bf16.msra.mxu1 %v7606_v55  ;;  %v7690_v54 = vld [vmem:[#allocation5 + $0x558] ss:$48 sps:$4 sm:$0xff]   ;;  %v7695_v55 = vld [vmem:[#allocation5 + $0x5b4] ss:$48 sps:$4 sm:$0xff]  }
 0x13e   :  { %4539 = vmatprep.subr.bf16.mxu0 %v7611_v56  ;;  %4703 = vmatprep.subr.bf16.mxu1 %v7614_v57  ;;  %v7698_v56 = vld [vmem:[#allocation5 + $0x5bc] ss:$48 sps:$4 sm:$0xff]   ;;  %v7693_v57 = vld [vmem:[#allocation5 + $0x5b0] ss:$48 sps:$4 sm:$0xff]  }
 0x13f   :  { %4569 = vmatprep.mubr.bf16.mxu0 %v8618_v48  ;;  %4733 = vmatprep.mubr.bf16.mxu1 %v8618_v48 }
 0x141   :  { %4540 = vmatpush1.bf16.msra.mxu0 %v7609_v58  ;;  %4704 = vmatpush1.bf16.msra.mxu1 %v7612_v59  ;;  %v7696_v58 = vld [vmem:[#allocation5 + $0x5b8] ss:$48 sps:$4 sm:$0xff]   ;;  %v7701_v59 = vld [vmem:[#allocation5 + $0x614] ss:$48 sps:$4 sm:$0xff]  }
 0x142   :  { %4541 = vmatprep.subr.bf16.mxu0 %v7617_v60  ;;  %4705 = vmatprep.subr.bf16.mxu1 %v7620_v61  ;;  %v7704_v60 = vld [vmem:[#allocation5 + $0x61c] ss:$48 sps:$4 sm:$0xff]   ;;  %v7699_v61 = vld [vmem:[#allocation5 + $0x610] ss:$48 sps:$4 sm:$0xff]  }
 0x145   :  { %4542 = vmatpush1.bf16.msra.mxu0 %v7615_v62  ;;  %4706 = vmatpush1.bf16.msra.mxu1 %v7618_v63  ;;  %v7702_v62 = vld [vmem:[#allocation5 + $0x618] ss:$48 sps:$4 sm:$0xff]   ;;  %v7707_v63 = vld [vmem:[#allocation5 + $0x674] ss:$48 sps:$4 sm:$0xff]  }
 0x146   :  { %4543 = vmatprep.subr.bf16.mxu0 %v7623_v0  ;;  %4707 = vmatprep.subr.bf16.mxu1 %v7626_v1  ;;  %v7710_v0 = vld [vmem:[#allocation5 + $0x67c] ss:$48 sps:$4 sm:$0xff]   ;;  %v7705_v1 = vld [vmem:[#allocation5 + $0x670] ss:$48 sps:$4 sm:$0xff]  }
 0x149   :  { %4544 = vmatpush1.bf16.msra.mxu0 %v7621_v2  ;;  %4708 = vmatpush1.bf16.msra.mxu1 %v7624_v3  ;;  %v7708_v2 = vld [vmem:[#allocation5 + $0x678] ss:$48 sps:$4 sm:$0xff]   ;;  %v7713_v3 = vld [vmem:[#allocation5 + $0x6d4] ss:$48 sps:$4 sm:$0xff]  }
 0x14a   :  { %4545 = vmatprep.subr.bf16.mxu0 %v7629_v4  ;;  %4709 = vmatprep.subr.bf16.mxu1 %v7632_v6  ;;  %v7716_v4 = vld [vmem:[#allocation5 + $0x6dc] ss:$48 sps:$4 sm:$0xff]   ;;  %v7711_v6 = vld [vmem:[#allocation5 + $0x6d0] ss:$48 sps:$4 sm:$0xff]  }
 0x14d   :  { %4546 = vmatpush1.bf16.msra.mxu0 %v7627_v7  ;;  %4710 = vmatpush1.bf16.msra.mxu1 %v7630_v8  ;;  %v7714_v7 = vld [vmem:[#allocation5 + $0x6d8] ss:$48 sps:$4 sm:$0xff]   ;;  %v7719_v8 = vld [vmem:[#allocation5 + $0x734] ss:$48 sps:$4 sm:$0xff]  }
 0x14e   :  { %4547 = vmatprep.subr.bf16.mxu0 %v7635_v9  ;;  %4711 = vmatprep.subr.bf16.mxu1 %v7638_v11  ;;  %v7722_v9 = vld [vmem:[#allocation5 + $0x73c] ss:$48 sps:$4 sm:$0xff]   ;;  %v7717_v11 = vld [vmem:[#allocation5 + $0x730] ss:$48 sps:$4 sm:$0xff]  }
 0x151   :  { %4548 = vmatpush1.bf16.msra.mxu0 %v7633_v12  ;;  %4712 = vmatpush1.bf16.msra.mxu1 %v7636_v14  ;;  %v7720_v12 = vld [vmem:[#allocation5 + $0x738] ss:$48 sps:$4 sm:$0xff]   ;;  %v7725_v14 = vld [vmem:[#allocation5 + $0x794] ss:$48 sps:$4 sm:$0xff]  }
 0x152   :  { %4549 = vmatprep.subr.bf16.mxu0 %v7641_v16  ;;  %4713 = vmatprep.subr.bf16.mxu1 %v7644_v17  ;;  %v7728_v16 = vld [vmem:[#allocation5 + $0x79c] ss:$48 sps:$4 sm:$0xff]   ;;  %v7723_v17 = vld [vmem:[#allocation5 + $0x790] ss:$48 sps:$4 sm:$0xff]  }
 0x155   :  { %4550 = vmatpush1.bf16.msra.mxu0 %v7639_v18  ;;  %4714 = vmatpush1.bf16.msra.mxu1 %v7642_v20  ;;  %v7726_v18 = vld [vmem:[#allocation5 + $0x798] ss:$48 sps:$4 sm:$0xff]   ;;  %v7731_v20 = vld [vmem:[#allocation5 + $0x7f4] ss:$48 sps:$4 sm:$0xff]  }
 0x156   :  { %4551 = vmatprep.subr.bf16.mxu0 %v7647_v21  ;;  %4715 = vmatprep.subr.bf16.mxu1 %v7650_v22  ;;  %v7734_v21 = vld [vmem:[#allocation5 + $0x7fc] ss:$48 sps:$4 sm:$0xff]   ;;  %v7729_v22 = vld [vmem:[#allocation5 + $0x7f0] ss:$48 sps:$4 sm:$0xff]  }
 0x159   :  { %4552 = vmatpush1.bf16.msra.mxu0 %v7645_v23  ;;  %4716 = vmatpush1.bf16.msra.mxu1 %v7648_v24  ;;  %v7732_v23 = vld [vmem:[#allocation5 + $0x7f8] ss:$48 sps:$4 sm:$0xff]   ;;  %v7737_v24 = vld [vmem:[#allocation5 + $0x854] ss:$48 sps:$4 sm:$0xff]  }
 0x15a   :  { %4553 = vmatprep.subr.bf16.mxu0 %v7653_v25  ;;  %4717 = vmatprep.subr.bf16.mxu1 %v7656_v13  ;;  %v7740_v25 = vld [vmem:[#allocation5 + $0x85c] ss:$48 sps:$4 sm:$0xff]   ;;  %v7735_v13 = vld [vmem:[#allocation5 + $0x850] ss:$48 sps:$4 sm:$0xff]  }
 0x15d   :  { %4554 = vmatpush1.bf16.msra.mxu0 %v7651_v27  ;;  %4718 = vmatpush1.bf16.msra.mxu1 %v7654_v28  ;;  %v7738_v27 = vld [vmem:[#allocation5 + $0x858] ss:$48 sps:$4 sm:$0xff]   ;;  %v7743_v28 = vld [vmem:[#allocation5 + $0x8b4] ss:$48 sps:$4 sm:$0xff]  }
 0x15e   :  { %4555 = vmatprep.subr.bf16.mxu0 %v7659_v29  ;;  %4719 = vmatprep.subr.bf16.mxu1 %v7662_v31  ;;  %v7746_v29 = vld [vmem:[#allocation5 + $0x8bc] ss:$48 sps:$4 sm:$0xff]   ;;  %v7741_v31 = vld [vmem:[#allocation5 + $0x8b0] ss:$48 sps:$4 sm:$0xff]  }
 0x161   :  { %4556 = vmatpush1.bf16.msra.mxu0 %v7657_v32  ;;  %4720 = vmatpush1.bf16.msra.mxu1 %v7660_v33  ;;  %v7744_v32 = vld [vmem:[#allocation5 + $0x8b8] ss:$48 sps:$4 sm:$0xff]   ;;  %v7749_v33 = vld [vmem:[#allocation5 + $0x914] ss:$48 sps:$4 sm:$0xff]  }
 0x162   :  { %4557 = vmatprep.subr.bf16.mxu0 %v7665_v34  ;;  %4721 = vmatprep.subr.bf16.mxu1 %v7668_v35  ;;  %v7752_v34 = vld [vmem:[#allocation5 + $0x91c] ss:$48 sps:$4 sm:$0xff]   ;;  %v7747_v35 = vld [vmem:[#allocation5 + $0x910] ss:$48 sps:$4 sm:$0xff]  }
 0x165   :  { %4558 = vmatpush1.bf16.msra.mxu0 %v7663_v36  ;;  %4722 = vmatpush1.bf16.msra.mxu1 %v7666_v37  ;;  %v7750_v36 = vld [vmem:[#allocation5 + $0x918] ss:$48 sps:$4 sm:$0xff]   ;;  %v7755_v37 = vld [vmem:[#allocation5 + $0x974] ss:$48 sps:$4 sm:$0xff]  }
 0x166   :  { %4559 = vmatprep.subr.bf16.mxu0 %v7671_v38  ;;  %4723 = vmatprep.subr.bf16.mxu1 %v7674_v39  ;;  %v7758_v38 = vld [vmem:[#allocation5 + $0x97c] ss:$48 sps:$4 sm:$0xff]   ;;  %v7753_v39 = vld [vmem:[#allocation5 + $0x970] ss:$48 sps:$4 sm:$0xff]  }
 0x169   :  { %4560 = vmatpush1.bf16.msra.mxu0 %v7669_v40  ;;  %4724 = vmatpush1.bf16.msra.mxu1 %v7672_v41  ;;  %v7756_v40 = vld [vmem:[#allocation5 + $0x978] ss:$48 sps:$4 sm:$0xff]   ;;  %v7761_v41 = vld [vmem:[#allocation5 + $0x9d4] ss:$48 sps:$4 sm:$0xff]  }
 0x16a   :  { %4561 = vmatprep.subr.bf16.mxu0 %v7677_v42  ;;  %4725 = vmatprep.subr.bf16.mxu1 %v7680_v43  ;;  %v7764_v42 = vld [vmem:[#allocation5 + $0x9dc] ss:$48 sps:$4 sm:$0xff]   ;;  %v7759_v43 = vld [vmem:[#allocation5 + $0x9d0] ss:$48 sps:$4 sm:$0xff]  }
 0x16d   :  { %4562 = vmatpush1.bf16.msra.mxu0 %v7675_v44  ;;  %4726 = vmatpush1.bf16.msra.mxu1 %v7678_v45  ;;  %v7762_v44 = vld [vmem:[#allocation5 + $0x9d8] ss:$48 sps:$4 sm:$0xff]   ;;  %v7767_v45 = vld [vmem:[#allocation5 + $0xa34] ss:$48 sps:$4 sm:$0xff]  }
 0x16e   :  { %4563 = vmatprep.subr.bf16.mxu0 %v7683_v46  ;;  %4727 = vmatprep.subr.bf16.mxu1 %v7686_v47  ;;  %v7770_v46 = vld [vmem:[#allocation5 + $0xa3c] ss:$48 sps:$4 sm:$0xff]   ;;  %v7765_v47 = vld [vmem:[#allocation5 + $0xa30] ss:$48 sps:$4 sm:$0xff]  }
 0x171   :  { %4564 = vmatpush1.bf16.msra.mxu0 %v7681_v49  ;;  %4728 = vmatpush1.bf16.msra.mxu1 %v7684_v50  ;;  %v7768_v49 = vld [vmem:[#allocation5 + $0xa38] ss:$48 sps:$4 sm:$0xff]   ;;  %v7773_v50 = vld [vmem:[#allocation5 + $0xa94] ss:$48 sps:$4 sm:$0xff]  }
 0x172   :  { %4565 = vmatprep.subr.bf16.mxu0 %v7689_v51  ;;  %4729 = vmatprep.subr.bf16.mxu1 %v7692_v52  ;;  %v7776_v51 = vld [vmem:[#allocation5 + $0xa9c] ss:$48 sps:$4 sm:$0xff]   ;;  %v7771_v52 = vld [vmem:[#allocation5 + $0xa90] ss:$48 sps:$4 sm:$0xff]  }
 0x175   :  { %4566 = vmatpush1.bf16.msra.mxu0 %v7687_v53  ;;  %4730 = vmatpush1.bf16.msra.mxu1 %v7690_v54  ;;  %v7774_v53 = vld [vmem:[#allocation5 + $0xa98] ss:$48 sps:$4 sm:$0xff]   ;;  %v7779_v54 = vld [vmem:[#allocation5 + $0xaf4] ss:$48 sps:$4 sm:$0xff]  }
 0x176   :  { %4567 = vmatprep.subr.bf16.mxu0 %v7695_v55  ;;  %4731 = vmatprep.subr.bf16.mxu1 %v7698_v56  ;;  %v7782_v55 = vld [vmem:[#allocation5 + $0xafc] ss:$48 sps:$4 sm:$0xff]   ;;  %v7777_v56 = vld [vmem:[#allocation5 + $0xaf0] ss:$48 sps:$4 sm:$0xff]  }
 0x179   :  { %4568 = vmatpush1.bf16.msra.mxu0 %v7693_v57  ;;  %4732 = vmatpush1.bf16.msra.mxu1 %v7696_v58  ;;  %v7780_v57 = vld [vmem:[#allocation5 + $0xaf8] ss:$48 sps:$4 sm:$0xff]   ;;  %v7785_v58 = vld [vmem:[#allocation5 + $0xb54] ss:$48 sps:$4 sm:$0xff]  }
 0x17a   :  { %4578 = vmatprep.subr.bf16.mxu0 %v7701_v59  ;;  %4742 = vmatprep.subr.bf16.mxu1 %v7704_v60  ;;  %v7788_v59 = vld [vmem:[#allocation5 + $0xb5c] ss:$48 sps:$4 sm:$0xff]   ;;  %v7783_v60 = vld [vmem:[#allocation5 + $0xb50] ss:$48 sps:$4 sm:$0xff]  }
 0x17c   :  { %4570 = vmatmul.mubr.bf16.vlgmr.msra.gmra.mrb[4].mxu0 %v8622_v5  ;;  %4734 = vmatmul.mubr.bf16.vlgmr.msra.gmra.mrb[4].mxu1 %v8622_v5 }
 0x17d   :  { %4579 = vmatpush1.bf16.msra.mxu0 %v7699_v61  ;;  %4743 = vmatpush1.bf16.msra.mxu1 %v7702_v62  ;;  %v7786_v61 = vld [vmem:[#allocation5 + $0xb58] ss:$48 sps:$4 sm:$0xff]   ;;  %v7791_v62 = vld [vmem:[#allocation5 + $0xbb4] ss:$48 sps:$4 sm:$0xff]  }
 0x17e   :  { %4580 = vmatprep.subr.bf16.mxu0 %v7707_v63  ;;  %4744 = vmatprep.subr.bf16.mxu1 %v7710_v0  ;;  %v7794_v63 = vld [vmem:[#allocation5 + $0xbbc] ss:$48 sps:$4 sm:$0xff]   ;;  %v7789_v0 = vld [vmem:[#allocation5 + $0xbb0] ss:$48 sps:$4 sm:$0xff]  }
 0x17f   :  { %4610 = vmatprep.mubr.bf16.mxu0 %v8630_v30  ;;  %4774 = vmatprep.mubr.bf16.mxu1 %v8630_v30 }
 0x181   :  { %4581 = vmatpush1.bf16.msra.mxu0 %v7705_v1  ;;  %4745 = vmatpush1.bf16.msra.mxu1 %v7708_v2  ;;  %v7792_v1 = vld [vmem:[#allocation5 + $0xbb8] ss:$48 sps:$4 sm:$0xff]   ;;  %v7797_v2 = vld [vmem:[#allocation5 + $0xc14] ss:$48 sps:$4 sm:$0xff]  }
 0x182   :  { %4582 = vmatprep.subr.bf16.mxu0 %v7713_v3  ;;  %4746 = vmatprep.subr.bf16.mxu1 %v7716_v4  ;;  %v7800_v3 = vld [vmem:[#allocation5 + $0xc1c] ss:$48 sps:$4 sm:$0xff]   ;;  %v7795_v4 = vld [vmem:[#allocation5 + $0xc10] ss:$48 sps:$4 sm:$0xff]  }
 0x185   :  { %4583 = vmatpush1.bf16.msra.mxu0 %v7711_v6  ;;  %4747 = vmatpush1.bf16.msra.mxu1 %v7714_v7  ;;  %v7798_v6 = vld [vmem:[#allocation5 + $0xc18] ss:$48 sps:$4 sm:$0xff]   ;;  %v7803_v7 = vld [vmem:[#allocation5 + $0xc74] ss:$48 sps:$4 sm:$0xff]  }
 0x186   :  { %4584 = vmatprep.subr.bf16.mxu0 %v7719_v8  ;;  %4748 = vmatprep.subr.bf16.mxu1 %v7722_v9  ;;  %v7806_v8 = vld [vmem:[#allocation5 + $0xc7c] ss:$48 sps:$4 sm:$0xff]   ;;  %v7801_v9 = vld [vmem:[#allocation5 + $0xc70] ss:$48 sps:$4 sm:$0xff]  }
 0x189   :  { %4585 = vmatpush1.bf16.msra.mxu0 %v7717_v11  ;;  %4749 = vmatpush1.bf16.msra.mxu1 %v7720_v12  ;;  %v7804_v11 = vld [vmem:[#allocation5 + $0xc78] ss:$48 sps:$4 sm:$0xff]   ;;  %v7809_v12 = vld [vmem:[#allocation5 + $0xcd4] ss:$48 sps:$4 sm:$0xff]  }
 0x18a   :  { %4586 = vmatprep.subr.bf16.mxu0 %v7725_v14  ;;  %4750 = vmatprep.subr.bf16.mxu1 %v7728_v16  ;;  %v7812_v14 = vld [vmem:[#allocation5 + $0xcdc] ss:$48 sps:$4 sm:$0xff]   ;;  %v7807_v16 = vld [vmem:[#allocation5 + $0xcd0] ss:$48 sps:$4 sm:$0xff]  }
 0x18d   :  { %4587 = vmatpush1.bf16.msra.mxu0 %v7723_v17  ;;  %4751 = vmatpush1.bf16.msra.mxu1 %v7726_v18  ;;  %v7810_v17 = vld [vmem:[#allocation5 + $0xcd8] ss:$48 sps:$4 sm:$0xff]   ;;  %v7815_v18 = vld [vmem:[#allocation5 + $0xd34] ss:$48 sps:$4 sm:$0xff]  }
 0x18e   :  { %4588 = vmatprep.subr.bf16.mxu0 %v7731_v20  ;;  %4752 = vmatprep.subr.bf16.mxu1 %v7734_v21  ;;  %v7818_v20 = vld [vmem:[#allocation5 + $0xd3c] ss:$48 sps:$4 sm:$0xff]   ;;  %v7813_v21 = vld [vmem:[#allocation5 + $0xd30] ss:$48 sps:$4 sm:$0xff]  }
 0x191   :  { %4589 = vmatpush1.bf16.msra.mxu0 %v7729_v22  ;;  %4753 = vmatpush1.bf16.msra.mxu1 %v7732_v23  ;;  %v7816_v22 = vld [vmem:[#allocation5 + $0xd38] ss:$48 sps:$4 sm:$0xff]   ;;  %v7821_v23 = vld [vmem:[#allocation5 + $0xd94] ss:$48 sps:$4 sm:$0xff]  }
 0x192   :  { %4590 = vmatprep.subr.bf16.mxu0 %v7737_v24  ;;  %4754 = vmatprep.subr.bf16.mxu1 %v7740_v25  ;;  %v7824_v24 = vld [vmem:[#allocation5 + $0xd9c] ss:$48 sps:$4 sm:$0xff]   ;;  %v7819_v25 = vld [vmem:[#allocation5 + $0xd90] ss:$48 sps:$4 sm:$0xff]  }
 0x195   :  { %4591 = vmatpush1.bf16.msra.mxu0 %v7735_v13  ;;  %4755 = vmatpush1.bf16.msra.mxu1 %v7738_v27  ;;  %v7822_v13 = vld [vmem:[#allocation5 + $0xd98] ss:$48 sps:$4 sm:$0xff]   ;;  %v7827_v27 = vld [vmem:[#allocation5 + $0xdf4] ss:$48 sps:$4 sm:$0xff]  }
 0x196   :  { %4592 = vmatprep.subr.bf16.mxu0 %v7743_v28  ;;  %4756 = vmatprep.subr.bf16.mxu1 %v7746_v29  ;;  %v7830_v28 = vld [vmem:[#allocation5 + $0xdfc] ss:$48 sps:$4 sm:$0xff]   ;;  %v7825_v29 = vld [vmem:[#allocation5 + $0xdf0] ss:$48 sps:$4 sm:$0xff]  }
 0x199   :  { %4593 = vmatpush1.bf16.msra.mxu0 %v7741_v31  ;;  %4757 = vmatpush1.bf16.msra.mxu1 %v7744_v32  ;;  %v7828_v31 = vld [vmem:[#allocation5 + $0xdf8] ss:$48 sps:$4 sm:$0xff]   ;;  %v7833_v32 = vld [vmem:[#allocation5 + $0xe54] ss:$48 sps:$4 sm:$0xff]  }
 0x19a   :  { %4594 = vmatprep.subr.bf16.mxu0 %v7749_v33  ;;  %4758 = vmatprep.subr.bf16.mxu1 %v7752_v34  ;;  %v7836_v33 = vld [vmem:[#allocation5 + $0xe5c] ss:$48 sps:$4 sm:$0xff]   ;;  %v7831_v34 = vld [vmem:[#allocation5 + $0xe50] ss:$48 sps:$4 sm:$0xff]  }
 0x19d   :  { %4595 = vmatpush1.bf16.msra.mxu0 %v7747_v35  ;;  %4759 = vmatpush1.bf16.msra.mxu1 %v7750_v36  ;;  %v7834_v35 = vld [vmem:[#allocation5 + $0xe58] ss:$48 sps:$4 sm:$0xff]   ;;  %v7839_v36 = vld [vmem:[#allocation5 + $0xeb4] ss:$48 sps:$4 sm:$0xff]  }
 0x19e   :  { %4596 = vmatprep.subr.bf16.mxu0 %v7755_v37  ;;  %4760 = vmatprep.subr.bf16.mxu1 %v7758_v38  ;;  %v7842_v37 = vld [vmem:[#allocation5 + $0xebc] ss:$48 sps:$4 sm:$0xff]   ;;  %v7837_v38 = vld [vmem:[#allocation5 + $0xeb0] ss:$48 sps:$4 sm:$0xff]  }
 0x1a1   :  { %4597 = vmatpush1.bf16.msra.mxu0 %v7753_v39  ;;  %4761 = vmatpush1.bf16.msra.mxu1 %v7756_v40  ;;  %v7840_v39 = vld [vmem:[#allocation5 + $0xeb8] ss:$48 sps:$4 sm:$0xff]   ;;  %v7845_v40 = vld [vmem:[#allocation5 + $0xf14] ss:$48 sps:$4 sm:$0xff]  }
 0x1a2   :  { %4598 = vmatprep.subr.bf16.mxu0 %v7761_v41  ;;  %4762 = vmatprep.subr.bf16.mxu1 %v7764_v42  ;;  %v7848_v41 = vld [vmem:[#allocation5 + $0xf1c] ss:$48 sps:$4 sm:$0xff]   ;;  %v7843_v42 = vld [vmem:[#allocation5 + $0xf10] ss:$48 sps:$4 sm:$0xff]  }
 0x1a5   :  { %4599 = vmatpush1.bf16.msra.mxu0 %v7759_v43  ;;  %4763 = vmatpush1.bf16.msra.mxu1 %v7762_v44  ;;  %v7846_v43 = vld [vmem:[#allocation5 + $0xf18] ss:$48 sps:$4 sm:$0xff]   ;;  %v7851_v44 = vld [vmem:[#allocation5 + $0xf74] ss:$48 sps:$4 sm:$0xff]  }
 0x1a6   :  { %4600 = vmatprep.subr.bf16.mxu0 %v7767_v45  ;;  %4764 = vmatprep.subr.bf16.mxu1 %v7770_v46  ;;  %v7854_v45 = vld [vmem:[#allocation5 + $0xf7c] ss:$48 sps:$4 sm:$0xff]   ;;  %v7849_v46 = vld [vmem:[#allocation5 + $0xf70] ss:$48 sps:$4 sm:$0xff]  }
 0x1a9   :  { %4601 = vmatpush1.bf16.msra.mxu0 %v7765_v47  ;;  %4765 = vmatpush1.bf16.msra.mxu1 %v7768_v49  ;;  %v7852_v47 = vld [vmem:[#allocation5 + $0xf78] ss:$48 sps:$4 sm:$0xff]   ;;  %v7857_v49 = vld [vmem:[#allocation5 + $0xfd4] ss:$48 sps:$4 sm:$0xff]  }
 0x1aa   :  { %4602 = vmatprep.subr.bf16.mxu0 %v7773_v50  ;;  %4766 = vmatprep.subr.bf16.mxu1 %v7776_v51  ;;  %v7860_v50 = vld [vmem:[#allocation5 + $0xfdc] ss:$48 sps:$4 sm:$0xff]   ;;  %v7855_v51 = vld [vmem:[#allocation5 + $0xfd0] ss:$48 sps:$4 sm:$0xff]  }
 0x1ad   :  { %4603 = vmatpush1.bf16.msra.mxu0 %v7771_v52  ;;  %4767 = vmatpush1.bf16.msra.mxu1 %v7774_v53  ;;  %v7858_v52 = vld [vmem:[#allocation5 + $0xfd8] ss:$48 sps:$4 sm:$0xff]   ;;  %v7863_v53 = vld [vmem:[#allocation5 + $0x1034] ss:$48 sps:$4 sm:$0xff]  }
 0x1ae   :  { %4604 = vmatprep.subr.bf16.mxu0 %v7779_v54  ;;  %4768 = vmatprep.subr.bf16.mxu1 %v7782_v55  ;;  %v7866_v54 = vld [vmem:[#allocation5 + $0x103c] ss:$48 sps:$4 sm:$0xff]   ;;  %v7861_v55 = vld [vmem:[#allocation5 + $0x1030] ss:$48 sps:$4 sm:$0xff]  }
 0x1b1   :  { %4605 = vmatpush1.bf16.msra.mxu0 %v7777_v56  ;;  %4769 = vmatpush1.bf16.msra.mxu1 %v7780_v57  ;;  %v7864_v56 = vld [vmem:[#allocation5 + $0x1038] ss:$48 sps:$4 sm:$0xff]   ;;  %v7869_v57 = vld [vmem:[#allocation5 + $0x1094] ss:$48 sps:$4 sm:$0xff]  }
 0x1b2   :  { %4606 = vmatprep.subr.bf16.mxu0 %v7785_v58  ;;  %4770 = vmatprep.subr.bf16.mxu1 %v7788_v59  ;;  %v7872_v58 = vld [vmem:[#allocation5 + $0x109c] ss:$48 sps:$4 sm:$0xff]   ;;  %v7867_v59 = vld [vmem:[#allocation5 + $0x1090] ss:$48 sps:$4 sm:$0xff]  }
 0x1b5   :  { %4607 = vmatpush1.bf16.msra.mxu0 %v7783_v60  ;;  %4771 = vmatpush1.bf16.msra.mxu1 %v7786_v61  ;;  %v7870_v60 = vld [vmem:[#allocation5 + $0x1098] ss:$48 sps:$4 sm:$0xff]   ;;  %v7875_v61 = vld [vmem:[#allocation5 + $0x10f4] ss:$48 sps:$4 sm:$0xff]  }
 0x1b6   :  { %4608 = vmatprep.subr.bf16.mxu0 %v7791_v62  ;;  %4772 = vmatprep.subr.bf16.mxu1 %v7794_v63  ;;  %v7878_v62 = vld [vmem:[#allocation5 + $0x10fc] ss:$48 sps:$4 sm:$0xff]   ;;  %v7873_v63 = vld [vmem:[#allocation5 + $0x10f0] ss:$48 sps:$4 sm:$0xff]  }
 0x1b9   :  { %4609 = vmatpush1.bf16.msra.mxu0 %v7789_v0  ;;  %4773 = vmatpush1.bf16.msra.mxu1 %v7792_v1  ;;  %v7876_v0 = vld [vmem:[#allocation5 + $0x10f8] ss:$48 sps:$4 sm:$0xff]   ;;  %v7881_v1 = vld [vmem:[#allocation5 + $0x1154] ss:$48 sps:$4 sm:$0xff]  }
 0x1ba   :  { %4619 = vmatprep.subr.bf16.mxu0 %v7797_v2  ;;  %4783 = vmatprep.subr.bf16.mxu1 %v7800_v3  ;;  %v7884_v2 = vld [vmem:[#allocation5 + $0x115c] ss:$48 sps:$4 sm:$0xff]   ;;  %v7879_v3 = vld [vmem:[#allocation5 + $0x1150] ss:$48 sps:$4 sm:$0xff]  }
 0x1bc   :  { %4611 = vmatmul.mubr.bf16.vlgmr.msra.gmra.mrb[4].mxu0 %v8636_v10  ;;  %4775 = vmatmul.mubr.bf16.vlgmr.msra.gmra.mrb[4].mxu1 %v8636_v10 }
 0x1bd   :  { %4620 = vmatpush1.bf16.msra.mxu0 %v7795_v4  ;;  %4784 = vmatpush1.bf16.msra.mxu1 %v7798_v6  ;;  %v7882_v4 = vld [vmem:[#allocation5 + $0x1158] ss:$48 sps:$4 sm:$0xff]   ;;  %v7887_v6 = vld [vmem:[#allocation5 + $0x11b4] ss:$48 sps:$4 sm:$0xff]  }
 0x1be   :  { %4621 = vmatprep.subr.bf16.mxu0 %v7803_v7  ;;  %4785 = vmatprep.subr.bf16.mxu1 %v7806_v8  ;;  %v7890_v7 = vld [vmem:[#allocation5 + $0x11bc] ss:$48 sps:$4 sm:$0xff]   ;;  %v7885_v8 = vld [vmem:[#allocation5 + $0x11b0] ss:$48 sps:$4 sm:$0xff]  }
 0x1bf   :  { %4651 = vmatprep.mubr.bf16.mxu0 %v8642_v15  ;;  %4815 = vmatprep.mubr.bf16.mxu1 %v8642_v15 }
 0x1c1   :  { %4622 = vmatpush1.bf16.msra.mxu0 %v7801_v9  ;;  %4786 = vmatpush1.bf16.msra.mxu1 %v7804_v11  ;;  %v7888_v9 = vld [vmem:[#allocation5 + $0x11b8] ss:$48 sps:$4 sm:$0xff]   ;;  %v7893_v11 = vld [vmem:[#allocation5 + $0x1214] ss:$48 sps:$4 sm:$0xff]  }
 0x1c2   :  { %4623 = vmatprep.subr.bf16.mxu0 %v7809_v12  ;;  %4787 = vmatprep.subr.bf16.mxu1 %v7812_v14  ;;  %v7896_v12 = vld [vmem:[#allocation5 + $0x121c] ss:$48 sps:$4 sm:$0xff]   ;;  %v7891_v14 = vld [vmem:[#allocation5 + $0x1210] ss:$48 sps:$4 sm:$0xff]  }
 0x1c5   :  { %4624 = vmatpush1.bf16.msra.mxu0 %v7807_v16  ;;  %4788 = vmatpush1.bf16.msra.mxu1 %v7810_v17  ;;  %v7894_v16 = vld [vmem:[#allocation5 + $0x1218] ss:$48 sps:$4 sm:$0xff]   ;;  %v7899_v17 = vld [vmem:[#allocation5 + $0x1274] ss:$48 sps:$4 sm:$0xff]  }
 0x1c6   :  { %4625 = vmatprep.subr.bf16.mxu0 %v7815_v18  ;;  %4789 = vmatprep.subr.bf16.mxu1 %v7818_v20  ;;  %v7902_v18 = vld [vmem:[#allocation5 + $0x127c] ss:$48 sps:$4 sm:$0xff]   ;;  %v7897_v20 = vld [vmem:[#allocation5 + $0x1270] ss:$48 sps:$4 sm:$0xff]  }
 0x1c9   :  { %4626 = vmatpush1.bf16.msra.mxu0 %v7813_v21  ;;  %4790 = vmatpush1.bf16.msra.mxu1 %v7816_v22  ;;  %v7900_v21 = vld [vmem:[#allocation5 + $0x1278] ss:$48 sps:$4 sm:$0xff]   ;;  %v7905_v22 = vld [vmem:[#allocation5 + $0x12d4] ss:$48 sps:$4 sm:$0xff]  }
 0x1ca   :  { %4627 = vmatprep.subr.bf16.mxu0 %v7821_v23  ;;  %4791 = vmatprep.subr.bf16.mxu1 %v7824_v24  ;;  %v7908_v23 = vld [vmem:[#allocation5 + $0x12dc] ss:$48 sps:$4 sm:$0xff]   ;;  %v7903_v24 = vld [vmem:[#allocation5 + $0x12d0] ss:$48 sps:$4 sm:$0xff]  }
 0x1cd   :  { %4628 = vmatpush1.bf16.msra.mxu0 %v7819_v25  ;;  %4792 = vmatpush1.bf16.msra.mxu1 %v7822_v13  ;;  %v7906_v25 = vld [vmem:[#allocation5 + $0x12d8] ss:$48 sps:$4 sm:$0xff]   ;;  %v7911_v13 = vld [vmem:[#allocation5 + $0x1334] ss:$48 sps:$4 sm:$0xff]  }
 0x1ce   :  { %4629 = vmatprep.subr.bf16.mxu0 %v7827_v27  ;;  %4793 = vmatprep.subr.bf16.mxu1 %v7830_v28  ;;  %v7914_v27 = vld [vmem:[#allocation5 + $0x133c] ss:$48 sps:$4 sm:$0xff]   ;;  %v7909_v28 = vld [vmem:[#allocation5 + $0x1330] ss:$48 sps:$4 sm:$0xff]  }
 0x1d1   :  { %4630 = vmatpush1.bf16.msra.mxu0 %v7825_v29  ;;  %4794 = vmatpush1.bf16.msra.mxu1 %v7828_v31  ;;  %v7912_v29 = vld [vmem:[#allocation5 + $0x1338] ss:$48 sps:$4 sm:$0xff]   ;;  %v7917_v31 = vld [vmem:[#allocation5 + $0x1394] ss:$48 sps:$4 sm:$0xff]  }
 0x1d2   :  { %4631 = vmatprep.subr.bf16.mxu0 %v7833_v32  ;;  %4795 = vmatprep.subr.bf16.mxu1 %v7836_v33  ;;  %v7920_v32 = vld [vmem:[#allocation5 + $0x139c] ss:$48 sps:$4 sm:$0xff]   ;;  %v7915_v33 = vld [vmem:[#allocation5 + $0x1390] ss:$48 sps:$4 sm:$0xff]  }
 0x1d5   :  { %4632 = vmatpush1.bf16.msra.mxu0 %v7831_v34  ;;  %4796 = vmatpush1.bf16.msra.mxu1 %v7834_v35  ;;  %v7918_v34 = vld [vmem:[#allocation5 + $0x1398] ss:$48 sps:$4 sm:$0xff]   ;;  %v7923_v35 = vld [vmem:[#allocation5 + $0x13f4] ss:$48 sps:$4 sm:$0xff]  }
 0x1d6   :  { %4633 = vmatprep.subr.bf16.mxu0 %v7839_v36  ;;  %4797 = vmatprep.subr.bf16.mxu1 %v7842_v37  ;;  %v7926_v36 = vld [vmem:[#allocation5 + $0x13fc] ss:$48 sps:$4 sm:$0xff]   ;;  %v7921_v37 = vld [vmem:[#allocation5 + $0x13f0] ss:$48 sps:$4 sm:$0xff]  }
 0x1d9   :  { %4634 = vmatpush1.bf16.msra.mxu0 %v7837_v38  ;;  %4798 = vmatpush1.bf16.msra.mxu1 %v7840_v39  ;;  %v7924_v38 = vld [vmem:[#allocation5 + $0x13f8] ss:$48 sps:$4 sm:$0xff]   ;;  %v7929_v39 = vld [vmem:[#allocation5 + $0x1454] ss:$48 sps:$4 sm:$0xff]  }
 0x1da   :  { %4635 = vmatprep.subr.bf16.mxu0 %v7845_v40  ;;  %4799 = vmatprep.subr.bf16.mxu1 %v7848_v41  ;;  %v7932_v40 = vld [vmem:[#allocation5 + $0x145c] ss:$48 sps:$4 sm:$0xff]  }
 0x1dd   :  { %4636 = vmatpush1.bf16.msra.mxu0 %v7843_v42  ;;  %4800 = vmatpush1.bf16.msra.mxu1 %v7846_v43 }
 0x1de   :  { %4637 = vmatprep.subr.bf16.mxu0 %v7851_v44  ;;  %4801 = vmatprep.subr.bf16.mxu1 %v7854_v45 }
 0x1e1   :  { %4638 = vmatpush1.bf16.msra.mxu0 %v7849_v46  ;;  %4802 = vmatpush1.bf16.msra.mxu1 %v7852_v47  ;;  %v7927_v47 = vld [vmem:[#allocation5 + $0x1450] ss:$48 sps:$4 sm:$0xff]  }
 0x1e2   :  { %4639 = vmatprep.subr.bf16.mxu0 %v7857_v49  ;;  %4803 = vmatprep.subr.bf16.mxu1 %v7860_v50  ;;  %v7930_v49 = vld [vmem:[#allocation5 + $0x1458] ss:$48 sps:$4 sm:$0xff]  }
 0x1e5   :  { %4640 = vmatpush1.bf16.msra.mxu0 %v7855_v51  ;;  %4804 = vmatpush1.bf16.msra.mxu1 %v7858_v52  ;;  %v7935_v52 = vld [vmem:[#allocation5 + $0x14b4] ss:$48 sps:$4 sm:$0xff]  }
 0x1e6   :  { %4641 = vmatprep.subr.bf16.mxu0 %v7863_v53  ;;  %4805 = vmatprep.subr.bf16.mxu1 %v7866_v54  ;;  %v7938_v53 = vld [vmem:[#allocation5 + $0x14bc] ss:$48 sps:$4 sm:$0xff]   ;;  %v7933_v54 = vld [vmem:[#allocation5 + $0x14b0] ss:$48 sps:$4 sm:$0xff]  }
 0x1e9   :  { %4642 = vmatpush1.bf16.msra.mxu0 %v7861_v55  ;;  %4806 = vmatpush1.bf16.msra.mxu1 %v7864_v56  ;;  %v7936_v55 = vld [vmem:[#allocation5 + $0x14b8] ss:$48 sps:$4 sm:$0xff]   ;;  %v7941_v56 = vld [vmem:[#allocation5 + $0x24] ss:$48 sps:$4 sm:$0xff]  }
 0x1ea   :  { %4643 = vmatprep.subr.bf16.mxu0 %v7869_v57  ;;  %4807 = vmatprep.subr.bf16.mxu1 %v7872_v58  ;;  %v7944_v57 = vld [vmem:[#allocation5 + $0x2c] ss:$48 sps:$4 sm:$0xff]   ;;  %v7939_v58 = vld [vmem:[#allocation5 + $0x20] ss:$48 sps:$4 sm:$0xff]  }
 0x1ed   :  { %4644 = vmatpush1.bf16.msra.mxu0 %v7867_v59  ;;  %4808 = vmatpush1.bf16.msra.mxu1 %v7870_v60  ;;  %v7942_v59 = vld [vmem:[#allocation5 + $0x28] ss:$48 sps:$4 sm:$0xff]   ;;  %v7947_v60 = vld [vmem:[#allocation5 + $0x84] ss:$48 sps:$4 sm:$0xff]  }
 0x1ee   :  { %4645 = vmatprep.subr.bf16.mxu0 %v7875_v61  ;;  %4809 = vmatprep.subr.bf16.mxu1 %v7878_v62  ;;  %v7950_v61 = vld [vmem:[#allocation5 + $0x8c] ss:$48 sps:$4 sm:$0xff]  }
 0x1ef   :  { %v8375_v62 = vld [vmem:[#allocation2 + $0x18] ss:$0 sps:$4 sm:$0xff]  }
 0x1f1   :  { %4646 = vmatpush1.bf16.msra.mxu0 %v7873_v63  ;;  %4810 = vmatpush1.bf16.msra.mxu1 %v7876_v0  ;;  %v7945_v63 = vld [vmem:[#allocation5 + $0x80] ss:$48 sps:$4 sm:$0xff]   ;;  %v7948_v0 = vld [vmem:[#allocation5 + $0x88] ss:$48 sps:$4 sm:$0xff]  }
 0x1f2   :  { %4647 = vmatprep.subr.bf16.mxu0 %v7881_v1  ;;  %4811 = vmatprep.subr.bf16.mxu1 %v7884_v2  ;;  %v7953_v1 = vld [vmem:[#allocation5 + $0xe4] ss:$48 sps:$4 sm:$0xff]   ;;  %v7956_v2 = vld [vmem:[#allocation5 + $0xec] ss:$48 sps:$4 sm:$0xff]  }
 0x1f5   :  { %4648 = vmatpush1.bf16.msra.mxu0 %v7879_v3  ;;  %4812 = vmatpush1.bf16.msra.mxu1 %v7882_v4  ;;  %v7951_v3 = vld [vmem:[#allocation5 + $0xe0] ss:$48 sps:$4 sm:$0xff]   ;;  %v7954_v4 = vld [vmem:[#allocation5 + $0xe8] ss:$48 sps:$4 sm:$0xff]  }
 0x1f6   :  { %4649 = vmatprep.subr.bf16.mxu0 %v7887_v6  ;;  %4813 = vmatprep.subr.bf16.mxu1 %v7890_v7  ;;  %v7959_v6 = vld [vmem:[#allocation5 + $0x144] ss:$48 sps:$4 sm:$0xff]   ;;  %v7962_v7 = vld [vmem:[#allocation5 + $0x14c] ss:$48 sps:$4 sm:$0xff]  }
 0x1f9   :  { %4650 = vmatpush1.bf16.msra.mxu0 %v7885_v8  ;;  %4814 = vmatpush1.bf16.msra.mxu1 %v7888_v9  ;;  %v7957_v8 = vld [vmem:[#allocation5 + $0x140] ss:$48 sps:$4 sm:$0xff]   ;;  %v7960_v9 = vld [vmem:[#allocation5 + $0x148] ss:$48 sps:$4 sm:$0xff]  }
 0x1fa   :  { %4660 = vmatprep.subr.bf16.mxu0 %v7893_v11  ;;  %4824 = vmatprep.subr.bf16.mxu1 %v7896_v12  ;;  %v7965_v11 = vld [vmem:[#allocation5 + $0x1a4] ss:$48 sps:$4 sm:$0xff]   ;;  %v7968_v12 = vld [vmem:[#allocation5 + $0x1ac] ss:$48 sps:$4 sm:$0xff]  }
 0x1fc   :  { %4652 = vmatmul.mubr.bf16.vlgmr.msra.gmra.mrb[4].mxu0 %v8650_v19  ;;  %4816 = vmatmul.mubr.bf16.vlgmr.msra.gmra.mrb[4].mxu1 %v8650_v19 }
 0x1fd   :  { %4661 = vmatpush1.bf16.msra.mxu0 %v7891_v14  ;;  %4825 = vmatpush1.bf16.msra.mxu1 %v7894_v16  ;;  %v7963_v14 = vld [vmem:[#allocation5 + $0x1a0] ss:$48 sps:$4 sm:$0xff]   ;;  %v7971_v16 = vld [vmem:[#allocation5 + $0x204] ss:$48 sps:$4 sm:$0xff]  }
 0x1fe   :  { %4662 = vmatprep.subr.bf16.mxu0 %v7899_v17  ;;  %4826 = vmatprep.subr.bf16.mxu1 %v7902_v18  ;;  %v7974_v17 = vld [vmem:[#allocation5 + $0x20c] ss:$48 sps:$4 sm:$0xff]   ;;  %v7969_v18 = vld [vmem:[#allocation5 + $0x200] ss:$48 sps:$4 sm:$0xff]  }
 0x1ff   :  { %4692 = vmatprep.mubr.bf16.mxu0 %v8526_v26  ;;  %4856 = vmatprep.mubr.bf16.mxu1 %v8526_v26 }
 0x201   :  { %4663 = vmatpush1.bf16.msra.mxu0 %v7897_v20  ;;  %4827 = vmatpush1.bf16.msra.mxu1 %v7900_v21  ;;  %v7972_v20 = vld [vmem:[#allocation5 + $0x208] ss:$48 sps:$4 sm:$0xff]   ;;  %v7977_v21 = vld [vmem:[#allocation5 + $0x264] ss:$48 sps:$4 sm:$0xff]  }
 0x202   :  { %4664 = vmatprep.subr.bf16.mxu0 %v7905_v22  ;;  %4828 = vmatprep.subr.bf16.mxu1 %v7908_v23  ;;  %v7980_v22 = vld [vmem:[#allocation5 + $0x26c] ss:$48 sps:$4 sm:$0xff]   ;;  %v7975_v23 = vld [vmem:[#allocation5 + $0x260] ss:$48 sps:$4 sm:$0xff]  }
 0x205   :  { %4665 = vmatpush1.bf16.msra.mxu0 %v7903_v24  ;;  %4829 = vmatpush1.bf16.msra.mxu1 %v7906_v25  ;;  %v7978_v24 = vld [vmem:[#allocation5 + $0x268] ss:$48 sps:$4 sm:$0xff]   ;;  %v7983_v25 = vld [vmem:[#allocation5 + $0x2c4] ss:$48 sps:$4 sm:$0xff]  }
 0x206   :  { %4666 = vmatprep.subr.bf16.mxu0 %v7911_v13  ;;  %4830 = vmatprep.subr.bf16.mxu1 %v7914_v27  ;;  %v7986_v13 = vld [vmem:[#allocation5 + $0x2cc] ss:$48 sps:$4 sm:$0xff]   ;;  %v7981_v27 = vld [vmem:[#allocation5 + $0x2c0] ss:$48 sps:$4 sm:$0xff]  }
 0x209   :  { %4667 = vmatpush1.bf16.msra.mxu0 %v7909_v28  ;;  %4831 = vmatpush1.bf16.msra.mxu1 %v7912_v29  ;;  %v7984_v28 = vld [vmem:[#allocation5 + $0x2c8] ss:$48 sps:$4 sm:$0xff]   ;;  %v7989_v29 = vld [vmem:[#allocation5 + $0x324] ss:$48 sps:$4 sm:$0xff]  }
 0x20a   :  { %4668 = vmatprep.subr.bf16.mxu0 %v7917_v31  ;;  %4832 = vmatprep.subr.bf16.mxu1 %v7920_v32  ;;  %v7992_v31 = vld [vmem:[#allocation5 + $0x32c] ss:$48 sps:$4 sm:$0xff]   ;;  %v7987_v32 = vld [vmem:[#allocation5 + $0x320] ss:$48 sps:$4 sm:$0xff]  }
 0x20d   :  { %4669 = vmatpush1.bf16.msra.mxu0 %v7915_v33  ;;  %4833 = vmatpush1.bf16.msra.mxu1 %v7918_v34  ;;  %v7990_v33 = vld [vmem:[#allocation5 + $0x328] ss:$48 sps:$4 sm:$0xff]   ;;  %v7995_v34 = vld [vmem:[#allocation5 + $0x384] ss:$48 sps:$4 sm:$0xff]  }
 0x20e   :  { %4670 = vmatprep.subr.bf16.mxu0 %v7923_v35  ;;  %4834 = vmatprep.subr.bf16.mxu1 %v7926_v36  ;;  %v7998_v35 = vld [vmem:[#allocation5 + $0x38c] ss:$48 sps:$4 sm:$0xff]   ;;  %v7993_v36 = vld [vmem:[#allocation5 + $0x380] ss:$48 sps:$4 sm:$0xff]  }
 0x20f   :  { %v8670_v41 = vpop.f32.mrb[0].mxu0  ;;  %v8672_v42 = vpop.f32.mrb[0].mxu1 }
 0x210   :  { %v8674_v43 = vpop.f32.mrb[1].mxu0  ;;  %v8676_v44 = vpop.f32.mrb[1].mxu1 }
 0x211   :  { %v4370_v45 = vpop.f32.mrb[2].mxu0  ;;  %v4534_v46 = vpop.f32.mrb[2].mxu1  ;;  %4671 = vmatpush1.bf16.msra.mxu0 %v7921_v37  ;;  %4835 = vmatpush1.bf16.msra.mxu1 %v7924_v38  ;;  %v7996_v37 = vld [vmem:[#allocation5 + $0x388] ss:$48 sps:$4 sm:$0xff]   ;;  %v8001_v38 = vld [vmem:[#allocation5 + $0x3e4] ss:$48 sps:$4 sm:$0xff]  }
 0x212   :  { %v4371_v50 = vpop.f32.mrb[3].mxu0  ;;  %v4535_v51 = vpop.f32.mrb[3].mxu1  ;;  %4672 = vmatprep.subr.bf16.mxu0 %v7929_v39  ;;  %4836 = vmatprep.subr.bf16.mxu1 %v7932_v40  ;;  %v8004_v39 = vld [vmem:[#allocation5 + $0x3ec] ss:$48 sps:$4 sm:$0xff]   ;;  %v7999_v40 = vld [vmem:[#allocation5 + $0x3e0] ss:$48 sps:$4 sm:$0xff]  }
 0x213   :  { %v8002_v45 = vld [vmem:[#allocation5 + $0x3e8] ss:$48 sps:$4 sm:$0xff]   ;;  %v8007_v46 = vld [vmem:[#allocation5 + $0x444] ss:$48 sps:$4 sm:$0xff]  }
 0x214   :  { %v8008_v50 = vld [vmem:[#allocation5 + $0x448] ss:$48 sps:$4 sm:$0xff]   ;;  %v8013_v51 = vld [vmem:[#allocation5 + $0x4a4] ss:$48 sps:$4 sm:$0xff]  }
 0x215   :  { %4673 = vmatpush1.bf16.msra.mxu0 %v7927_v47  ;;  %4837 = vmatpush1.bf16.msra.mxu1 %v7930_v49  ;;  %v8010_v47 = vld [vmem:[#allocation5 + $0x44c] ss:$48 sps:$4 sm:$0xff]   ;;  %v8005_v49 = vld [vmem:[#allocation5 + $0x440] ss:$48 sps:$4 sm:$0xff]  }
 0x216   :  { %4674 = vmatprep.subr.bf16.mxu0 %v7935_v52  ;;  %4838 = vmatprep.subr.bf16.mxu1 %v7938_v53  ;;  %v8016_v52 = vld [vmem:[#allocation5 + $0x4ac] ss:$48 sps:$4 sm:$0xff]   ;;  %v8011_v53 = vld [vmem:[#allocation5 + $0x4a0] ss:$48 sps:$4 sm:$0xff]  }
 0x219   :  { %4675 = vmatpush1.bf16.msra.mxu0 %v7933_v54  ;;  %4839 = vmatpush1.bf16.msra.mxu1 %v7936_v55  ;;  %v8014_v54 = vld [vmem:[#allocation5 + $0x4a8] ss:$48 sps:$4 sm:$0xff]   ;;  %v8019_v55 = vld [vmem:[#allocation5 + $0x504] ss:$48 sps:$4 sm:$0xff]  }
 0x21a   :  { %4865 = vmatprep.subr.bf16.mxu0 %v7941_v56  ;;  %5029 = vmatprep.subr.bf16.mxu1 %v7944_v57  ;;  %v8022_v56 = vld [vmem:[#allocation5 + $0x50c] ss:$48 sps:$4 sm:$0xff]   ;;  %v8017_v57 = vld [vmem:[#allocation5 + $0x500] ss:$48 sps:$4 sm:$0xff]  }
 0x21c   :  { %4693 = vmatmul.mubr.bf16.vlgmr.msra.gmra.mrb[4].mxu0 %v8375_v62  ;;  %4857 = vmatmul.mubr.bf16.vlgmr.msra.gmra.mrb[4].mxu1 %v8375_v62  ;;  %v8026_v62 = vld [vmem:[#allocation5 + $0x568] ss:$48 sps:$4 sm:$0xff]  }
 0x21d   :  { %4866 = vmatpush1.bf16.msra.mxu0 %v7939_v58  ;;  %5030 = vmatpush1.bf16.msra.mxu1 %v7942_v59  ;;  %v8020_v58 = vld [vmem:[#allocation5 + $0x508] ss:$48 sps:$4 sm:$0xff]   ;;  %v8025_v59 = vld [vmem:[#allocation5 + $0x564] ss:$48 sps:$4 sm:$0xff]  }
 0x21e   :  { %4867 = vmatprep.subr.bf16.mxu0 %v7947_v60  ;;  %5031 = vmatprep.subr.bf16.mxu1 %v7950_v61  ;;  %v8028_v60 = vld [vmem:[#allocation5 + $0x56c] ss:$48 sps:$4 sm:$0xff]   ;;  %v8023_v61 = vld [vmem:[#allocation5 + $0x560] ss:$48 sps:$4 sm:$0xff]  }
 0x21f   :  { %4897 = vmatprep.mubr.bf16.mxu0 %v8618_v48  ;;  %5061 = vmatprep.mubr.bf16.mxu1 %v8618_v48  ;;  %v7966_v48 = vld [vmem:[#allocation5 + $0x1a8] ss:$48 sps:$4 sm:$0xff]  }
 0x221   :  { %4868 = vmatpush1.bf16.msra.mxu0 %v7945_v63  ;;  %5032 = vmatpush1.bf16.msra.mxu1 %v7948_v0  ;;  %v8031_v63 = vld [vmem:[#allocation5 + $0x5c4] ss:$48 sps:$4 sm:$0xff]   ;;  %v8034_v0 = vld [vmem:[#allocation5 + $0x5cc] ss:$48 sps:$4 sm:$0xff]  }
 0x222   :  { %4869 = vmatprep.subr.bf16.mxu0 %v7953_v1  ;;  %5033 = vmatprep.subr.bf16.mxu1 %v7956_v2  ;;  %v8029_v1 = vld [vmem:[#allocation5 + $0x5c0] ss:$48 sps:$4 sm:$0xff]   ;;  %v8032_v2 = vld [vmem:[#allocation5 + $0x5c8] ss:$48 sps:$4 sm:$0xff]  }
 0x225   :  { %4870 = vmatpush1.bf16.msra.mxu0 %v7951_v3  ;;  %5034 = vmatpush1.bf16.msra.mxu1 %v7954_v4  ;;  %v8037_v3 = vld [vmem:[#allocation5 + $0x624] ss:$48 sps:$4 sm:$0xff]   ;;  %v8040_v4 = vld [vmem:[#allocation5 + $0x62c] ss:$48 sps:$4 sm:$0xff]  }
 0x226   :  { %4871 = vmatprep.subr.bf16.mxu0 %v7959_v6  ;;  %5035 = vmatprep.subr.bf16.mxu1 %v7962_v7  ;;  %v8035_v6 = vld [vmem:[#allocation5 + $0x620] ss:$48 sps:$4 sm:$0xff]   ;;  %v8038_v7 = vld [vmem:[#allocation5 + $0x628] ss:$48 sps:$4 sm:$0xff]  }
 0x229   :  { %4872 = vmatpush1.bf16.msra.mxu0 %v7957_v8  ;;  %5036 = vmatpush1.bf16.msra.mxu1 %v7960_v9  ;;  %v8043_v8 = vld [vmem:[#allocation5 + $0x684] ss:$48 sps:$4 sm:$0xff]   ;;  %v8046_v9 = vld [vmem:[#allocation5 + $0x68c] ss:$48 sps:$4 sm:$0xff]  }
 0x22a   :  { %4873 = vmatprep.subr.bf16.mxu0 %v7965_v11  ;;  %5037 = vmatprep.subr.bf16.mxu1 %v7968_v12  ;;  %v8041_v11 = vld [vmem:[#allocation5 + $0x680] ss:$48 sps:$4 sm:$0xff]   ;;  %v8044_v12 = vld [vmem:[#allocation5 + $0x688] ss:$48 sps:$4 sm:$0xff]  }
 0x22d   :  { %4874 = vmatpush1.bf16.msra.mxu0 %v7963_v14  ;;  %5038 = vmatpush1.bf16.msra.mxu1 %v7966_v48  ;;  %v8049_v14 = vld [vmem:[#allocation5 + $0x6e4] ss:$48 sps:$4 sm:$0xff]   ;;  %v8052_v48 = vld [vmem:[#allocation5 + $0x6ec] ss:$48 sps:$4 sm:$0xff]  }
 0x22e   :  { %4875 = vmatprep.subr.bf16.mxu0 %v7971_v16  ;;  %5039 = vmatprep.subr.bf16.mxu1 %v7974_v17  ;;  %v8047_v16 = vld [vmem:[#allocation5 + $0x6e0] ss:$48 sps:$4 sm:$0xff]   ;;  %v8050_v17 = vld [vmem:[#allocation5 + $0x6e8] ss:$48 sps:$4 sm:$0xff]  }
 0x231   :  { %4876 = vmatpush1.bf16.msra.mxu0 %v7969_v18  ;;  %5040 = vmatpush1.bf16.msra.mxu1 %v7972_v20  ;;  %v8055_v18 = vld [vmem:[#allocation5 + $0x744] ss:$48 sps:$4 sm:$0xff]   ;;  %v8053_v20 = vld [vmem:[#allocation5 + $0x740] ss:$48 sps:$4 sm:$0xff]  }
 0x232   :  { %4877 = vmatprep.subr.bf16.mxu0 %v7977_v21  ;;  %5041 = vmatprep.subr.bf16.mxu1 %v7980_v22  ;;  %v8056_v21 = vld [vmem:[#allocation5 + $0x748] ss:$48 sps:$4 sm:$0xff]   ;;  %v764_v22 = vlaneseq }
 0x235   :  { %4878 = vmatpush1.bf16.msra.mxu0 %v7975_v23  ;;  %5042 = vmatpush1.bf16.msra.mxu1 %v7978_v24  ;;  %v8061_v23 = vld [vmem:[#allocation5 + $0x7a4] ss:$48 sps:$4 sm:$0xff]   ;;  %v8064_v24 = vld [vmem:[#allocation5 + $0x7ac] ss:$48 sps:$4 sm:$0xff]  }
 0x236   :  { %4879 = vmatprep.subr.bf16.mxu0 %v7983_v25  ;;  %5043 = vmatprep.subr.bf16.mxu1 %v7986_v13  ;;  %v8062_v25 = vld [vmem:[#allocation5 + $0x7a8] ss:$48 sps:$4 sm:$0xff]   ;;  %v8684_v13 = vshrl.u32 %v764_v22, 7 }
 0x237   :  { %v8134_v22 = vld [vmem:[#allocation5 + $0xc28] ss:$48 sps:$4 sm:$0xff]  }
 0x239   :  { %4880 = vmatpush1.bf16.msra.mxu0 %v7981_v27  ;;  %5044 = vmatpush1.bf16.msra.mxu1 %v7984_v28  ;;  %v8067_v27 = vld [vmem:[#allocation5 + $0x804] ss:$48 sps:$4 sm:$0xff]   ;;  %v8070_v28 = vld [vmem:[#allocation5 + $0x80c] ss:$48 sps:$4 sm:$0xff]  }
 0x23a   :  { %4881 = vmatprep.subr.bf16.mxu0 %v7989_v29  ;;  %5045 = vmatprep.subr.bf16.mxu1 %v7992_v31  ;;  %v790_v29 = vsub.s32 6, %v8684_v13  ;;  %v8687_v31 = vld [vmem:[#allocation7] sm:$0xff] }
 0x23d   :  { %4882 = vmatpush1.bf16.msra.mxu0 %v7987_v32  ;;  %5046 = vmatpush1.bf16.msra.mxu1 %v7990_v33  ;;  %v8065_v32 = vld [vmem:[#allocation5 + $0x800] ss:$48 sps:$4 sm:$0xff]   ;;  %v8068_v33 = vld [vmem:[#allocation5 + $0x808] ss:$48 sps:$4 sm:$0xff]  }
 0x23e   :  { %4883 = vmatprep.subr.bf16.mxu0 %v7995_v34  ;;  %5047 = vmatprep.subr.bf16.mxu1 %v7998_v35  ;;  %v8073_v34 = vld [vmem:[#allocation5 + $0x864] ss:$48 sps:$4 sm:$0xff]   ;;  %v8076_v35 = vld [vmem:[#allocation5 + $0x86c] ss:$48 sps:$4 sm:$0xff]  }
 0x241   :  { %4884 = vmatpush1.bf16.msra.mxu0 %v7993_v36  ;;  %5048 = vmatpush1.bf16.msra.mxu1 %v7996_v37  ;;  %v8690_v36 = vrot.slane %v8687_v31, %v790_v29  ;;  %v8071_v37 = vld [vmem:[#allocation5 + $0x860] ss:$48 sps:$4 sm:$0xff]  }
 0x242   :  { %4885 = vmatprep.subr.bf16.mxu0 %v8001_v38  ;;  %5049 = vmatprep.subr.bf16.mxu1 %v8004_v39  ;;  %v8074_v38 = vld [vmem:[#allocation5 + $0x868] ss:$48 sps:$4 sm:$0xff]   ;;  %v8079_v39 = vld [vmem:[#allocation5 + $0x8c4] ss:$48 sps:$4 sm:$0xff]   ;;  %v8143_v29 = vld [vmem:[#allocation5 + $0xce0] ss:$48 sps:$4 sm:$0xff]  }
 0x245   :  { %4886 = vmatpush1.bf16.msra.mxu0 %v7999_v40  ;;  %5050 = vmatpush1.bf16.msra.mxu1 %v8002_v45  ;;  %v8082_v40 = vld [vmem:[#allocation5 + $0x8cc] ss:$48 sps:$4 sm:$0xff]   ;;  %v8077_v45 = vld [vmem:[#allocation5 + $0x8c0] ss:$48 sps:$4 sm:$0xff]  }
 0x246   :  { %4887 = vmatprep.subr.bf16.mxu0 %v8007_v46  ;;  %5051 = vmatprep.subr.bf16.mxu1 %v8010_v47  ;;  %v8080_v46 = vld [vmem:[#allocation5 + $0x8c8] ss:$48 sps:$4 sm:$0xff]   ;;  %v8085_v47 = vld [vmem:[#allocation5 + $0x924] ss:$48 sps:$4 sm:$0xff]  }
 0x249   :  { %4888 = vmatpush1.bf16.msra.mxu0 %v8005_v49  ;;  %5052 = vmatpush1.bf16.msra.mxu1 %v8008_v50  ;;  %v8088_v49 = vld [vmem:[#allocation5 + $0x92c] ss:$48 sps:$4 sm:$0xff]   ;;  %v8083_v50 = vld [vmem:[#allocation5 + $0x920] ss:$48 sps:$4 sm:$0xff]  }
 0x24a   :  { %4889 = vmatprep.subr.bf16.mxu0 %v8013_v51  ;;  %5053 = vmatprep.subr.bf16.mxu1 %v8016_v52  ;;  %v8086_v51 = vld [vmem:[#allocation5 + $0x928] ss:$48 sps:$4 sm:$0xff]   ;;  %v8091_v52 = vld [vmem:[#allocation5 + $0x984] ss:$48 sps:$4 sm:$0xff]  }
 0x24d   :  { %4890 = vmatpush1.bf16.msra.mxu0 %v8011_v53  ;;  %5054 = vmatpush1.bf16.msra.mxu1 %v8014_v54  ;;  %v8094_v53 = vld [vmem:[#allocation5 + $0x98c] ss:$48 sps:$4 sm:$0xff]   ;;  %v8089_v54 = vld [vmem:[#allocation5 + $0x980] ss:$48 sps:$4 sm:$0xff]  }
 0x24e   :  { %4891 = vmatprep.subr.bf16.mxu0 %v8019_v55  ;;  %5055 = vmatprep.subr.bf16.mxu1 %v8022_v56  ;;  %v8092_v55 = vld [vmem:[#allocation5 + $0x988] ss:$48 sps:$4 sm:$0xff]   ;;  %v8097_v56 = vld [vmem:[#allocation5 + $0x9e4] ss:$48 sps:$4 sm:$0xff]  }
 0x251   :  { %4892 = vmatpush1.bf16.msra.mxu0 %v8017_v57  ;;  %5056 = vmatpush1.bf16.msra.mxu1 %v8020_v58  ;;  %v8100_v57 = vld [vmem:[#allocation5 + $0x9ec] ss:$48 sps:$4 sm:$0xff]   ;;  %v8095_v58 = vld [vmem:[#allocation5 + $0x9e0] ss:$48 sps:$4 sm:$0xff]  }
 0x252   :  { %4893 = vmatprep.subr.bf16.mxu0 %v8025_v59  ;;  %5057 = vmatprep.subr.bf16.mxu1 %v8028_v60  ;;  %v8098_v59 = vld [vmem:[#allocation5 + $0x9e8] ss:$48 sps:$4 sm:$0xff]   ;;  %v8103_v60 = vld [vmem:[#allocation5 + $0xa44] ss:$48 sps:$4 sm:$0xff]  }
 0x255   :  { %4894 = vmatpush1.bf16.msra.mxu0 %v8023_v61  ;;  %5058 = vmatpush1.bf16.msra.mxu1 %v8026_v62  ;;  %v8106_v61 = vld [vmem:[#allocation5 + $0xa4c] ss:$48 sps:$4 sm:$0xff]   ;;  %v8101_v62 = vld [vmem:[#allocation5 + $0xa40] ss:$48 sps:$4 sm:$0xff]  }
 0x256   :  { %4895 = vmatprep.subr.bf16.mxu0 %v8031_v63  ;;  %5059 = vmatprep.subr.bf16.mxu1 %v8034_v0  ;;  %v8104_v63 = vld [vmem:[#allocation5 + $0xa48] ss:$48 sps:$4 sm:$0xff]   ;;  %v8109_v0 = vld [vmem:[#allocation5 + $0xaa4] ss:$48 sps:$4 sm:$0xff]  }
 0x259   :  { %4896 = vmatpush1.bf16.msra.mxu0 %v8029_v1  ;;  %5060 = vmatpush1.bf16.msra.mxu1 %v8032_v2  ;;  %v8112_v1 = vld [vmem:[#allocation5 + $0xaac] ss:$48 sps:$4 sm:$0xff]   ;;  %v8107_v2 = vld [vmem:[#allocation5 + $0xaa0] ss:$48 sps:$4 sm:$0xff]  }
 0x25a   :  { %4906 = vmatprep.subr.bf16.mxu0 %v8037_v3  ;;  %5070 = vmatprep.subr.bf16.mxu1 %v8040_v4  ;;  %v8110_v3 = vld [vmem:[#allocation5 + $0xaa8] ss:$48 sps:$4 sm:$0xff]   ;;  %v8115_v4 = vld [vmem:[#allocation5 + $0xb04] ss:$48 sps:$4 sm:$0xff]  }
 0x25c   :  { %4898 = vmatmul.mubr.bf16.vlgmr.msra.gmra.mrb[8].mxu0 %v8622_v5  ;;  %5062 = vmatmul.mubr.bf16.vlgmr.msra.gmra.mrb[8].mxu1 %v8622_v5  ;;  %v8058_v5 = vld [vmem:[#allocation5 + $0x74c] ss:$48 sps:$4 sm:$0xff]  }
 0x25d   :  { %4907 = vmatpush1.bf16.msra.mxu0 %v8035_v6  ;;  %5071 = vmatpush1.bf16.msra.mxu1 %v8038_v7  ;;  %v8118_v6 = vld [vmem:[#allocation5 + $0xb0c] ss:$48 sps:$4 sm:$0xff]   ;;  %v8113_v7 = vld [vmem:[#allocation5 + $0xb00] ss:$48 sps:$4 sm:$0xff]  }
 0x25e   :  { %4908 = vmatprep.subr.bf16.mxu0 %v8043_v8  ;;  %5072 = vmatprep.subr.bf16.mxu1 %v8046_v9  ;;  %v8116_v8 = vld [vmem:[#allocation5 + $0xb08] ss:$48 sps:$4 sm:$0xff]   ;;  %v8121_v9 = vld [vmem:[#allocation5 + $0xb64] ss:$48 sps:$4 sm:$0xff]  }
 0x25f   :  { %4938 = vmatprep.mubr.bf16.mxu0 %v8630_v30  ;;  %5102 = vmatprep.mubr.bf16.mxu1 %v8630_v30  ;;  %v8059_v30 = vld [vmem:[#allocation5 + $0x7a0] ss:$48 sps:$4 sm:$0xff]  }
 0x261   :  { %4909 = vmatpush1.bf16.msra.mxu0 %v8041_v11  ;;  %5073 = vmatpush1.bf16.msra.mxu1 %v8044_v12  ;;  %v8124_v11 = vld [vmem:[#allocation5 + $0xb6c] ss:$48 sps:$4 sm:$0xff]   ;;  %v8119_v12 = vld [vmem:[#allocation5 + $0xb60] ss:$48 sps:$4 sm:$0xff]  }
 0x262   :  { %4910 = vmatprep.subr.bf16.mxu0 %v8049_v14  ;;  %5074 = vmatprep.subr.bf16.mxu1 %v8052_v48  ;;  %v8122_v14 = vld [vmem:[#allocation5 + $0xb68] ss:$48 sps:$4 sm:$0xff]   ;;  %v8127_v48 = vld [vmem:[#allocation5 + $0xbc4] ss:$48 sps:$4 sm:$0xff]  }
 0x265   :  { %4911 = vmatpush1.bf16.msra.mxu0 %v8047_v16  ;;  %5075 = vmatpush1.bf16.msra.mxu1 %v8050_v17  ;;  %v8130_v16 = vld [vmem:[#allocation5 + $0xbcc] ss:$48 sps:$4 sm:$0xff]   ;;  %v8125_v17 = vld [vmem:[#allocation5 + $0xbc0] ss:$48 sps:$4 sm:$0xff]  }
 0x266   :  { %4912 = vmatprep.subr.bf16.mxu0 %v8055_v18  ;;  %5076 = vmatprep.subr.bf16.mxu1 %v8058_v5  ;;  %v8128_v18 = vld [vmem:[#allocation5 + $0xbc8] ss:$48 sps:$4 sm:$0xff]   ;;  %v8133_v5 = vld [vmem:[#allocation5 + $0xc24] ss:$48 sps:$4 sm:$0xff]  }
 0x269   :  { %4913 = vmatpush1.bf16.msra.mxu0 %v8053_v20  ;;  %5077 = vmatpush1.bf16.msra.mxu1 %v8056_v21  ;;  %v8136_v20 = vld [vmem:[#allocation5 + $0xc2c] ss:$48 sps:$4 sm:$0xff]   ;;  %v8131_v21 = vld [vmem:[#allocation5 + $0xc20] ss:$48 sps:$4 sm:$0xff]  }
 0x26a   :  { %4914 = vmatprep.subr.bf16.mxu0 %v8061_v23  ;;  %5078 = vmatprep.subr.bf16.mxu1 %v8064_v24  ;;  %v8139_v23 = vld [vmem:[#allocation5 + $0xc84] ss:$48 sps:$4 sm:$0xff]   ;;  %v8142_v24 = vld [vmem:[#allocation5 + $0xc8c] ss:$48 sps:$4 sm:$0xff]  }
 0x26d   :  { %4915 = vmatpush1.bf16.msra.mxu0 %v8059_v30  ;;  %5079 = vmatpush1.bf16.msra.mxu1 %v8062_v25  ;;  %v8137_v30 = vld [vmem:[#allocation5 + $0xc80] ss:$48 sps:$4 sm:$0xff]   ;;  %v8140_v25 = vld [vmem:[#allocation5 + $0xc88] ss:$48 sps:$4 sm:$0xff]  }
 0x26e   :  { %4916 = vmatprep.subr.bf16.mxu0 %v8067_v27  ;;  %5080 = vmatprep.subr.bf16.mxu1 %v8070_v28  ;;  %v8145_v27 = vld [vmem:[#allocation5 + $0xce4] ss:$48 sps:$4 sm:$0xff]   ;;  %v8148_v28 = vld [vmem:[#allocation5 + $0xcec] ss:$48 sps:$4 sm:$0xff]  }
 0x271   :  { %4917 = vmatpush1.bf16.msra.mxu0 %v8065_v32  ;;  %5081 = vmatpush1.bf16.msra.mxu1 %v8068_v33  ;;  %v8146_v32 = vld [vmem:[#allocation5 + $0xce8] ss:$48 sps:$4 sm:$0xff]   ;;  %v8151_v33 = vld [vmem:[#allocation5 + $0xd44] ss:$48 sps:$4 sm:$0xff]  }
 0x272   :  { %4918 = vmatprep.subr.bf16.mxu0 %v8073_v34  ;;  %5082 = vmatprep.subr.bf16.mxu1 %v8076_v35  ;;  %v8149_v34 = vld [vmem:[#allocation5 + $0xd40] ss:$48 sps:$4 sm:$0xff]   ;;  %v8152_v35 = vld [vmem:[#allocation5 + $0xd48] ss:$48 sps:$4 sm:$0xff]  }
 0x275   :  { %4919 = vmatpush1.bf16.msra.mxu0 %v8071_v37  ;;  %5083 = vmatpush1.bf16.msra.mxu1 %v8074_v38  ;;  %v8157_v37 = vld [vmem:[#allocation5 + $0xda4] ss:$48 sps:$4 sm:$0xff]   ;;  %v8160_v38 = vld [vmem:[#allocation5 + $0xdac] ss:$48 sps:$4 sm:$0xff]  }
 0x276   :  { %4920 = vmatprep.subr.bf16.mxu0 %v8079_v39  ;;  %5084 = vmatprep.subr.bf16.mxu1 %v8082_v40  ;;  %v8155_v39 = vld [vmem:[#allocation5 + $0xda0] ss:$48 sps:$4 sm:$0xff]   ;;  %v8163_v40 = vld [vmem:[#allocation5 + $0xe04] ss:$48 sps:$4 sm:$0xff]  }
 0x279   :  { %4921 = vmatpush1.bf16.msra.mxu0 %v8077_v45  ;;  %5085 = vmatpush1.bf16.msra.mxu1 %v8080_v46  ;;  %v8166_v45 = vld [vmem:[#allocation5 + $0xe0c] ss:$48 sps:$4 sm:$0xff]   ;;  %v8161_v46 = vld [vmem:[#allocation5 + $0xe00] ss:$48 sps:$4 sm:$0xff]  }
 0x27a   :  { %4922 = vmatprep.subr.bf16.mxu0 %v8085_v47  ;;  %5086 = vmatprep.subr.bf16.mxu1 %v8088_v49  ;;  %v8164_v47 = vld [vmem:[#allocation5 + $0xe08] ss:$48 sps:$4 sm:$0xff]   ;;  %v8169_v49 = vld [vmem:[#allocation5 + $0xe64] ss:$48 sps:$4 sm:$0xff]  }
 0x27d   :  { %4923 = vmatpush1.bf16.msra.mxu0 %v8083_v50  ;;  %5087 = vmatpush1.bf16.msra.mxu1 %v8086_v51  ;;  %v8172_v50 = vld [vmem:[#allocation5 + $0xe6c] ss:$48 sps:$4 sm:$0xff]   ;;  %v8167_v51 = vld [vmem:[#allocation5 + $0xe60] ss:$48 sps:$4 sm:$0xff]  }
 0x27e   :  { %4924 = vmatprep.subr.bf16.mxu0 %v8091_v52  ;;  %5088 = vmatprep.subr.bf16.mxu1 %v8094_v53  ;;  %v8170_v52 = vld [vmem:[#allocation5 + $0xe68] ss:$48 sps:$4 sm:$0xff]   ;;  %v8175_v53 = vld [vmem:[#allocation5 + $0xec4] ss:$48 sps:$4 sm:$0xff]  }
 0x281   :  { %4925 = vmatpush1.bf16.msra.mxu0 %v8089_v54  ;;  %5089 = vmatpush1.bf16.msra.mxu1 %v8092_v55  ;;  %v8178_v54 = vld [vmem:[#allocation5 + $0xecc] ss:$48 sps:$4 sm:$0xff]   ;;  %v8173_v55 = vld [vmem:[#allocation5 + $0xec0] ss:$48 sps:$4 sm:$0xff]  }
 0x282   :  { %4926 = vmatprep.subr.bf16.mxu0 %v8097_v56  ;;  %5090 = vmatprep.subr.bf16.mxu1 %v8100_v57  ;;  %v8176_v56 = vld [vmem:[#allocation5 + $0xec8] ss:$48 sps:$4 sm:$0xff]   ;;  %v8181_v57 = vld [vmem:[#allocation5 + $0xf24] ss:$48 sps:$4 sm:$0xff]  }
 0x285   :  { %4927 = vmatpush1.bf16.msra.mxu0 %v8095_v58  ;;  %5091 = vmatpush1.bf16.msra.mxu1 %v8098_v59  ;;  %v8184_v58 = vld [vmem:[#allocation5 + $0xf2c] ss:$48 sps:$4 sm:$0xff]   ;;  %v8179_v59 = vld [vmem:[#allocation5 + $0xf20] ss:$48 sps:$4 sm:$0xff]  }
 0x286   :  { %4928 = vmatprep.subr.bf16.mxu0 %v8103_v60  ;;  %5092 = vmatprep.subr.bf16.mxu1 %v8106_v61  ;;  %v8182_v60 = vld [vmem:[#allocation5 + $0xf28] ss:$48 sps:$4 sm:$0xff]   ;;  %v8187_v61 = vld [vmem:[#allocation5 + $0xf84] ss:$48 sps:$4 sm:$0xff]  }
 0x289   :  { %4929 = vmatpush1.bf16.msra.mxu0 %v8101_v62  ;;  %5093 = vmatpush1.bf16.msra.mxu1 %v8104_v63  ;;  %v8190_v62 = vld [vmem:[#allocation5 + $0xf8c] ss:$48 sps:$4 sm:$0xff]   ;;  %v8185_v63 = vld [vmem:[#allocation5 + $0xf80] ss:$48 sps:$4 sm:$0xff]  }
 0x28a   :  { %4930 = vmatprep.subr.bf16.mxu0 %v8109_v0  ;;  %5094 = vmatprep.subr.bf16.mxu1 %v8112_v1  ;;  %v8188_v0 = vld [vmem:[#allocation5 + $0xf88] ss:$48 sps:$4 sm:$0xff]   ;;  %v8193_v1 = vld [vmem:[#allocation5 + $0xfe4] ss:$48 sps:$4 sm:$0xff]  }
 0x28d   :  { %4931 = vmatpush1.bf16.msra.mxu0 %v8107_v2  ;;  %5095 = vmatpush1.bf16.msra.mxu1 %v8110_v3  ;;  %v8196_v2 = vld [vmem:[#allocation5 + $0xfec] ss:$48 sps:$4 sm:$0xff]   ;;  %v8191_v3 = vld [vmem:[#allocation5 + $0xfe0] ss:$48 sps:$4 sm:$0xff]  }
 0x28e   :  { %4932 = vmatprep.subr.bf16.mxu0 %v8115_v4  ;;  %5096 = vmatprep.subr.bf16.mxu1 %v8118_v6  ;;  %v8194_v4 = vld [vmem:[#allocation5 + $0xfe8] ss:$48 sps:$4 sm:$0xff]   ;;  %v8199_v6 = vld [vmem:[#allocation5 + $0x1044] ss:$48 sps:$4 sm:$0xff]  }
 0x291   :  { %4933 = vmatpush1.bf16.msra.mxu0 %v8113_v7  ;;  %5097 = vmatpush1.bf16.msra.mxu1 %v8116_v8  ;;  %v8202_v7 = vld [vmem:[#allocation5 + $0x104c] ss:$48 sps:$4 sm:$0xff]   ;;  %v8197_v8 = vld [vmem:[#allocation5 + $0x1040] ss:$48 sps:$4 sm:$0xff]  }
 0x292   :  { %4934 = vmatprep.subr.bf16.mxu0 %v8121_v9  ;;  %5098 = vmatprep.subr.bf16.mxu1 %v8124_v11  ;;  %v8200_v9 = vld [vmem:[#allocation5 + $0x1048] ss:$48 sps:$4 sm:$0xff]   ;;  %v8205_v11 = vld [vmem:[#allocation5 + $0x10a4] ss:$48 sps:$4 sm:$0xff]  }
 0x295   :  { %4935 = vmatpush1.bf16.msra.mxu0 %v8119_v12  ;;  %5099 = vmatpush1.bf16.msra.mxu1 %v8122_v14  ;;  %v8208_v12 = vld [vmem:[#allocation5 + $0x10ac] ss:$48 sps:$4 sm:$0xff]   ;;  %v8203_v14 = vld [vmem:[#allocation5 + $0x10a0] ss:$48 sps:$4 sm:$0xff]  }
 0x296   :  { %4936 = vmatprep.subr.bf16.mxu0 %v8127_v48  ;;  %5100 = vmatprep.subr.bf16.mxu1 %v8130_v16  ;;  %v8206_v48 = vld [vmem:[#allocation5 + $0x10a8] ss:$48 sps:$4 sm:$0xff]   ;;  %v8211_v16 = vld [vmem:[#allocation5 + $0x1104] ss:$48 sps:$4 sm:$0xff]  }
 0x299   :  { %4937 = vmatpush1.bf16.msra.mxu0 %v8125_v17  ;;  %5101 = vmatpush1.bf16.msra.mxu1 %v8128_v18  ;;  %v8214_v17 = vld [vmem:[#allocation5 + $0x110c] ss:$48 sps:$4 sm:$0xff]   ;;  %v8209_v18 = vld [vmem:[#allocation5 + $0x1100] ss:$48 sps:$4 sm:$0xff]  }
 0x29a   :  { %4947 = vmatprep.subr.bf16.mxu0 %v8133_v5  ;;  %5111 = vmatprep.subr.bf16.mxu1 %v8136_v20  ;;  %v8212_v5 = vld [vmem:[#allocation5 + $0x1108] ss:$48 sps:$4 sm:$0xff]   ;;  %v8217_v20 = vld [vmem:[#allocation5 + $0x1164] ss:$48 sps:$4 sm:$0xff]  }
 0x29c   :  { %4939 = vmatmul.mubr.bf16.vlgmr.msra.gmra.mrb[8].mxu0 %v8636_v10  ;;  %5103 = vmatmul.mubr.bf16.vlgmr.msra.gmra.mrb[8].mxu1 %v8636_v10  ;;  %v8154_v10 = vld [vmem:[#allocation5 + $0xd4c] ss:$48 sps:$4 sm:$0xff]  }
 0x29d   :  { %4948 = vmatpush1.bf16.msra.mxu0 %v8131_v21  ;;  %5112 = vmatpush1.bf16.msra.mxu1 %v8134_v22  ;;  %v8220_v21 = vld [vmem:[#allocation5 + $0x116c] ss:$48 sps:$4 sm:$0xff]   ;;  %v8215_v22 = vld [vmem:[#allocation5 + $0x1160] ss:$48 sps:$4 sm:$0xff]  }
 0x29e   :  { %4949 = vmatprep.subr.bf16.mxu0 %v8139_v23  ;;  %5113 = vmatprep.subr.bf16.mxu1 %v8142_v24  ;;  %v8218_v23 = vld [vmem:[#allocation5 + $0x1168] ss:$48 sps:$4 sm:$0xff]   ;;  %v8223_v24 = vld [vmem:[#allocation5 + $0x11c4] ss:$48 sps:$4 sm:$0xff]  }
 0x29f   :  { %4979 = vmatprep.mubr.bf16.mxu0 %v8642_v15  ;;  %5143 = vmatprep.mubr.bf16.mxu1 %v8642_v15  ;;  %v8158_v15 = vld [vmem:[#allocation5 + $0xda8] ss:$48 sps:$4 sm:$0xff]  }
 0x2a1   :  { %4950 = vmatpush1.bf16.msra.mxu0 %v8137_v30  ;;  %5114 = vmatpush1.bf16.msra.mxu1 %v8140_v25  ;;  %v8226_v30 = vld [vmem:[#allocation5 + $0x11cc] ss:$48 sps:$4 sm:$0xff]   ;;  %v8221_v25 = vld [vmem:[#allocation5 + $0x11c0] ss:$48 sps:$4 sm:$0xff]  }
 0x2a2   :  { %4951 = vmatprep.subr.bf16.mxu0 %v8145_v27  ;;  %5115 = vmatprep.subr.bf16.mxu1 %v8148_v28  ;;  %v8224_v27 = vld [vmem:[#allocation5 + $0x11c8] ss:$48 sps:$4 sm:$0xff]   ;;  %v8229_v28 = vld [vmem:[#allocation5 + $0x1224] ss:$48 sps:$4 sm:$0xff]  }
 0x2a5   :  { %4952 = vmatpush1.bf16.msra.mxu0 %v8143_v29  ;;  %5116 = vmatpush1.bf16.msra.mxu1 %v8146_v32  ;;  %v8232_v29 = vld [vmem:[#allocation5 + $0x122c] ss:$48 sps:$4 sm:$0xff]   ;;  %v8227_v32 = vld [vmem:[#allocation5 + $0x1220] ss:$48 sps:$4 sm:$0xff]  }
 0x2a6   :  { %4953 = vmatprep.subr.bf16.mxu0 %v8151_v33  ;;  %5117 = vmatprep.subr.bf16.mxu1 %v8154_v10  ;;  %v8230_v33 = vld [vmem:[#allocation5 + $0x1228] ss:$48 sps:$4 sm:$0xff]   ;;  %v8235_v10 = vld [vmem:[#allocation5 + $0x1284] ss:$48 sps:$4 sm:$0xff]  }
 0x2a9   :  { %4954 = vmatpush1.bf16.msra.mxu0 %v8149_v34  ;;  %5118 = vmatpush1.bf16.msra.mxu1 %v8152_v35  ;;  %v8238_v34 = vld [vmem:[#allocation5 + $0x128c] ss:$48 sps:$4 sm:$0xff]   ;;  %v8233_v35 = vld [vmem:[#allocation5 + $0x1280] ss:$48 sps:$4 sm:$0xff]  }
 0x2aa   :  { %4955 = vmatprep.subr.bf16.mxu0 %v8157_v37  ;;  %5119 = vmatprep.subr.bf16.mxu1 %v8160_v38  ;;  %v8236_v37 = vld [vmem:[#allocation5 + $0x1288] ss:$48 sps:$4 sm:$0xff]   ;;  %v8241_v38 = vld [vmem:[#allocation5 + $0x12e4] ss:$48 sps:$4 sm:$0xff]  }
 0x2ad   :  { %4956 = vmatpush1.bf16.msra.mxu0 %v8155_v39  ;;  %5120 = vmatpush1.bf16.msra.mxu1 %v8158_v15  ;;  %v8244_v39 = vld [vmem:[#allocation5 + $0x12ec] ss:$48 sps:$4 sm:$0xff]   ;;  %v8239_v15 = vld [vmem:[#allocation5 + $0x12e0] ss:$48 sps:$4 sm:$0xff]  }
 0x2ae   :  { %4957 = vmatprep.subr.bf16.mxu0 %v8163_v40  ;;  %5121 = vmatprep.subr.bf16.mxu1 %v8166_v45  ;;  %v8242_v40 = vld [vmem:[#allocation5 + $0x12e8] ss:$48 sps:$4 sm:$0xff]   ;;  %v8247_v45 = vld [vmem:[#allocation5 + $0x1344] ss:$48 sps:$4 sm:$0xff]  }
 0x2b1   :  { %4958 = vmatpush1.bf16.msra.mxu0 %v8161_v46  ;;  %5122 = vmatpush1.bf16.msra.mxu1 %v8164_v47  ;;  %v8245_v46 = vld [vmem:[#allocation5 + $0x1340] ss:$48 sps:$4 sm:$0xff]   ;;  %v8248_v47 = vld [vmem:[#allocation5 + $0x1348] ss:$48 sps:$4 sm:$0xff]  }
 0x2b2   :  { %4959 = vmatprep.subr.bf16.mxu0 %v8169_v49  ;;  %5123 = vmatprep.subr.bf16.mxu1 %v8172_v50  ;;  %v8253_v49 = vld [vmem:[#allocation5 + $0x13a4] ss:$48 sps:$4 sm:$0xff]   ;;  %v8256_v50 = vld [vmem:[#allocation5 + $0x13ac] ss:$48 sps:$4 sm:$0xff]  }
 0x2b5   :  { %4960 = vmatpush1.bf16.msra.mxu0 %v8167_v51  ;;  %5124 = vmatpush1.bf16.msra.mxu1 %v8170_v52  ;;  %v782_v51 = vsub.s32 4, %v8684_v13  ;;  %v8254_v52 = vld [vmem:[#allocation5 + $0x13a8] ss:$48 sps:$4 sm:$0xff]  }
 0x2b6   :  { %4961 = vmatprep.subr.bf16.mxu0 %v8175_v53  ;;  %5125 = vmatprep.subr.bf16.mxu1 %v8178_v54  ;;  %v8259_v53 = vld [vmem:[#allocation5 + $0x1404] ss:$48 sps:$4 sm:$0xff]   ;;  %v8262_v54 = vld [vmem:[#allocation5 + $0x140c] ss:$48 sps:$4 sm:$0xff]  }
 0x2b9   :  { %4962 = vmatpush1.bf16.msra.mxu0 %v8173_v55  ;;  %5126 = vmatpush1.bf16.msra.mxu1 %v8176_v56  ;;  %v770_v55 = vsub.s32 1, %v8684_v13  ;;  %v778_v56 = vsub.s32 3, %v8684_v13 }
 0x2ba   :  { %4963 = vmatprep.subr.bf16.mxu0 %v8181_v57  ;;  %5127 = vmatprep.subr.bf16.mxu1 %v8184_v58  ;;  %v783_v57 = vrot.slane %v8687_v31, %v782_v51  ;;  %v8257_v58 = vld [vmem:[#allocation5 + $0x1400] ss:$48 sps:$4 sm:$0xff]   ;;  %v8296_v51 = vld [vmem:[#allocation8 + $0xe8] sm:$0xff]  }
 0x2bd   :  { %4964 = vmatpush1.bf16.msra.mxu0 %v8179_v59  ;;  %5128 = vmatpush1.bf16.msra.mxu1 %v8182_v60  ;;  %v8260_v59 = vld [vmem:[#allocation5 + $0x1408] ss:$48 sps:$4 sm:$0xff]   ;;  %v8265_v60 = vld [vmem:[#allocation5 + $0x1464] ss:$48 sps:$4 sm:$0xff]  }
 0x2be   :  { %4965 = vmatprep.subr.bf16.mxu0 %v8187_v61  ;;  %5129 = vmatprep.subr.bf16.mxu1 %v8190_v62  ;;  %v8268_v61 = vld [vmem:[#allocation5 + $0x146c] ss:$48 sps:$4 sm:$0xff]   ;;  %v771_v62 = vrot.slane %v8687_v31, %v770_v55 }
 0x2c1   :  { %4966 = vmatpush1.bf16.msra.mxu0 %v8185_v63  ;;  %5130 = vmatpush1.bf16.msra.mxu1 %v8188_v0 }
 0x2c2   :  { %4967 = vmatprep.subr.bf16.mxu0 %v8193_v1  ;;  %5131 = vmatprep.subr.bf16.mxu1 %v8196_v2  ;;  %v779_v1 = vrot.slane %v8687_v31, %v778_v56 }
 0x2c5   :  { %4968 = vmatpush1.bf16.msra.mxu0 %v8191_v3  ;;  %5132 = vmatpush1.bf16.msra.mxu1 %v8194_v4 }
 0x2c6   :  { %4969 = vmatprep.subr.bf16.mxu0 %v8199_v6  ;;  %5133 = vmatprep.subr.bf16.mxu1 %v8202_v7 }
 0x2c9   :  { %4970 = vmatpush1.bf16.msra.mxu0 %v8197_v8  ;;  %5134 = vmatpush1.bf16.msra.mxu1 %v8200_v9  ;;  %v8263_v9 = vld [vmem:[#allocation5 + $0x1460] ss:$48 sps:$4 sm:$0xff]  }
 0x2ca   :  { %4971 = vmatprep.subr.bf16.mxu0 %v8205_v11  ;;  %5135 = vmatprep.subr.bf16.mxu1 %v8208_v12  ;;  %v8266_v11 = vld [vmem:[#allocation5 + $0x1468] ss:$48 sps:$4 sm:$0xff]  }
 0x2cd   :  { %4972 = vmatpush1.bf16.msra.mxu0 %v8203_v14  ;;  %5136 = vmatpush1.bf16.msra.mxu1 %v8206_v48  ;;  %v8271_v48 = vld [vmem:[#allocation5 + $0x14c4] ss:$48 sps:$4 sm:$0xff]  }
 0x2ce   :  { %4973 = vmatprep.subr.bf16.mxu0 %v8211_v16  ;;  %5137 = vmatprep.subr.bf16.mxu1 %v8214_v17  ;;  %v8274_v16 = vld [vmem:[#allocation5 + $0x14cc] ss:$48 sps:$4 sm:$0xff]   ;;  %v7166_v17 = vadd.f32 %v8674_v43, %v771_v62  ;;  %v8279_v43 = vld [vmem:[#allocation8 + $0x48] sm:$0xff]  }
 0x2d1   :  { %4974 = vmatpush1.bf16.msra.mxu0 %v8209_v18  ;;  %5138 = vmatpush1.bf16.msra.mxu1 %v8212_v5  ;;  %v8269_v18 = vld [vmem:[#allocation5 + $0x14c0] ss:$48 sps:$4 sm:$0xff]   ;;  %v8272_v5 = vld [vmem:[#allocation5 + $0x14c8] ss:$48 sps:$4 sm:$0xff]  }
 0x2d2   :  { %4975 = vmatprep.subr.bf16.mxu0 %v8217_v20  ;;  %5139 = vmatprep.subr.bf16.mxu1 %v8220_v21  ;;  %v8275_v20 = vld [vmem:[#allocation8 + $0x40] sm:$0xff]  }
 0x2d3   :  { %v8276_v21 = vld [vmem:[#allocation8 + $0xc0] sm:$0xff]  }
 0x2d5   :  { %4976 = vmatpush1.bf16.msra.mxu0 %v8215_v22  ;;  %5140 = vmatpush1.bf16.msra.mxu1 %v8218_v23  ;;  %v5194_v22 = vmax.f32 %v7166_v17, 0.0  ;;  %v8308_v17 = vld [vmem:[#allocation8 + $0x1c0] sm:$0xff]  }
 0x2d6   :  { %4977 = vmatprep.subr.bf16.mxu0 %v8223_v24  ;;  %5141 = vmatprep.subr.bf16.mxu1 %v8226_v30  ;;  %v8277_v24 = vld [vmem:[#allocation8] sm:$0xff]  }
 0x2d7   :  { %v8278_v30 = vld [vmem:[#allocation8 + $0x80] sm:$0xff]  }
 0x2d9   :  { %4978 = vmatpush1.bf16.msra.mxu0 %v8221_v25  ;;  %5142 = vmatpush1.bf16.msra.mxu1 %v8224_v27  ;;  %v5206_v25 = vpack.c.bf16 %v5194_v22, %v5194_v22  ;;  %v8280_v27 = vld [vmem:[#allocation8 + $0xc8] sm:$0xff]  }
 0x2da   :  { %4988 = vmatprep.subr.bf16.mxu0 %v8229_v28  ;;  %5152 = vmatprep.subr.bf16.mxu1 %v8232_v29  ;;  %v8376_v28 = vld [vmem:[#allocation2 + $0x18] ss:$0 sps:$4 sm:$0xff]   ;;  %v8281_v29 = vld [vmem:[#allocation8 + $0x8] sm:$0xff]  }
 0x2db   :  { %v8312_v22 = vld [vmem:[#allocation8 + $0x1c8] sm:$0xff]  }
 0x2dc   :  { %4980 = vmatmul.mubr.bf16.vlgmr.msra.gmra.mrb[8].mxu0 %v8650_v19  ;;  %5144 = vmatmul.mubr.bf16.vlgmr.msra.gmra.mrb[8].mxu1 %v8650_v19  ;;  %v8250_v19 = vld [vmem:[#allocation5 + $0x134c] ss:$48 sps:$4 sm:$0xff]  }
 0x2dd   :  { %4989 = vmatpush1.bf16.msra.mxu0 %v8227_v32  ;;  %5153 = vmatpush1.bf16.msra.mxu1 %v8230_v33  ;;  %v8282_v32 = vld [vmem:[#allocation8 + $0x88] sm:$0xff]   ;;  %v8283_v33 = vld [vmem:[#allocation8 + $0x50] sm:$0xff]  }
 0x2de   :  { %4990 = vmatprep.subr.bf16.mxu0 %v8235_v10  ;;  %5154 = vmatprep.subr.bf16.mxu1 %v8238_v34  ;;  %v8284_v10 = vld [vmem:[#allocation8 + $0xd0] sm:$0xff]  }
 0x2df   :  { %5020 = vmatprep.mubr.bf16.mxu0 %v8526_v26  ;;  %5184 = vmatprep.mubr.bf16.mxu1 %v8526_v26  ;;  %v8251_v26 = vld [vmem:[#allocation5 + $0x13a0] ss:$48 sps:$4 sm:$0xff]  }
 0x2e0   :  { %v8285_v34 = vld [vmem:[#allocation8 + $0x10] sm:$0xff]  }
 0x2e1   :  { %4991 = vmatpush1.bf16.msra.mxu0 %v8233_v35  ;;  %5155 = vmatpush1.bf16.msra.mxu1 %v8236_v37  ;;  %v8286_v35 = vld [vmem:[#allocation8 + $0x90] sm:$0xff]   ;;  %v8287_v37 = vld [vmem:[#allocation8 + $0x58] sm:$0xff]  }
 0x2e2   :  { %4992 = vmatprep.subr.bf16.mxu0 %v8241_v38  ;;  %5156 = vmatprep.subr.bf16.mxu1 %v8244_v39  ;;  %v8288_v38 = vld [vmem:[#allocation8 + $0xd8] sm:$0xff]  }
 0x2e3   :  { %v8289_v39 = vld [vmem:[#allocation8 + $0x18] sm:$0xff]  }
 0x2e5   :  { %4993 = vmatpush1.bf16.msra.mxu0 %v8239_v15  ;;  %5157 = vmatpush1.bf16.msra.mxu1 %v8242_v40  ;;  %v8290_v15 = vld [vmem:[#allocation8 + $0x98] sm:$0xff]   ;;  %v8291_v40 = vld [vmem:[#allocation8 + $0x60] sm:$0xff]  }
 0x2e6   :  { %4994 = vmatprep.subr.bf16.mxu0 %v8247_v45  ;;  %5158 = vmatprep.subr.bf16.mxu1 %v8250_v19  ;;  %v8292_v45 = vld [vmem:[#allocation8 + $0xe0] sm:$0xff]  }
 0x2e7   :  { %v8293_v19 = vld [vmem:[#allocation8 + $0x20] sm:$0xff]  }
 0x2e9   :  { %4995 = vmatpush1.bf16.msra.mxu0 %v8245_v46  ;;  %5159 = vmatpush1.bf16.msra.mxu1 %v8248_v47  ;;  %v766_v46 = vsub.s32 0, %v8684_v13  ;;  %v8294_v47 = vld [vmem:[#allocation8 + $0xa0] sm:$0xff]  }
 0x2ea   :  { %4996 = vmatprep.subr.bf16.mxu0 %v8253_v49  ;;  %5160 = vmatprep.subr.bf16.mxu1 %v8256_v50  ;;  %v8295_v49 = vld [vmem:[#allocation8 + $0x68] sm:$0xff]   ;;  %v774_v50 = vsub.s32 2, %v8684_v13 }
 0x2ed   :  { %4997 = vmatpush1.bf16.msra.mxu0 %v8251_v26  ;;  %5161 = vmatpush1.bf16.msra.mxu1 %v8254_v52  ;;  %v786_v26 = vsub.s32 5, %v8684_v13  ;;  %v794_v52 = vsub.s32 7, %v8684_v13 }
 0x2ee   :  { %4998 = vmatprep.subr.bf16.mxu0 %v8259_v53  ;;  %5162 = vmatprep.subr.bf16.mxu1 %v8262_v54  ;;  %v8297_v53 = vld [vmem:[#allocation8 + $0x28] sm:$0xff]   ;;  %v767_v54 = vrot.slane %v8687_v31, %v766_v46 }
 0x2ef   :  { %v4694_v63 = vpop.f32.mrb[4].mxu0  ;;  %v4858_v0 = vpop.f32.mrb[4].mxu1  ;;  %v795_v62 = vrot.slane %v8687_v31, %v794_v52  ;;  %v8337_v52 = vld [vmem:[#allocation8 + $0x138] sm:$0xff]  }
 0x2f0   :  { %v8710_v2 = vadd.f32 %v4694_v63, %v783_v57  ;;  %v8713_v3 = vadd.f32 %v4858_v0, %v8690_v36  ;;  %v8715_v4 = vpop.f32.mrb[5].mxu0  ;;  %v8717_v6 = vpop.f32.mrb[5].mxu1  ;;  %v7168_v36 = vadd.f32 %v8676_v44, %v779_v1  ;;  %v8298_v57 = vld [vmem:[#allocation8 + $0xa8] sm:$0xff]   ;;  %v8301_v63 = vld [vmem:[#allocation8 + $0x30] sm:$0xff]   ;;  %v7165_v0 = vadd.f32 %v8670_v41, %v767_v54  ;;  %v8338_v54 = vld [vmem:[#allocation8 + $0x1b8] sm:$0xff]  }
 0x2f1   :  { %v4698_v7 = vpop.f32.mrb[6].mxu0  ;;  %v4862_v8 = vpop.f32.mrb[6].mxu1  ;;  %4999 = vmatpush1.bf16.msra.mxu0 %v8257_v58  ;;  %5163 = vmatpush1.bf16.msra.mxu1 %v8260_v59  ;;  %v8299_v58 = vld [vmem:[#allocation8 + $0x70] sm:$0xff]   ;;  %v775_v59 = vrot.slane %v8687_v31, %v774_v50 }
 0x2f2   :  { %v4699_v12 = vpop.f32.mrb[7].mxu0  ;;  %v4863_v14 = vpop.f32.mrb[7].mxu1  ;;  %5000 = vmatprep.subr.bf16.mxu0 %v8265_v60  ;;  %5164 = vmatprep.subr.bf16.mxu1 %v8268_v61  ;;  %v5196_v23 = vmax.f32 %v7168_v36, 0.0  ;;  %v8300_v60 = vld [vmem:[#allocation8 + $0xf0] sm:$0xff]   ;;  %v787_v61 = vrot.slane %v8687_v31, %v786_v26  ;;  %v8303_v7 = vld [vmem:[#allocation8 + $0x78] sm:$0xff]  }
 0x2f3   :  { %v8302_v1 = vld [vmem:[#allocation8 + $0xb0] sm:$0xff]   ;;  %v7167_v8 = vadd.f32 %v8672_v42, %v775_v59  ;;  %v7172_v12 = vadd.f32 %v8717_v6, %v795_v62  ;;  %v8305_v14 = vld [vmem:[#allocation8 + $0x38] sm:$0xff]   ;;  %v8309_v42 = vld [vmem:[#allocation8 + $0x100] sm:$0xff]  }
 0x2f4   :  { %v5208_v44 = vpack.c.bf16 %v5196_v23, %v5196_v23  ;;  %v8306_v31 = vld [vmem:[#allocation8 + $0xb8] sm:$0xff]   ;;  %v8311_v6 = vld [vmem:[#allocation8 + $0x148] sm:$0xff]   ;;  %v8340_v59 = vld [vmem:[#allocation8 + $0x2c0] sm:$0xff]  }
 0x2f5   :  { %5001 = vmatpush1.bf16.msra.mxu0 %v8263_v9  ;;  %5165 = vmatpush1.bf16.msra.mxu1 %v8266_v11  ;;  %v8304_v9 = vld [vmem:[#allocation8 + $0xf8] sm:$0xff]   ;;  %v7170_v11 = vadd.f32 %v8715_v4, %v787_v61  ;;  %v5195_v41 = vmax.f32 %v7167_v8, 0.0  ;;  %v8310_v4 = vld [vmem:[#allocation8 + $0x180] sm:$0xff]   ;;  %v8348_v8 = vld [vmem:[#allocation8 + $0x2d0] sm:$0xff]  }
 0x2f6   :  { %5002 = vmatprep.subr.bf16.mxu0 %v8271_v48  ;;  %5166 = vmatprep.subr.bf16.mxu1 %v8274_v16  ;;  %v5193_v48 = vmax.f32 %v7165_v0, 0.0  ;;  %v8307_v16 = vld [vmem:[#allocation8 + $0x140] sm:$0xff]   ;;  %v8336_v26 = vld [vmem:[#allocation8 + $0x1f8] sm:$0xff]  }
 0x2f7   :  { %v5198_v36 = vmax.f32 %v7170_v11, 0.0  ;;  %v8342_v62 = vld [vmem:[#allocation8 + $0x280] sm:$0xff]   ;;  %v8350_v11 = vld [vmem:[#allocation8 + $0x290] sm:$0xff]  }
 0x2f9   :  { %5003 = vmatpush1.bf16.msra.mxu0 %v8269_v18  ;;  %5167 = vmatpush1.bf16.msra.mxu1 %v8272_v5  ;;  %v5200_v18 = vmax.f32 %v7172_v12, 0.0  ;;  %v5205_v5 = vpack.c.bf16 %v5193_v48, %v5193_v48  ;;  %v8351_v12 = vld [vmem:[#allocation8 + $0x258] sm:$0xff]  }
 0x2fa   :  { %7033 = vmatprep.subr.bf16.mxu0 %v8275_v20  ;;  %7055 = vmatprep.subr.bf16.mxu1 %v8276_v21  ;;  %v5207_v20 = vpack.c.bf16 %v5195_v41, %v5195_v41  ;;  %v5210_v21 = vpack.c.bf16 %v5198_v36, %v5198_v36  ;;  %v8353_v48 = vld [vmem:[#allocation8 + $0x218] sm:$0xff]   ;;  %v8356_v41 = vld [vmem:[#allocation8 + $0x2e0] sm:$0xff]  }
 0x2fb   :  { %v5212_v23 = vpack.c.bf16 %v5200_v18, %v5200_v18  ;;  %v8358_v36 = vld [vmem:[#allocation8 + $0x2a0] sm:$0xff]   ;;  %v8359_v18 = vld [vmem:[#allocation8 + $0x268] sm:$0xff]  }
 0x2fc   :  { %5021 = vmatmul.mubr.bf16.vlgmr.msra.gmra.mrb[8].mxu0 %v8376_v28  ;;  %5185 = vmatmul.mubr.bf16.vlgmr.msra.gmra.mrb[8].mxu1 %v8376_v28  ;;  %v8319_v28 = vld [vmem:[#allocation8 + $0x158] sm:$0xff]  }
 0x2fd   :  { %7034 = vmatpush3.bf16.msra.mxu0 %v8277_v24  ;;  %6024 = vmatprep.mubr.bf16.mxu0 %v5206_v25  ;;  %v8313_v24 = vld [vmem:[#allocation8 + $0x108] sm:$0xff]   ;;  %v8315_v25 = vld [vmem:[#allocation8 + $0x150] sm:$0xff]  }
 0x2fe   :  { %7056 = vmatpush3.bf16.msra.mxu1 %v8278_v30  ;;  %6064 = vmatprep.mubr.bf16.mxu1 %v5208_v44  ;;  %v8314_v30 = vld [vmem:[#allocation8 + $0x188] sm:$0xff]   ;;  %v8318_v44 = vld [vmem:[#allocation8 + $0x190] sm:$0xff]  }
 0x2ff   :  { %7035 = vmatprep.subr.bf16.mxu0 %v8279_v43  ;;  %7057 = vmatprep.subr.bf16.mxu1 %v8280_v27  ;;  %v8316_v43 = vld [vmem:[#allocation8 + $0x1d0] sm:$0xff]  }
 0x300   :  { %v8317_v27 = vld [vmem:[#allocation8 + $0x110] sm:$0xff]  }
 0x301   :  { %7036 = vmatpush3.bf16.msra.mxu0 %v8281_v29  ;;  %v8320_v29 = vld [vmem:[#allocation8 + $0x1d8] sm:$0xff]  }
 0x302   :  { %7058 = vmatpush3.bf16.msra.mxu1 %v8282_v32  ;;  %7037 = vmatprep.subr.bf16.mxu0 %v8283_v33  ;;  %v8321_v32 = vld [vmem:[#allocation8 + $0x118] sm:$0xff]  }
 0x303   :  { %7059 = vmatprep.subr.bf16.mxu1 %v8284_v10  ;;  %v8322_v33 = vld [vmem:[#allocation8 + $0x198] sm:$0xff]   ;;  %v8323_v10 = vld [vmem:[#allocation8 + $0x160] sm:$0xff]  }
 0x305   :  { %7038 = vmatpush3.bf16.msra.mxu0 %v8285_v34  ;;  %v8324_v34 = vld [vmem:[#allocation8 + $0x1e0] sm:$0xff]  }
 0x306   :  { %7060 = vmatpush3.bf16.msra.mxu1 %v8286_v35  ;;  %7039 = vmatprep.subr.bf16.mxu0 %v8287_v37  ;;  %v8325_v35 = vld [vmem:[#allocation8 + $0x120] sm:$0xff]  }
 0x307   :  { %7061 = vmatprep.subr.bf16.mxu1 %v8288_v38  ;;  %v8326_v37 = vld [vmem:[#allocation8 + $0x1a0] sm:$0xff]   ;;  %v8327_v38 = vld [vmem:[#allocation8 + $0x168] sm:$0xff]  }
 0x309   :  { %7040 = vmatpush3.bf16.msra.mxu0 %v8289_v39  ;;  %v8328_v39 = vld [vmem:[#allocation8 + $0x1e8] sm:$0xff]  }
 0x30a   :  { %7062 = vmatpush3.bf16.msra.mxu1 %v8290_v15  ;;  %7041 = vmatprep.subr.bf16.mxu0 %v8291_v40  ;;  %v8329_v15 = vld [vmem:[#allocation8 + $0x128] sm:$0xff]  }
 0x30b   :  { %7063 = vmatprep.subr.bf16.mxu1 %v8292_v45  ;;  %v8330_v40 = vld [vmem:[#allocation8 + $0x1a8] sm:$0xff]   ;;  %v8331_v45 = vld [vmem:[#allocation8 + $0x170] sm:$0xff]  }
 0x30d   :  { %7042 = vmatpush3.bf16.msra.mxu0 %v8293_v19  ;;  %v8332_v19 = vld [vmem:[#allocation8 + $0x1f0] sm:$0xff]  }
 0x30e   :  { %7064 = vmatpush3.bf16.msra.mxu1 %v8294_v47  ;;  %7043 = vmatprep.subr.bf16.mxu0 %v8295_v49  ;;  %v8333_v47 = vld [vmem:[#allocation8 + $0x130] sm:$0xff]  }
 0x30f   :  { %7065 = vmatprep.subr.bf16.mxu1 %v8296_v51  ;;  %v8334_v49 = vld [vmem:[#allocation8 + $0x1b0] sm:$0xff]   ;;  %v8335_v51 = vld [vmem:[#allocation8 + $0x178] sm:$0xff]  }
 0x311   :  { %7044 = vmatpush3.bf16.msra.mxu0 %v8297_v53  ;;  %v5197_v53 = vmax.f32 %v8710_v2, 0.0  ;;  %v8345_v2 = vld [vmem:[#allocation8 + $0x208] sm:$0xff]  }
 0x312   :  { %7066 = vmatpush3.bf16.msra.mxu1 %v8298_v57  ;;  %7045 = vmatprep.subr.bf16.mxu0 %v8299_v58  ;;  %v8339_v57 = vld [vmem:[#allocation8 + $0x240] sm:$0xff]   ;;  %v5199_v58 = vmax.f32 %v8713_v3, 0.0  ;;  %v8347_v3 = vld [vmem:[#allocation8 + $0x250] sm:$0xff]  }
 0x313   :  { %7067 = vmatprep.subr.bf16.mxu1 %v8300_v60  ;;  %v8341_v60 = vld [vmem:[#allocation8 + $0x200] sm:$0xff]   ;;  %v5209_v61 = vpack.c.bf16 %v5197_v53, %v5197_v53 }
 0x314   :  { %v5211_v0 = vpack.c.bf16 %v5199_v58, %v5199_v58  ;;  %v6935_v53 = vld [vmem:[#allocation10] ss:$0 sm:$0xff] }
 0x315   :  { %7046 = vmatpush3.bf16.msra.mxu0 %v8301_v63  ;;  %v8343_v63 = vld [vmem:[#allocation8 + $0x248] sm:$0xff]  }
 0x316   :  { %7068 = vmatpush3.bf16.msra.mxu1 %v8302_v1  ;;  %7047 = vmatprep.subr.bf16.mxu0 %v8303_v7  ;;  %v8344_v1 = vld [vmem:[#allocation8 + $0x2c8] sm:$0xff]  }
 0x317   :  { %7069 = vmatprep.subr.bf16.mxu1 %v8304_v9  ;;  %v8346_v7 = vld [vmem:[#allocation8 + $0x288] sm:$0xff]   ;;  %v8349_v9 = vld [vmem:[#allocation8 + $0x210] sm:$0xff]  }
 0x319   :  { %7048 = vmatpush3.bf16.msra.mxu0 %v8305_v14  ;;  %v8352_v14 = vld [vmem:[#allocation8 + $0x2d8] sm:$0xff]  }
 0x31a   :  { %7070 = vmatpush3.bf16.msra.mxu1 %v8306_v31  ;;  %7077 = vmatprep.subr.bf16.mxu0 %v8307_v16  ;;  %v8354_v31 = vld [vmem:[#allocation8 + $0x298] sm:$0xff]   ;;  %v8355_v16 = vld [vmem:[#allocation8 + $0x260] sm:$0xff]  }
 0x31b   :  { %7099 = vmatprep.subr.bf16.mxu1 %v8308_v17  ;;  %v8357_v17 = vld [vmem:[#allocation8 + $0x220] sm:$0xff]  }
 0x31c   :  { %6025 = vmatmul.mubr.bf16.vlgmr.msra.gmra.mrb[12].mxu0 %v5205_v5  ;;  %v8361_v5 = vld [vmem:[#allocation8 + $0x228] sm:$0xff]  }
 0x31d   :  { %6065 = vmatmul.mubr.bf16.vlgmr.msra.gmra.mrb[12].mxu1 %v5207_v20  ;;  %7078 = vmatpush3.bf16.msra.mxu0 %v8309_v42  ;;  %v8360_v42 = vld [vmem:[#allocation8 + $0x2e8] sm:$0xff]   ;;  %v8363_v20 = vld [vmem:[#allocation8 + $0x270] sm:$0xff]  }
 0x31e   :  { %6104 = vmatprep.mubr.bf16.mxu0 %v5210_v21  ;;  %7100 = vmatpush3.bf16.msra.mxu1 %v8310_v4  ;;  %v8362_v4 = vld [vmem:[#allocation8 + $0x2a8] sm:$0xff]   ;;  %v8365_v21 = vld [vmem:[#allocation8 + $0x230] sm:$0xff]  }
 0x31f   :  { %6144 = vmatprep.mubr.bf16.mxu1 %v5212_v23  ;;  %7079 = vmatprep.subr.bf16.mxu0 %v8311_v6  ;;  %v8364_v6 = vld [vmem:[#allocation8 + $0x2f0] sm:$0xff]   ;;  %v8367_v23 = vld [vmem:[#allocation8 + $0x278] sm:$0xff]  }
 0x320   :  { %7101 = vmatprep.subr.bf16.mxu1 %v8312_v22  ;;  %v8366_v22 = vld [vmem:[#allocation8 + $0x2b0] sm:$0xff]  }
 0x321   :  { %7080 = vmatpush3.bf16.msra.mxu0 %v8313_v24  ;;  %v8368_v24 = vld [vmem:[#allocation8 + $0x2f8] sm:$0xff]  }
 0x322   :  { %7102 = vmatpush3.bf16.msra.mxu1 %v8314_v30  ;;  %7081 = vmatprep.subr.bf16.mxu0 %v8315_v25  ;;  %v8369_v30 = vld [vmem:[#allocation8 + $0x238] sm:$0xff]  }
 0x323   :  { %7103 = vmatprep.subr.bf16.mxu1 %v8316_v43  ;;  %v8370_v25 = vld [vmem:[#allocation8 + $0x2b8] sm:$0xff]  }
 0x324   :  { %v761_v43 = vld [vmem:[#allocation7 + $0x8] sm:$0xf] }
 0x325   :  { %7082 = vmatpush3.bf16.msra.mxu0 %v8317_v27  ;;  %v799_v27 = vrot.slane %v761_v43, %v766_v46 }
 0x326   :  { %7104 = vmatpush3.bf16.msra.mxu1 %v8318_v44  ;;  %7083 = vmatprep.subr.bf16.mxu0 %v8319_v28  ;;  %v807_v44 = vrot.slane %v761_v43, %v774_v50  ;;  %v803_v28 = vrot.slane %v761_v43, %v770_v55 }
 0x327   :  { %7105 = vmatprep.subr.bf16.mxu1 %v8320_v29  ;;  %v811_v29 = vrot.slane %v761_v43, %v778_v56 }
 0x329   :  { %7084 = vmatpush3.bf16.msra.mxu0 %v8321_v32 }
 0x32a   :  { %7106 = vmatpush3.bf16.msra.mxu1 %v8322_v33  ;;  %7085 = vmatprep.subr.bf16.mxu0 %v8323_v10 }
 0x32b   :  { %7107 = vmatprep.subr.bf16.mxu1 %v8324_v34 }
 0x32d   :  { %7086 = vmatpush3.bf16.msra.mxu0 %v8325_v35 }
 0x32e   :  { %7108 = vmatpush3.bf16.msra.mxu1 %v8326_v37  ;;  %7087 = vmatprep.subr.bf16.mxu0 %v8327_v38 }
 0x32f   :  { %7109 = vmatprep.subr.bf16.mxu1 %v8328_v39 }
 0x331   :  { %7088 = vmatpush3.bf16.msra.mxu0 %v8329_v15 }
 0x332   :  { %7110 = vmatpush3.bf16.msra.mxu1 %v8330_v40  ;;  %7089 = vmatprep.subr.bf16.mxu0 %v8331_v45 }
 0x333   :  { %7111 = vmatprep.subr.bf16.mxu1 %v8332_v19 }
 0x335   :  { %7090 = vmatpush3.bf16.msra.mxu0 %v8333_v47 }
 0x336   :  { %7112 = vmatpush3.bf16.msra.mxu1 %v8334_v49  ;;  %7091 = vmatprep.subr.bf16.mxu0 %v8335_v51 }
 0x337   :  { %7113 = vmatprep.subr.bf16.mxu1 %v8336_v26 }
 0x339   :  { %7092 = vmatpush3.bf16.msra.mxu0 %v8337_v52 }
 0x33a   :  { %7114 = vmatpush3.bf16.msra.mxu1 %v8338_v54  ;;  %7121 = vmatprep.subr.bf16.mxu0 %v8339_v57 }
 0x33b   :  { %7143 = vmatprep.subr.bf16.mxu1 %v8340_v59 }
 0x33c   :  { %6105 = vmatmul.mubr.bf16.vlgmr.msra.gmra.mrb[16].mxu0 %v5209_v61 }
 0x33d   :  { %6145 = vmatmul.mubr.bf16.vlgmr.msra.gmra.mrb[16].mxu1 %v5211_v0  ;;  %7122 = vmatpush3.bf16.msra.mxu0 %v8341_v60 }
 0x33e   :  { %7144 = vmatpush3.bf16.msra.mxu1 %v8342_v62  ;;  %7123 = vmatprep.subr.bf16.mxu0 %v8343_v63 }
 0x33f   :  { %7145 = vmatprep.subr.bf16.mxu1 %v8344_v1 }
 0x341   :  { %7124 = vmatpush3.bf16.msra.mxu0 %v8345_v2 }
 0x342   :  { %7146 = vmatpush3.bf16.msra.mxu1 %v8346_v7  ;;  %7125 = vmatprep.subr.bf16.mxu0 %v8347_v3 }
 0x343   :  { %7147 = vmatprep.subr.bf16.mxu1 %v8348_v8 }
 0x345   :  { %7126 = vmatpush3.bf16.msra.mxu0 %v8349_v9 }
 0x346   :  { %7148 = vmatpush3.bf16.msra.mxu1 %v8350_v11  ;;  %7127 = vmatprep.subr.bf16.mxu0 %v8351_v12 }
 0x347   :  { %7149 = vmatprep.subr.bf16.mxu1 %v8352_v14 }
 0x349   :  { %7128 = vmatpush3.bf16.msra.mxu0 %v8353_v48 }
 0x34a   :  { %7150 = vmatpush3.bf16.msra.mxu1 %v8354_v31  ;;  %7129 = vmatprep.subr.bf16.mxu0 %v8355_v16 }
 0x34b   :  { %7151 = vmatprep.subr.bf16.mxu1 %v8356_v41 }
 0x34d   :  { %7130 = vmatpush3.bf16.msra.mxu0 %v8357_v17 }
 0x34e   :  { %7152 = vmatpush3.bf16.msra.mxu1 %v8358_v36  ;;  %7131 = vmatprep.subr.bf16.mxu0 %v8359_v18 }
 0x34f   :  { %7153 = vmatprep.subr.bf16.mxu1 %v8360_v42 }
 0x351   :  { %7132 = vmatpush3.bf16.msra.mxu0 %v8361_v5 }
 0x352   :  { %7154 = vmatpush3.bf16.msra.mxu1 %v8362_v4  ;;  %7133 = vmatprep.subr.bf16.mxu0 %v8363_v20 }
 0x353   :  { %7155 = vmatprep.subr.bf16.mxu1 %v8364_v6 }
 0x355   :  { %7134 = vmatpush3.bf16.msra.mxu0 %v8365_v21 }
 0x356   :  { %7156 = vmatpush3.bf16.msra.mxu1 %v8366_v22  ;;  %7135 = vmatprep.subr.bf16.mxu0 %v8367_v23 }
 0x357   :  { %7157 = vmatprep.subr.bf16.mxu1 %v8368_v24 }
 0x359   :  { %7136 = vmatpush3.bf16.msra.mxu0 %v8369_v30 }
 0x35a   :  { %7158 = vmatpush3.bf16.msra.mxu1 %v8370_v25 }
 0x3cf   :  { %v5022_v32 = vpop.f32.mrb[8].mxu0  ;;  %v5186_v33 = vpop.f32.mrb[8].mxu1 }
 0x3d0   :  { %v7173_v10 = vadd.f32 %v5022_v32, %v799_v27  ;;  %v7175_v34 = vadd.f32 %v5186_v33, %v807_v44  ;;  %v5024_v35 = vpop.f32.mrb[9].mxu0  ;;  %v5188_v37 = vpop.f32.mrb[9].mxu1 }
 0x3d1   :  { %v7174_v38 = vadd.f32 %v5024_v35, %v803_v28  ;;  %v7176_v39 = vadd.f32 %v5188_v37, %v811_v29  ;;  %v5026_v15 = vpop.f32.mrb[10].mxu0  ;;  %v5190_v40 = vpop.f32.mrb[10].mxu1 }
 0x3d2   :  { %v5201_v46 = vmax.f32 %v7173_v10, 0.0  ;;  %v5203_v45 = vmax.f32 %v7175_v34, 0.0  ;;  %v5027_v19 = vpop.f32.mrb[11].mxu0  ;;  %v5191_v50 = vpop.f32.mrb[11].mxu1 }
 0x3d3   :  { %v5202_v47 = vmax.f32 %v7174_v38, 0.0  ;;  %v5204_v49 = vmax.f32 %v7176_v39, 0.0 }
 0x3d4   :  { %v5213_v13 = vpack.c.bf16 %v5201_v46, %v5201_v46  ;;  %v5215_v56 = vpack.c.bf16 %v5203_v45, %v5203_v45 }
 0x3d5   :  { %v5214_v55 = vpack.c.bf16 %v5202_v47, %v5202_v47  ;;  %v5216_v51 = vpack.c.bf16 %v5204_v49, %v5204_v49 }
 0x3d7   :  { %6184 = vmatprep.mubr.bf16.mxu0 %v5214_v55  ;;  %6224 = vmatprep.mubr.bf16.mxu1 %v5216_v51 }
 0x3d8   :  { %6185 = vmatmul.mubr.bf16.vlgmr.msra.gmra.mrb[20].mxu0 %v5213_v13  ;;  %6225 = vmatmul.mubr.bf16.vlgmr.msra.gmra.mrb[20].mxu1 %v5215_v56 }
 0x3ef   :  { %v7049_v26 = vpop.f32.mrb[12].mxu0 }
 0x3f0   :  { %v7071_v52 = vpop.f32.mrb[12].mxu1  ;;  %v7050_v54 = vpop.f32.mrb[13].mxu0 }
 0x3f1   :  { %v7051_v57 = vadd.f32 %v7050_v54, %v7049_v26  ;;  %v7072_v58 = vpop.f32.mrb[13].mxu1  ;;  %v7052_v59 = vpop.f32.mrb[14].mxu0 }
 0x3f2   :  { %v7073_v60 = vadd.f32 %v7072_v58, %v7071_v52  ;;  %v7074_v61 = vpop.f32.mrb[14].mxu1  ;;  %v7053_v62 = vpop.f32.mrb[15].mxu0 }
 0x3f3   :  { %v6027_v63 = vadd.f32 %v7051_v57, %v6935_v53  ;;  %v7075_v0 = vpop.f32.mrb[15].mxu1 }
 0x3f5   :  { %v6067_v1 = vadd.f32 %v7073_v60, %v6027_v63 }
 0x40f   :  { %v7093_v2 = vpop.f32.mrb[16].mxu0 }
 0x410   :  { %v7115_v7 = vpop.f32.mrb[16].mxu1  ;;  %v7094_v3 = vpop.f32.mrb[17].mxu0 }
 0x411   :  { %v7095_v8 = vadd.f32 %v7094_v3, %v7093_v2  ;;  %v7116_v9 = vpop.f32.mrb[17].mxu1  ;;  %v7096_v11 = vpop.f32.mrb[18].mxu0 }
 0x412   :  { %v7117_v12 = vadd.f32 %v7116_v9, %v7115_v7  ;;  %v7118_v14 = vpop.f32.mrb[18].mxu1  ;;  %v7097_v48 = vpop.f32.mrb[19].mxu0 }
 0x413   :  { %v6107_v31 = vadd.f32 %v7095_v8, %v6067_v1  ;;  %v7119_v16 = vpop.f32.mrb[19].mxu1 }
 0x415   :  { %v6147_v41 = vadd.f32 %v7117_v12, %v6107_v31 }
 0x4ab   :  { %v7137_v17 = vpop.f32.mrb[20].mxu0  ;;  %v7159_v36 = vpop.f32.mrb[20].mxu1 }
 0x4ac   :  { %v7138_v18 = vpop.f32.mrb[21].mxu0  ;;  %v7160_v42 = vpop.f32.mrb[21].mxu1 }
 0x4ad   :  { %v7139_v5 = vadd.f32 %v7138_v18, %v7137_v17  ;;  %v7161_v4 = vadd.f32 %v7160_v42, %v7159_v36  ;;  %v7140_v20 = vpop.f32.mrb[22].mxu0  ;;  %v7162_v6 = vpop.f32.mrb[22].mxu1 }
 0x4ae   :  { %v7141_v21 = vpop.f32.mrb[23].mxu0  ;;  %v7163_v22 = vpop.f32.mrb[23].mxu1 }
 0x4af   :  { %v6187_v23 = vadd.f32 %v7139_v5, %v6147_v41 }
 0x4b1   :  { %v6227_v24 = vadd.f32 %v7161_v4, %v6187_v23 }
 0x4b3   :  { %v7032_v30 = vmul.f32 -1.442695, %v6227_v24 }
 0x4b5   :  { %8371 = vpow2.f32 %v7032_v30 }
 0x4bf   :  { %v8372_v25 = vpop.eup %8371 }
 0x4c0   :  { %v6235_v43 = vadd.f32 1.0, %v8372_v25 }
 0x4c2   :  { %8373 = vrcp.f32 %v6235_v43 }
 0x4cc   :  { %v8374_v27 = vpop.eup %8373 }
 0x4cd   :  { %6238 = vst [vmem:[#allocation11] sm:$0xff] %v8374_v27 }
 0x4ce   :  { %8498 = shalt.err (!%p8495_p2)
}
 0x4cf   :  { %s8499_s6 = scalar_lea.hbm %s8764_s5, 128 }
 0x4d0   :  { %p8500_p3 = scmp.ne.s32.totalorder %s8764_s5, %s8499_s6  ;;  %p8503_p4 = scmp.lt.u32.totalorder %s8499_s6, %s8764_s5 }
 0x4d2   :  { %p8505_p5 = pnand %p8503_p4, %p8500_p3 }
 0x4d4   :  { %8508 = shalt.err (!%p8505_p5)
}
 0x4d5   :  { %6248 = dma.vmem_to_hbm [thread:$0]  %s6246_s28, 128, %s8764_s5, [#allocation4]  }
 0x4d6   :  { %8515 = dma.done.wait [#allocation4], 128  }
 0x4d7   :  { %8516 = vsyncadd [#allocation4], 4294967168 }
 0x4d8   :  { %6252 = vsyncpa [#allocation3], 1 }
 0x4d9   :  { %6253 = vsyncpa [#allocation6], 1 }
 0x4da   :  { %6254 = vsyncpa [#allocation9], 1 }
 0x4db   :  { %6255 = vsyncpa [#allocation4], 1 }

</bundles_post_ra>
